<compile_context>
chip_gen: v6e
topology: v6e:2x2x1
jax: 0.10.0
libtpu: 0.0.40
codegen_flags: <defaults>
</compile_context>

<pallas_src>
import functools

import jax
import jax.numpy as jnp
from jax.experimental import pallas as pl
from jax.experimental.pallas import tpu as pltpu


def mlp_kernel(x_ref, w12_ref, b12_ref, w3_ref, b3_ref, w4t_ref, b4_ref,
               o_ref):
    # x: (bn, 13) row-major; weights are tiny and resident in VMEM.
    x = x_ref[...]

    # Fused linear1+linear2 (exact: no nonlinearity between them), then relu.
    h = jnp.dot(x, w12_ref[...],
                preferred_element_type=jnp.float32) + b12_ref[...]   # (bn, 32)
    h = jnp.maximum(h, 0.0)

    h = jnp.dot(h, w3_ref[...],
                preferred_element_type=jnp.float32) + b3_ref[...]    # (bn, 16)
    h = jnp.maximum(h, 0.0)

    # linear4 (out_dim == 1): broadcast-multiply on the VPU + cross-lane
    # reduce on the XLU instead of a 1-column MXU matmul.
    h = jnp.sum(h * w4t_ref[...], axis=-1, keepdims=True) + b4_ref[...]  # (bn,1)

    # Exact, sign-stable sigmoid: exp on the EUP, exact f32 division.
    # For h << 0: exp(-h) -> inf and 1/(1+inf) -> 0 (no NaN).
    o_ref[...] = 1.0 / (1.0 + jnp.exp(-h))


def prepare_params(params):
    """One-time (outside jit) parameter prep: fuse linear1+linear2 and
    pre-transpose the last-layer weight row."""
    (w1, b1), (w2, b2), (w3, b3), (w4, b4) = params
    w12 = w1 @ w2                  # (13, 32)
    b12 = b1 @ w2 + b2             # (1, 32)
    return (w12, b12, w3, b3, w4.T, b4)   # w4.T: (1, 16), b4: (1, 1)


@functools.partial(jax.jit, static_argnames=("block_n",))
def mlp_forward(x, prepared, block_n=None):
    """x: (N, 13) float32 -> (N, 1) float32 (sigmoid outputs).

    block_n: rows per grid step (static). Default: single block for N<=16384
    (best on 1-TC v5e/v6e), otherwise 16384-row blocks.  On v7x pass a
    block_n that yields >= 2 grid steps so both TensorCores get work.
    """
    w12, b12, w3, b3, w4t, b4 = prepared
    n, d_in = x.shape
    out_dim = b4.shape[1]

    if block_n is None:
        block_n = n if n <= 16384 else 16384
    block_n = min(block_n, n)

    if block_n < n:
        # Multi-step grid: block must be sublane-aligned; pad only if needed.
        assert block_n % 8 == 0, "block_n must be a multiple of 8"
        n_pad = pl.cdiv(n, block_n) * block_n
    else:
        n_pad = n
    x_in = x if n_pad == n else jnp.pad(x, ((0, n_pad - n), (0, 0)))
    grid = n_pad // block_n

    def full(a):
        shape = a.shape
        return pl.BlockSpec(shape, lambda i, _s=shape: (0,) * len(_s))

    y = pl.pallas_call(
        mlp_kernel,
        out_shape=jax.ShapeDtypeStruct((n_pad, out_dim), jnp.float32),
        grid_spec=pltpu.PrefetchScalarGridSpec(
            num_scalar_prefetch=0,
            grid=(grid,),
            in_specs=[
                pl.BlockSpec((block_n, d_in), lambda i: (i, 0)),
                full(w12), full(b12),
                full(w3), full(b3),
                full(w4t), full(b4),
            ],
            out_specs=pl.BlockSpec((block_n, out_dim), lambda i: (i, 0)),
        ),
        compiler_params=pltpu.CompilerParams(
            dimension_semantics=("parallel",)),
    )(x_in, w12, b12, w3, b3, w4t, b4)

    return y if n_pad == n else y[:n]


def init_params(key, input_dim, output_dim):
    """Deterministic init matching the nn.Linear shapes.
    Stored as (in, out) weights + (1, out) biases."""
    dims = [(input_dim, 32), (32, 32), (32, 16), (16, output_dim)]
    params = []
    for i, (din, dout) in enumerate(dims):
        kw, kb = jax.random.split(jax.random.fold_in(key, i))
        bound = 1.0 / (din ** 0.5)   # same uniform bound PyTorch uses
        w = jax.random.uniform(kw, (din, dout), jnp.float32, -bound, bound)
        b = jax.random.uniform(kb, (1, dout), jnp.float32, -bound, bound)
        params.append((w, b))
    return params


def reference_forward(x, params):
    """Unfused pure-JAX reference matching the PyTorch forward exactly."""
    (w1, b1), (w2, b2), (w3, b3), (w4, b4) = params
    h = x @ w1 + b1
    h = h @ w2 + b2
    h = jnp.maximum(h, 0.0)
    h = h @ w3 + b3
    h = jnp.maximum(h, 0.0)
    h = h @ w4 + b4
    return jax.nn.sigmoid(h)


if __name__ == "__main__":
    key = jax.random.PRNGKey(0)
    input_dim, output_dim = 13, 1   # Boston housing: 13 features -> 1 target
    batch = 1024

    kx, kp = jax.random.split(key)
    x = jax.random.normal(kx, (batch, input_dim), jnp.float32)
    params = init_params(kp, input_dim, output_dim)
    prepared = prepare_params(params)   # W1@W2 fusion done once, outside jit

    y_ref = reference_forward(x, params)

    # Default path: single grid step (no pad, no slice).
    y = jax.block_until_ready(mlp_forward(x, prepared))
    assert y.shape == (batch, output_dim)
    max_err = float(jnp.max(jnp.abs(y - y_ref)))
    assert max_err < 1e-4, f"max abs err {max_err}"

    # Tiled path (e.g. what you'd use on v7x to feed both TensorCores).
    y2 = jax.block_until_ready(mlp_forward(x, prepared, block_n=256))
    max_err2 = float(jnp.max(jnp.abs(y2 - y_ref)))
    assert max_err2 < 1e-4, f"max abs err (tiled) {max_err2}"

    print("KERNEL_OK")
</pallas_src>

<mosaic_0001>
module attributes {stable_mosaic.version = 11 : i64} {
  func.func @mlp_kernel(%arg0: i32, %arg1: memref<1024x13xf32, #tpu.memory_space<vmem>>, %arg2: memref<13x32xf32, #tpu.memory_space<vmem>>, %arg3: memref<1x32xf32, #tpu.memory_space<vmem>>, %arg4: memref<32x16xf32, #tpu.memory_space<vmem>>, %arg5: memref<1x16xf32, #tpu.memory_space<vmem>>, %arg6: memref<1x16xf32, #tpu.memory_space<vmem>>, %arg7: memref<1x1xf32, #tpu.memory_space<vmem>>, %arg8: memref<1024x1xf32, #tpu.memory_space<vmem>>) attributes {dimension_semantics = [#tpu.dimension_semantics<parallel>], iteration_bounds = array<i64: 1>, scalar_prefetch = 0 : i64, scratch_operands = 0 : i64, tpu.core_type = #tpu.core_type<tc>, window_params = [{transform_indices = @transform_0, window_bounds = array<i64: 1024, 13>}, {pipeline_mode = #tpu.pipeline_mode<synchronous>, transform_indices = @transform_1, window_bounds = array<i64: 13, 32>}, {pipeline_mode = #tpu.pipeline_mode<synchronous>, transform_indices = @transform_2, window_bounds = array<i64: 1, 32>}, {pipeline_mode = #tpu.pipeline_mode<synchronous>, transform_indices = @transform_3, window_bounds = array<i64: 32, 16>}, {pipeline_mode = #tpu.pipeline_mode<synchronous>, transform_indices = @transform_4, window_bounds = array<i64: 1, 16>}, {pipeline_mode = #tpu.pipeline_mode<synchronous>, transform_indices = @transform_5, window_bounds = array<i64: 1, 16>}, {pipeline_mode = #tpu.pipeline_mode<synchronous>, transform_indices = @transform_6, window_bounds = array<i64: 1, 1>}, {transform_indices = @transform_7, window_bounds = array<i64: 1024, 1>}]} {
    %c0 = arith.constant 0 : index
    %c0_0 = arith.constant 0 : index
    %0 = vector.load %arg1[%c0, %c0_0] : memref<1024x13xf32, #tpu.memory_space<vmem>>, vector<1024x13xf32>
    %c0_1 = arith.constant 0 : index
    %c0_2 = arith.constant 0 : index
    %1 = vector.load %arg2[%c0_1, %c0_2] : memref<13x32xf32, #tpu.memory_space<vmem>>, vector<13x32xf32>
    %cst = arith.constant dense<0.000000e+00> : vector<1024x32xf32>
    %2 = tpu.matmul %0, %1, %cst {dimension_numbers = #tpu.dot_dimension_numbers<[1], [0], [0], [1], [0, 0, 1, 1], [], []>} : vector<1024x13xf32>, vector<13x32xf32>, vector<1024x32xf32> -> vector<1024x32xf32>
    %c0_3 = arith.constant 0 : index
    %c0_4 = arith.constant 0 : index
    %3 = vector.load %arg3[%c0_3, %c0_4] : memref<1x32xf32, #tpu.memory_space<vmem>>, vector<1x32xf32>
    %4 = vector.broadcast %3 : vector<1x32xf32> to vector<1024x32xf32>
    %5 = arith.addf %2, %4 : vector<1024x32xf32>
    %cst_5 = arith.constant 0.000000e+00 : f32
    %6 = vector.broadcast %cst_5 : f32 to vector<1024x32xf32>
    %7 = arith.maximumf %5, %6 : vector<1024x32xf32>
    %c0_6 = arith.constant 0 : index
    %c0_7 = arith.constant 0 : index
    %8 = vector.load %arg4[%c0_6, %c0_7] : memref<32x16xf32, #tpu.memory_space<vmem>>, vector<32x16xf32>
    %cst_8 = arith.constant dense<0.000000e+00> : vector<1024x16xf32>
    %9 = tpu.matmul %7, %8, %cst_8 {dimension_numbers = #tpu.dot_dimension_numbers<[1], [0], [0], [1], [0, 0, 1, 1], [], []>} : vector<1024x32xf32>, vector<32x16xf32>, vector<1024x16xf32> -> vector<1024x16xf32>
    %c0_9 = arith.constant 0 : index
    %c0_10 = arith.constant 0 : index
    %10 = vector.load %arg5[%c0_9, %c0_10] : memref<1x16xf32, #tpu.memory_space<vmem>>, vector<1x16xf32>
    %11 = vector.broadcast %10 : vector<1x16xf32> to vector<1024x16xf32>
    %12 = arith.addf %9, %11 : vector<1024x16xf32>
    %cst_11 = arith.constant 0.000000e+00 : f32
    %13 = vector.broadcast %cst_11 : f32 to vector<1024x16xf32>
    %14 = arith.maximumf %12, %13 : vector<1024x16xf32>
    %c0_12 = arith.constant 0 : index
    %c0_13 = arith.constant 0 : index
    %15 = vector.load %arg6[%c0_12, %c0_13] : memref<1x16xf32, #tpu.memory_space<vmem>>, vector<1x16xf32>
    %16 = vector.broadcast %15 : vector<1x16xf32> to vector<1024x16xf32>
    %17 = arith.mulf %14, %16 : vector<1024x16xf32>
    %cst_14 = arith.constant dense<0.000000e+00> : vector<1024xf32>
    %18 = vector.multi_reduction <add>, %17, %cst_14 [1] : vector<1024x16xf32> to vector<1024xf32>
    %19 = vector.shape_cast %18 : vector<1024xf32> to vector<1024x1xf32>
    %c0_15 = arith.constant 0 : index
    %c0_16 = arith.constant 0 : index
    %20 = vector.load %arg7[%c0_15, %c0_16] : memref<1x1xf32, #tpu.memory_space<vmem>>, vector<1x1xf32>
    %21 = vector.broadcast %20 : vector<1x1xf32> to vector<1024x1xf32>
    %22 = arith.addf %19, %21 : vector<1024x1xf32>
    %cst_17 = arith.constant 0.000000e+00 : f32
    %23 = vector.broadcast %cst_17 : f32 to vector<1024x1xf32>
    %24 = arith.subf %23, %22 : vector<1024x1xf32>
    %25 = math.exp %24 : vector<1024x1xf32>
    %cst_18 = arith.constant 1.000000e+00 : f32
    %26 = vector.broadcast %cst_18 : f32 to vector<1024x1xf32>
    %27 = arith.addf %26, %25 : vector<1024x1xf32>
    %cst_19 = arith.constant 1.000000e+00 : f32
    %28 = vector.broadcast %cst_19 : f32 to vector<1024x1xf32>
    %29 = arith.divf %28, %27 : vector<1024x1xf32>
    %c0_20 = arith.constant 0 : index
    %c0_21 = arith.constant 0 : index
    %30 = vector.load %arg8[%c0_20, %c0_21] : memref<1024x1xf32, #tpu.memory_space<vmem>>, vector<1024x1xf32>
    tpu.vector_store %arg8[%c0_20, %c0_21], %29 {strides = array<i32>} : memref<1024x1xf32, #tpu.memory_space<vmem>>, vector<1024x1xf32>,
    return
  }
  func.func @transform_0(%arg0: i32) -> (i32, i32) {
    %c0_i32 = arith.constant 0 : i32
    %c0_i32_0 = arith.constant 0 : i32
    return %arg0, %c0_i32 : i32, i32
  }
  func.func @transform_1(%arg0: i32) -> (i32, i32) {
    %c0_i32 = arith.constant 0 : i32
    %c0_i32_0 = arith.constant 0 : i32
    %c0_i32_1 = arith.constant 0 : i32
    return %c0_i32, %c0_i32_0 : i32, i32
  }
  func.func @transform_2(%arg0: i32) -> (i32, i32) {
    %c0_i32 = arith.constant 0 : i32
    %c0_i32_0 = arith.constant 0 : i32
    %c0_i32_1 = arith.constant 0 : i32
    return %c0_i32, %c0_i32_0 : i32, i32
  }
  func.func @transform_3(%arg0: i32) -> (i32, i32) {
    %c0_i32 = arith.constant 0 : i32
    %c0_i32_0 = arith.constant 0 : i32
    %c0_i32_1 = arith.constant 0 : i32
    return %c0_i32, %c0_i32_0 : i32, i32
  }
  func.func @transform_4(%arg0: i32) -> (i32, i32) {
    %c0_i32 = arith.constant 0 : i32
    %c0_i32_0 = arith.constant 0 : i32
    %c0_i32_1 = arith.constant 0 : i32
    return %c0_i32, %c0_i32_0 : i32, i32
  }
  func.func @transform_5(%arg0: i32) -> (i32, i32) {
    %c0_i32 = arith.constant 0 : i32
    %c0_i32_0 = arith.constant 0 : i32
    %c0_i32_1 = arith.constant 0 : i32
    return %c0_i32, %c0_i32_0 : i32, i32
  }
  func.func @transform_6(%arg0: i32) -> (i32, i32) {
    %c0_i32 = arith.constant 0 : i32
    %c0_i32_0 = arith.constant 0 : i32
    %c0_i32_1 = arith.constant 0 : i32
    return %c0_i32, %c0_i32_0 : i32, i32
  }
  func.func @transform_7(%arg0: i32) -> (i32, i32) {
    %c0_i32 = arith.constant 0 : i32
    %c0_i32_0 = arith.constant 0 : i32
    return %arg0, %c0_i32 : i32, i32
  }
}

</mosaic_0001>

<bundles_post_ra>
// kernel: mlp_forward.1
= control target key start
LH: loop header
LB: loop body
LE: loop exit
PB: predicated region body
PF: predicated region fallthrough
CT: control target
= control target key end

     0   :  { %vm550_vm0 = vcmask 1044480   ;;  %vm165_vm1 = vcmask 105472   ;;  %vm1398_vm2 = vcmask 261120   ;;  %vm2751_vm3 = vcmask 130048   ;;  %s7847_s1 = inlined_call_operand.vmem [shape: f32[13,32], index: 1, kind: input, shape index: {}]   ;;  %s7848_s0 = inlined_call_operand.vmem [shape: f32[1024,13], index: 0, kind: input, shape index: {}]   ;;  %s7849_s3 = inlined_call_operand.vmem [shape: f32[32,16], index: 3, kind: input, shape index: {}]   ;;  %s7850_s2 = inlined_call_operand.vmem [shape: f32[1,32], index: 2, kind: input, shape index: {}]   ;;  %s7851_s4 = inlined_call_operand.vmem [shape: f32[1,16], index: 4, kind: input, shape index: {}]   ;;  %s7852_s5 = inlined_call_operand.vmem [shape: f32[1,16], index: 5, kind: input, shape index: {}]   ;;  %s7853_s6 = inlined_call_operand.<no memory space> [shape: f32[1,1], index: 6, kind: input, shape index: {}]   ;;  %s7854_s7 = inlined_call_operand.vmem [shape: f32[1024,1], index: 7, kind: output, shape index: {}]  }
   0x1   :  { %v157_v0 = vld [vmem:[%s7847_s1 + $0x8] sm:$0x1f]  ;;  %v156_v1 = vld [vmem:[%s7847_s1] sm:$0xff]  ;;  %v30_v4 = vld [vmem:[%s7848_s0 + $0x10] sm:$0xff]  ;;  %vm4039_vm4 = vcmask 7168  }
   0x2   :  { %v28_v2 = vld [vmem:[%s7848_s0] sm:$0xff]  ;;  %4695 = vmatprep.subr.msk.mxu0 %vm550_vm0, %v157_v0  ;;  %v29_v3 = vld [vmem:[%s7848_s0 + $0x8] sm:$0xff]  ;;  %v31_v5 = vld [vmem:[%s7848_s0 + $0x18] sm:$0xff] }
   0x3   :  { %4699 = vmatprep.mubr.msk.f32.mxu0 %vm165_vm1, %v28_v2  ;;  %4696 = vmatpush3.msk.msra.mxu0 %vm550_vm0, %v157_v0  ;;  %v32_v6 = vld [vmem:[%s7848_s0 + $0x20] sm:$0xff]  ;;  %v33_v7 = vld [vmem:[%s7848_s0 + $0x28] sm:$0xff]  ;;  %v34_v8 = vld [vmem:[%s7848_s0 + $0x30] sm:$0xff] }
   0x4   :  { %4697 = vmatprep.subr.mxu0 %v156_v1  ;;  %v35_v9 = vld [vmem:[%s7848_s0 + $0x38] sm:$0xff]  ;;  %v36_v10 = vld [vmem:[%s7848_s0 + $0x40] sm:$0xff]  ;;  %v37_v11 = vld [vmem:[%s7848_s0 + $0x48] sm:$0xff] }
   0x5   :  { %4698 = vmatpush3.msra.mxu0 %v156_v1  ;;  %v38_v12 = vld [vmem:[%s7848_s0 + $0x50] sm:$0xff]  ;;  %v39_v13 = vld [vmem:[%s7848_s0 + $0x58] sm:$0xff]  ;;  %v40_v14 = vld [vmem:[%s7848_s0 + $0x60] sm:$0xff] }
   0x6   :  { %4700 = vmatmul.mubr.msk.f32.vlgmr.msra.gmra.mxu0 %vm165_vm1, %v29_v3  ;;  %v41_v15 = vld [vmem:[%s7848_s0 + $0x68] sm:$0xff]  ;;  %v42_v16 = vld [vmem:[%s7848_s0 + $0x70] sm:$0xff]  ;;  %v43_v17 = vld [vmem:[%s7848_s0 + $0x78] sm:$0xff] }
   0x7   :  { %4702 = vmatprep.mubr.msk.f32.mxu0 %vm165_vm1, %v30_v4  ;;  %v44_v18 = vld [vmem:[%s7848_s0 + $0x80] sm:$0xff]  ;;  %v45_v19 = vld [vmem:[%s7848_s0 + $0x88] sm:$0xff]  ;;  %v46_v20 = vld [vmem:[%s7848_s0 + $0x90] sm:$0xff] }
   0x8   :  { %v47_v21 = vld [vmem:[%s7848_s0 + $0x98] sm:$0xff]  ;;  %v48_v22 = vld [vmem:[%s7848_s0 + $0xa0] sm:$0xff]  ;;  %v49_v23 = vld [vmem:[%s7848_s0 + $0xa8] sm:$0xff] }
   0x9   :  { %v50_v24 = vld [vmem:[%s7848_s0 + $0xb0] sm:$0xff]  ;;  %v51_v25 = vld [vmem:[%s7848_s0 + $0xb8] sm:$0xff]  ;;  %v52_v26 = vld [vmem:[%s7848_s0 + $0xc0] sm:$0xff] }
   0xa   :  { %4703 = vmatmul.mubr.msk.f32.gmra.mxu0 %vm165_vm1, %v31_v5  ;;  %v53_v27 = vld [vmem:[%s7848_s0 + $0xc8] sm:$0xff]  ;;  %v54_v28 = vld [vmem:[%s7848_s0 + $0xd0] sm:$0xff]  ;;  %v55_v29 = vld [vmem:[%s7848_s0 + $0xd8] sm:$0xff] }
   0xb   :  { %4705 = vmatprep.mubr.msk.f32.mxu0 %vm165_vm1, %v32_v6  ;;  %v56_v30 = vld [vmem:[%s7848_s0 + $0xe0] sm:$0xff]  ;;  %v57_v31 = vld [vmem:[%s7848_s0 + $0xe8] sm:$0xff]  ;;  %v58_v32 = vld [vmem:[%s7848_s0 + $0xf0] sm:$0xff] }
   0xc   :  { %v59_v33 = vld [vmem:[%s7848_s0 + $0xf8] sm:$0xff]  ;;  %v60_v34 = vld [vmem:[%s7848_s0 + $0x100] sm:$0xff]  ;;  %v61_v35 = vld [vmem:[%s7848_s0 + $0x108] sm:$0xff] }
   0xd   :  { %v62_v36 = vld [vmem:[%s7848_s0 + $0x110] sm:$0xff]  ;;  %v1390_v37 = vld [vmem:[%s7849_s3 + $0x18] sm:$0xff]  ;;  %v64_v40 = vld [vmem:[%s7848_s0 + $0x120] sm:$0xff] }
   0xe   :  { %4706 = vmatmul.mubr.msk.f32.gmra.mxu0 %vm165_vm1, %v33_v7  ;;  %4891 = vmatprep.subr.mxu1 %v1390_v37  ;;  %v63_v38 = vld [vmem:[%s7848_s0 + $0x118] sm:$0xff]  ;;  %v1389_v39 = vld [vmem:[%s7849_s3 + $0x10] sm:$0xff]  ;;  %v1388_v41 = vld [vmem:[%s7849_s3 + $0x8] sm:$0xff] }
   0xf   :  { %4708 = vmatprep.mubr.msk.f32.mxu0 %vm165_vm1, %v34_v8  ;;  %4892 = vmatpush3.msra.mxu1 %v1390_v37  ;;  %v65_v42 = vld [vmem:[%s7848_s0 + $0x128] sm:$0xff]  ;;  %v1387_v43 = vld [vmem:[%s7849_s3] sm:$0xff]  ;;  %v66_v44 = vld [vmem:[%s7848_s0 + $0x130] sm:$0xff] }
  0x10   :  { %4893 = vmatprep.subr.mxu1 %v1389_v39  ;;  %v67_v45 = vld [vmem:[%s7848_s0 + $0x138] sm:$0xff]  ;;  %v68_v46 = vld [vmem:[%s7848_s0 + $0x140] sm:$0xff]  ;;  %v69_v47 = vld [vmem:[%s7848_s0 + $0x148] sm:$0xff] }
  0x11   :  { %4894 = vmatpush3.msra.mxu1 %v1389_v39  ;;  %v70_v48 = vld [vmem:[%s7848_s0 + $0x150] sm:$0xff]  ;;  %v71_v49 = vld [vmem:[%s7848_s0 + $0x158] sm:$0xff]  ;;  %v72_v50 = vld [vmem:[%s7848_s0 + $0x160] sm:$0xff] }
  0x12   :  { %4709 = vmatmul.mubr.msk.f32.gmra.mxu0 %vm165_vm1, %v35_v9  ;;  %4895 = vmatprep.subr.mxu1 %v1388_v41  ;;  %v73_v51 = vld [vmem:[%s7848_s0 + $0x168] sm:$0xff]  ;;  %v74_v52 = vld [vmem:[%s7848_s0 + $0x170] sm:$0xff]  ;;  %v75_v53 = vld [vmem:[%s7848_s0 + $0x178] sm:$0xff] }
  0x13   :  { %4711 = vmatprep.mubr.msk.f32.mxu0 %vm165_vm1, %v36_v10  ;;  %4896 = vmatpush3.msra.mxu1 %v1388_v41  ;;  %v76_v54 = vld [vmem:[%s7848_s0 + $0x180] sm:$0xff]  ;;  %v77_v55 = vld [vmem:[%s7848_s0 + $0x188] sm:$0xff]  ;;  %v78_v56 = vld [vmem:[%s7848_s0 + $0x190] sm:$0xff] }
  0x14   :  { %4897 = vmatprep.subr.mxu1 %v1387_v43  ;;  %v79_v57 = vld [vmem:[%s7848_s0 + $0x198] sm:$0xff]  ;;  %v80_v58 = vld [vmem:[%s7848_s0 + $0x1a0] sm:$0xff]  ;;  %v81_v59 = vld [vmem:[%s7848_s0 + $0x1a8] sm:$0xff] }
  0x15   :  { %4898 = vmatpush3.msra.mxu1 %v1387_v43  ;;  %v82_v60 = vld [vmem:[%s7848_s0 + $0x1b0] sm:$0xff]  ;;  %v83_v61 = vld [vmem:[%s7848_s0 + $0x1b8] sm:$0xff]  ;;  %v84_v62 = vld [vmem:[%s7848_s0 + $0x1c0] sm:$0xff] }
  0x16   :  { %4712 = vmatmul.mubr.msk.f32.gmra.mxu0 %vm165_vm1, %v37_v11  ;;  %v85_v63 = vld [vmem:[%s7848_s0 + $0x1c8] sm:$0xff]  ;;  %v86_v0 = vld [vmem:[%s7848_s0 + $0x1d0] sm:$0xff]  ;;  %v87_v1 = vld [vmem:[%s7848_s0 + $0x1d8] sm:$0xff] }
  0x17   :  { %4714 = vmatprep.mubr.msk.f32.mxu0 %vm165_vm1, %v38_v12  ;;  %v88_v2 = vld [vmem:[%s7848_s0 + $0x1e0] sm:$0xff]  ;;  %v89_v3 = vld [vmem:[%s7848_s0 + $0x1e8] sm:$0xff]  ;;  %v90_v4 = vld [vmem:[%s7848_s0 + $0x1f0] sm:$0xff] }
  0x18   :  { %v91_v5 = vld [vmem:[%s7848_s0 + $0x1f8] sm:$0xff]  ;;  %v92_v6 = vld [vmem:[%s7848_s0 + $0x200] sm:$0xff]  ;;  %v93_v7 = vld [vmem:[%s7848_s0 + $0x208] sm:$0xff] }
  0x19   :  { %v94_v8 = vld [vmem:[%s7848_s0 + $0x210] sm:$0xff]  ;;  %v95_v9 = vld [vmem:[%s7848_s0 + $0x218] sm:$0xff]  ;;  %v96_v10 = vld [vmem:[%s7848_s0 + $0x220] sm:$0xff] }
  0x1a   :  { %4715 = vmatmul.mubr.msk.f32.gmra.mxu0 %vm165_vm1, %v39_v13  ;;  %v97_v11 = vld [vmem:[%s7848_s0 + $0x228] sm:$0xff]  ;;  %v98_v12 = vld [vmem:[%s7848_s0 + $0x230] sm:$0xff]  ;;  %v99_v13 = vld [vmem:[%s7848_s0 + $0x238] sm:$0xff] }
  0x1b   :  { %4717 = vmatprep.mubr.msk.f32.mxu0 %vm165_vm1, %v40_v14  ;;  %v100_v14 = vld [vmem:[%s7848_s0 + $0x240] sm:$0xff]  ;;  %v123_v37 = vld [vmem:[%s7848_s0 + $0x2f8] sm:$0xff]  ;;  %v125_v39 = vld [vmem:[%s7848_s0 + $0x308] sm:$0xff] }
  0x1c   :  { %v6066_v41 = vld [vmem:[%s7850_s2] ss:$0 sm:$0xff]  ;;  %v127_v43 = vld [vmem:[%s7848_s0 + $0x318] sm:$0xff] }
  0x1e   :  { %4718 = vmatmul.mubr.msk.f32.gmra.mxu0 %vm165_vm1, %v41_v15  ;;  %v101_v15 = vld [vmem:[%s7848_s0 + $0x248] sm:$0xff] }
  0x1f   :  { %4720 = vmatprep.mubr.msk.f32.mxu0 %vm165_vm1, %v42_v16  ;;  %v102_v16 = vld [vmem:[%s7848_s0 + $0x250] sm:$0xff] }
  0x22   :  { %4721 = vmatmul.mubr.msk.f32.gmra.mxu0 %vm165_vm1, %v43_v17  ;;  %v103_v17 = vld [vmem:[%s7848_s0 + $0x258] sm:$0xff] }
  0x23   :  { %4723 = vmatprep.mubr.msk.f32.mxu0 %vm165_vm1, %v44_v18  ;;  %v104_v18 = vld [vmem:[%s7848_s0 + $0x260] sm:$0xff] }
  0x26   :  { %4724 = vmatmul.mubr.msk.f32.gmra.mxu0 %vm165_vm1, %v45_v19  ;;  %v105_v19 = vld [vmem:[%s7848_s0 + $0x268] sm:$0xff] }
  0x27   :  { %4726 = vmatprep.mubr.msk.f32.mxu0 %vm165_vm1, %v46_v20  ;;  %v106_v20 = vld [vmem:[%s7848_s0 + $0x270] sm:$0xff] }
  0x2a   :  { %4727 = vmatmul.mubr.msk.f32.gmra.mxu0 %vm165_vm1, %v47_v21  ;;  %v107_v21 = vld [vmem:[%s7848_s0 + $0x278] sm:$0xff] }
  0x2b   :  { %4729 = vmatprep.mubr.msk.f32.mxu0 %vm165_vm1, %v48_v22  ;;  %v108_v22 = vld [vmem:[%s7848_s0 + $0x280] sm:$0xff] }
  0x2e   :  { %4730 = vmatmul.mubr.msk.f32.gmra.mxu0 %vm165_vm1, %v49_v23  ;;  %v109_v23 = vld [vmem:[%s7848_s0 + $0x288] sm:$0xff] }
  0x2f   :  { %4732 = vmatprep.mubr.msk.f32.mxu0 %vm165_vm1, %v50_v24  ;;  %v110_v24 = vld [vmem:[%s7848_s0 + $0x290] sm:$0xff] }
  0x32   :  { %4733 = vmatmul.mubr.msk.f32.gmra.mxu0 %vm165_vm1, %v51_v25  ;;  %v111_v25 = vld [vmem:[%s7848_s0 + $0x298] sm:$0xff] }
  0x33   :  { %4735 = vmatprep.mubr.msk.f32.mxu0 %vm165_vm1, %v52_v26  ;;  %v112_v26 = vld [vmem:[%s7848_s0 + $0x2a0] sm:$0xff] }
  0x36   :  { %4736 = vmatmul.mubr.msk.f32.gmra.mxu0 %vm165_vm1, %v53_v27  ;;  %v113_v27 = vld [vmem:[%s7848_s0 + $0x2a8] sm:$0xff] }
  0x37   :  { %4738 = vmatprep.mubr.msk.f32.mxu0 %vm165_vm1, %v54_v28  ;;  %v114_v28 = vld [vmem:[%s7848_s0 + $0x2b0] sm:$0xff] }
  0x3a   :  { %4739 = vmatmul.mubr.msk.f32.gmra.mxu0 %vm165_vm1, %v55_v29  ;;  %v115_v29 = vld [vmem:[%s7848_s0 + $0x2b8] sm:$0xff] }
  0x3b   :  { %4741 = vmatprep.mubr.msk.f32.mxu0 %vm165_vm1, %v56_v30  ;;  %v116_v30 = vld [vmem:[%s7848_s0 + $0x2c0] sm:$0xff] }
  0x3e   :  { %4742 = vmatmul.mubr.msk.f32.gmra.mxu0 %vm165_vm1, %v57_v31  ;;  %v117_v31 = vld [vmem:[%s7848_s0 + $0x2c8] sm:$0xff] }
  0x3f   :  { %4744 = vmatprep.mubr.msk.f32.mxu0 %vm165_vm1, %v58_v32  ;;  %v118_v32 = vld [vmem:[%s7848_s0 + $0x2d0] sm:$0xff] }
  0x42   :  { %4745 = vmatmul.mubr.msk.f32.gmra.mxu0 %vm165_vm1, %v59_v33  ;;  %v119_v33 = vld [vmem:[%s7848_s0 + $0x2d8] sm:$0xff] }
  0x43   :  { %4747 = vmatprep.mubr.msk.f32.mxu0 %vm165_vm1, %v60_v34  ;;  %v120_v34 = vld [vmem:[%s7848_s0 + $0x2e0] sm:$0xff] }
  0x46   :  { %4748 = vmatmul.mubr.msk.f32.gmra.mxu0 %vm165_vm1, %v61_v35  ;;  %v121_v35 = vld [vmem:[%s7848_s0 + $0x2e8] sm:$0xff] }
  0x47   :  { %4750 = vmatprep.mubr.msk.f32.mxu0 %vm165_vm1, %v62_v36  ;;  %v122_v36 = vld [vmem:[%s7848_s0 + $0x2f0] sm:$0xff] }
  0x4a   :  { %4751 = vmatmul.mubr.msk.f32.gmra.mxu0 %vm165_vm1, %v63_v38  ;;  %v124_v38 = vld [vmem:[%s7848_s0 + $0x300] sm:$0xff] }
  0x4b   :  { %4753 = vmatprep.mubr.msk.f32.mxu0 %vm165_vm1, %v64_v40  ;;  %v126_v40 = vld [vmem:[%s7848_s0 + $0x310] sm:$0xff] }
  0x4e   :  { %4754 = vmatmul.mubr.msk.f32.gmra.mxu0 %vm165_vm1, %v65_v42 }
  0x4f   :  { %4756 = vmatprep.mubr.msk.f32.mxu0 %vm165_vm1, %v66_v44 }
  0x52   :  { %4757 = vmatmul.mubr.msk.f32.gmra.mxu0 %vm165_vm1, %v67_v45 }
  0x53   :  { %4759 = vmatprep.mubr.msk.f32.mxu0 %vm165_vm1, %v68_v46  ;;  %v128_v46 = vld [vmem:[%s7848_s0 + $0x320] sm:$0xff] }
  0x56   :  { %4760 = vmatmul.mubr.msk.f32.gmra.mxu0 %vm165_vm1, %v69_v47 }
  0x57   :  { %4762 = vmatprep.mubr.msk.f32.mxu0 %vm165_vm1, %v70_v48 }
  0x5a   :  { %4763 = vmatmul.mubr.msk.f32.gmra.mxu0 %vm165_vm1, %v71_v49 }
  0x5b   :  { %4765 = vmatprep.mubr.msk.f32.mxu0 %vm165_vm1, %v72_v50  ;;  %v129_v50 = vld [vmem:[%s7848_s0 + $0x328] sm:$0xff] }
  0x5e   :  { %4766 = vmatmul.mubr.msk.f32.gmra.mxu0 %vm165_vm1, %v73_v51 }
  0x5f   :  { %4768 = vmatprep.mubr.msk.f32.mxu0 %vm165_vm1, %v74_v52 }
  0x62   :  { %4769 = vmatmul.mubr.msk.f32.gmra.mxu0 %vm165_vm1, %v75_v53 }
  0x63   :  { %4771 = vmatprep.mubr.msk.f32.mxu0 %vm165_vm1, %v76_v54  ;;  %v130_v54 = vld [vmem:[%s7848_s0 + $0x330] sm:$0xff] }
  0x66   :  { %4772 = vmatmul.mubr.msk.f32.gmra.mxu0 %vm165_vm1, %v77_v55 }
  0x67   :  { %4774 = vmatprep.mubr.msk.f32.mxu0 %vm165_vm1, %v78_v56 }
  0x6a   :  { %4775 = vmatmul.mubr.msk.f32.gmra.mxu0 %vm165_vm1, %v79_v57 }
  0x6b   :  { %4777 = vmatprep.mubr.msk.f32.mxu0 %vm165_vm1, %v80_v58 }
  0x6e   :  { %4778 = vmatmul.mubr.msk.f32.gmra.mxu0 %vm165_vm1, %v81_v59  ;;  %v131_v59 = vld [vmem:[%s7848_s0 + $0x338] sm:$0xff] }
  0x6f   :  { %4780 = vmatprep.mubr.msk.f32.mxu0 %vm165_vm1, %v82_v60 }
  0x72   :  { %4781 = vmatmul.mubr.msk.f32.gmra.mxu0 %vm165_vm1, %v83_v61 }
  0x73   :  { %4783 = vmatprep.mubr.msk.f32.mxu0 %vm165_vm1, %v84_v62  ;;  %v132_v62 = vld [vmem:[%s7848_s0 + $0x340] sm:$0xff] }
  0x76   :  { %4784 = vmatmul.mubr.msk.f32.gmra.mxu0 %vm165_vm1, %v85_v63 }
  0x77   :  { %4786 = vmatprep.mubr.msk.f32.mxu0 %vm165_vm1, %v86_v0 }
  0x7a   :  { %4787 = vmatmul.mubr.msk.f32.gmra.mxu0 %vm165_vm1, %v87_v1 }
  0x7b   :  { %4789 = vmatprep.mubr.msk.f32.mxu0 %vm165_vm1, %v88_v2 }
  0x7e   :  { %4790 = vmatmul.mubr.msk.f32.gmra.mxu0 %vm165_vm1, %v89_v3 }
  0x7f   :  { %4792 = vmatprep.mubr.msk.f32.mxu0 %vm165_vm1, %v90_v4  ;;  %v133_v4 = vld [vmem:[%s7848_s0 + $0x348] sm:$0xff] }
  0x82   :  { %4793 = vmatmul.mubr.msk.f32.gmra.mxu0 %vm165_vm1, %v91_v5 }
  0x83   :  { %4795 = vmatprep.mubr.msk.f32.mxu0 %vm165_vm1, %v92_v6  ;;  %v134_v6 = vld [vmem:[%s7848_s0 + $0x350] sm:$0xff] }
  0x86   :  { %4796 = vmatmul.mubr.msk.f32.gmra.mxu0 %vm165_vm1, %v93_v7 }
  0x87   :  { %4798 = vmatprep.mubr.msk.f32.mxu0 %vm165_vm1, %v94_v8 }
  0x8a   :  { %4799 = vmatmul.mubr.msk.f32.gmra.mxu0 %vm165_vm1, %v95_v9 }
  0x8b   :  { %4801 = vmatprep.mubr.msk.f32.mxu0 %vm165_vm1, %v96_v10 }
  0x8e   :  { %4802 = vmatmul.mubr.msk.f32.gmra.mxu0 %vm165_vm1, %v97_v11 }
  0x8f   :  { %4804 = vmatprep.mubr.msk.f32.mxu0 %vm165_vm1, %v98_v12  ;;  %v135_v12 = vld [vmem:[%s7848_s0 + $0x358] sm:$0xff] }
  0x92   :  { %4805 = vmatmul.mubr.msk.f32.gmra.mxu0 %vm165_vm1, %v99_v13 }
  0x93   :  { %4807 = vmatprep.mubr.msk.f32.mxu0 %vm165_vm1, %v100_v14  ;;  %v136_v14 = vld [vmem:[%s7848_s0 + $0x360] sm:$0xff] }
  0x96   :  { %4808 = vmatmul.mubr.msk.f32.gmra.mxu0 %vm165_vm1, %v101_v15 }
  0x97   :  { %4810 = vmatprep.mubr.msk.f32.mxu0 %vm165_vm1, %v102_v16 }
  0x9a   :  { %4811 = vmatmul.mubr.msk.f32.gmra.mxu0 %vm165_vm1, %v103_v17 }
  0x9b   :  { %4813 = vmatprep.mubr.msk.f32.mxu0 %vm165_vm1, %v104_v18 }
  0x9e   :  { %4814 = vmatmul.mubr.msk.f32.gmra.mxu0 %vm165_vm1, %v105_v19 }
  0x9f   :  { %4816 = vmatprep.mubr.msk.f32.mxu0 %vm165_vm1, %v106_v20  ;;  %v137_v20 = vld [vmem:[%s7848_s0 + $0x368] sm:$0xff] }
  0xa2   :  { %4817 = vmatmul.mubr.msk.f32.gmra.mxu0 %vm165_vm1, %v107_v21 }
  0xa3   :  { %4819 = vmatprep.mubr.msk.f32.mxu0 %vm165_vm1, %v108_v22  ;;  %v138_v22 = vld [vmem:[%s7848_s0 + $0x370] sm:$0xff] }
  0xa6   :  { %4820 = vmatmul.mubr.msk.f32.gmra.mxu0 %vm165_vm1, %v109_v23 }
  0xa7   :  { %4822 = vmatprep.mubr.msk.f32.mxu0 %vm165_vm1, %v110_v24 }
  0xaa   :  { %4823 = vmatmul.mubr.msk.f32.gmra.mxu0 %vm165_vm1, %v111_v25 }
  0xab   :  { %4825 = vmatprep.mubr.msk.f32.mxu0 %vm165_vm1, %v112_v26 }
  0xae   :  { %4826 = vmatmul.mubr.msk.f32.gmra.mxu0 %vm165_vm1, %v113_v27 }
  0xaf   :  { %4828 = vmatprep.mubr.msk.f32.mxu0 %vm165_vm1, %v114_v28  ;;  %v139_v28 = vld [vmem:[%s7848_s0 + $0x378] sm:$0xff] }
  0xb2   :  { %4829 = vmatmul.mubr.msk.f32.gmra.mxu0 %vm165_vm1, %v115_v29 }
  0xb3   :  { %4831 = vmatprep.mubr.msk.f32.mxu0 %vm165_vm1, %v116_v30  ;;  %v140_v30 = vld [vmem:[%s7848_s0 + $0x380] sm:$0xff] }
  0xb6   :  { %4832 = vmatmul.mubr.msk.f32.gmra.mxu0 %vm165_vm1, %v117_v31 }
  0xb7   :  { %4834 = vmatprep.mubr.msk.f32.mxu0 %vm165_vm1, %v118_v32 }
  0xba   :  { %4835 = vmatmul.mubr.msk.f32.gmra.mxu0 %vm165_vm1, %v119_v33 }
  0xbb   :  { %4837 = vmatprep.mubr.msk.f32.mxu0 %vm165_vm1, %v120_v34 }
  0xbe   :  { %4838 = vmatmul.mubr.msk.f32.gmra.mxu0 %vm165_vm1, %v121_v35 }
  0xbf   :  { %4840 = vmatprep.mubr.msk.f32.mxu0 %vm165_vm1, %v122_v36  ;;  %v141_v36 = vld [vmem:[%s7848_s0 + $0x388] sm:$0xff] }
  0xc2   :  { %4841 = vmatmul.mubr.msk.f32.gmra.mxu0 %vm165_vm1, %v123_v37 }
  0xc3   :  { %4843 = vmatprep.mubr.msk.f32.mxu0 %vm165_vm1, %v124_v38  ;;  %v142_v38 = vld [vmem:[%s7848_s0 + $0x390] sm:$0xff] }
  0xc6   :  { %v4701_v42 = vpop.f32.mrf.mxu0  ;;  %4844 = vmatmul.mubr.msk.f32.gmra.mxu0 %vm165_vm1, %v125_v39 }
  0xc7   :  { %4846 = vmatprep.mubr.msk.f32.mxu0 %vm165_vm1, %v126_v40  ;;  %v626_v44 = vadd.f32 %v4701_v42, %v6066_v41 }
  0xc8   :  { %v620_v45 = vpop.f32.mrf.mxu0 }
  0xc9   :  { %v621_v47 = vadd.f32 %v6066_v41, %v620_v45  ;;  %v1260_v51 = vmax.f32 %v626_v44, 0.0  ;;  %v143_v45 = vld [vmem:[%s7848_s0 + $0x398] sm:$0xff] }
  0xca   :  { %v4704_v48 = vpop.f32.mrf.mxu0  ;;  %4847 = vmatmul.mubr.msk.f32.gmra.mxu0 %vm165_vm1, %v127_v43 }
  0xcb   :  { %4849 = vmatprep.mubr.msk.f32.mxu0 %vm165_vm1, %v128_v46  ;;  %v1259_v49 = vmax.f32 %v621_v47, 0.0  ;;  %v636_v52 = vadd.f32 %v4704_v48, %v6066_v41  ;;  %v144_v47 = vld [vmem:[%s7848_s0 + $0x3a0] sm:$0xff] }
  0xcc   :  { %v630_v53 = vpop.f32.mrf.mxu0 }
  0xcd   :  { %v631_v55 = vadd.f32 %v6066_v41, %v630_v53  ;;  %4899 = vmatprep.mubr.msk.f32.mxu1 %vm1398_vm2, %v1259_v49  ;;  %v1262_v60 = vmax.f32 %v636_v52, 0.0  ;;  %v145_v53 = vld [vmem:[%s7848_s0 + $0x3a8] sm:$0xff] }
  0xce   :  { %v4707_v56 = vpop.f32.mrf.mxu0  ;;  %4850 = vmatmul.mubr.msk.f32.gmra.mxu0 %vm165_vm1, %v129_v50  ;;  %4900 = vmatmul.mubr.msk.f32.vlgmr.msra.gmra.mxu1 %vm1398_vm2, %v1260_v51 }
  0xcf   :  { %v1261_v57 = vmax.f32 %v631_v55, 0.0  ;;  %v646_v58 = vadd.f32 %v4707_v56, %v6066_v41  ;;  %4852 = vmatprep.mubr.msk.f32.mxu0 %vm165_vm1, %v130_v54  ;;  %v146_v55 = vld [vmem:[%s7848_s0 + $0x3b0] sm:$0xff] }
  0xd0   :  { %v640_v61 = vpop.f32.mrf.mxu0 }
  0xd1   :  { %v641_v63 = vadd.f32 %v6066_v41, %v640_v61  ;;  %4902 = vmatprep.mubr.msk.f32.mxu1 %vm1398_vm2, %v1261_v57  ;;  %v1264_v0 = vmax.f32 %v646_v58, 0.0  ;;  %v147_v61 = vld [vmem:[%s7848_s0 + $0x3b8] sm:$0xff] }
  0xd2   :  { %v4710_v1 = vpop.f32.mrf.mxu0  ;;  %4853 = vmatmul.mubr.msk.f32.gmra.mxu0 %vm165_vm1, %v131_v59  ;;  %4903 = vmatmul.mubr.msk.f32.gmra.mxu1 %vm1398_vm2, %v1262_v60 }
  0xd3   :  { %v1263_v2 = vmax.f32 %v641_v63, 0.0  ;;  %v656_v3 = vadd.f32 %v4710_v1, %v6066_v41  ;;  %4855 = vmatprep.mubr.msk.f32.mxu0 %vm165_vm1, %v132_v62  ;;  %v148_v63 = vld [vmem:[%s7848_s0 + $0x3c0] sm:$0xff] }
  0xd4   :  { %v650_v5 = vpop.f32.mrf.mxu0 }
  0xd5   :  { %v651_v7 = vadd.f32 %v6066_v41, %v650_v5  ;;  %4905 = vmatprep.mubr.msk.f32.mxu1 %vm1398_vm2, %v1263_v2  ;;  %v1266_v8 = vmax.f32 %v656_v3, 0.0  ;;  %v149_v5 = vld [vmem:[%s7848_s0 + $0x3c8] sm:$0xff] }
  0xd6   :  { %v4713_v9 = vpop.f32.mrf.mxu0  ;;  %4856 = vmatmul.mubr.msk.f32.gmra.mxu0 %vm165_vm1, %v133_v4  ;;  %4906 = vmatmul.mubr.msk.f32.gmra.mxu1 %vm1398_vm2, %v1264_v0 }
  0xd7   :  { %v1265_v10 = vmax.f32 %v651_v7, 0.0  ;;  %v666_v11 = vadd.f32 %v4713_v9, %v6066_v41  ;;  %4858 = vmatprep.mubr.msk.f32.mxu0 %vm165_vm1, %v134_v6  ;;  %v150_v7 = vld [vmem:[%s7848_s0 + $0x3d0] sm:$0xff] }
  0xd8   :  { %v660_v13 = vpop.f32.mrf.mxu0 }
  0xd9   :  { %v661_v15 = vadd.f32 %v6066_v41, %v660_v13  ;;  %4908 = vmatprep.mubr.msk.f32.mxu1 %vm1398_vm2, %v1265_v10  ;;  %v1268_v16 = vmax.f32 %v666_v11, 0.0  ;;  %v151_v13 = vld [vmem:[%s7848_s0 + $0x3d8] sm:$0xff] }
  0xda   :  { %v4716_v17 = vpop.f32.mrf.mxu0  ;;  %4859 = vmatmul.mubr.msk.f32.gmra.mxu0 %vm165_vm1, %v135_v12  ;;  %4909 = vmatmul.mubr.msk.f32.gmra.mxu1 %vm1398_vm2, %v1266_v8 }
  0xdb   :  { %v1267_v18 = vmax.f32 %v661_v15, 0.0  ;;  %v676_v19 = vadd.f32 %v4716_v17, %v6066_v41  ;;  %4861 = vmatprep.mubr.msk.f32.mxu0 %vm165_vm1, %v136_v14  ;;  %v152_v15 = vld [vmem:[%s7848_s0 + $0x3e0] sm:$0xff] }
  0xdc   :  { %v670_v21 = vpop.f32.mrf.mxu0 }
  0xdd   :  { %v671_v23 = vadd.f32 %v6066_v41, %v670_v21  ;;  %4911 = vmatprep.mubr.msk.f32.mxu1 %vm1398_vm2, %v1267_v18  ;;  %v1270_v24 = vmax.f32 %v676_v19, 0.0  ;;  %v153_v21 = vld [vmem:[%s7848_s0 + $0x3e8] sm:$0xff] }
  0xde   :  { %v4719_v25 = vpop.f32.mrf.mxu0  ;;  %4862 = vmatmul.mubr.msk.f32.gmra.mxu0 %vm165_vm1, %v137_v20  ;;  %4912 = vmatmul.mubr.msk.f32.gmra.mxu1 %vm1398_vm2, %v1268_v16 }
  0xdf   :  { %v1269_v26 = vmax.f32 %v671_v23, 0.0  ;;  %v686_v27 = vadd.f32 %v4719_v25, %v6066_v41  ;;  %4864 = vmatprep.mubr.msk.f32.mxu0 %vm165_vm1, %v138_v22  ;;  %v154_v23 = vld [vmem:[%s7848_s0 + $0x3f0] sm:$0xff] }
  0xe0   :  { %v680_v29 = vpop.f32.mrf.mxu0 }
  0xe1   :  { %v681_v31 = vadd.f32 %v6066_v41, %v680_v29  ;;  %4914 = vmatprep.mubr.msk.f32.mxu1 %vm1398_vm2, %v1269_v26  ;;  %v1272_v32 = vmax.f32 %v686_v27, 0.0  ;;  %v155_v29 = vld [vmem:[%s7848_s0 + $0x3f8] sm:$0xff] }
  0xe2   :  { %v4722_v33 = vpop.f32.mrf.mxu0  ;;  %4865 = vmatmul.mubr.msk.f32.gmra.mxu0 %vm165_vm1, %v139_v28  ;;  %4915 = vmatmul.mubr.msk.f32.gmra.mxu1 %vm1398_vm2, %v1270_v24 }
  0xe3   :  { %v1271_v34 = vmax.f32 %v681_v31, 0.0  ;;  %v696_v35 = vadd.f32 %v4722_v33, %v6066_v41  ;;  %4867 = vmatprep.mubr.msk.f32.mxu0 %vm165_vm1, %v140_v30 }
  0xe4   :  { %v690_v37 = vpop.f32.mrf.mxu0 }
  0xe5   :  { %v691_v39 = vadd.f32 %v6066_v41, %v690_v37  ;;  %4917 = vmatprep.mubr.msk.f32.mxu1 %vm1398_vm2, %v1271_v34  ;;  %v1274_v40 = vmax.f32 %v696_v35, 0.0 }
  0xe6   :  { %v4725_v42 = vpop.f32.mrf.mxu0  ;;  %4868 = vmatmul.mubr.msk.f32.gmra.mxu0 %vm165_vm1, %v141_v36  ;;  %4918 = vmatmul.mubr.msk.f32.gmra.mxu1 %vm1398_vm2, %v1272_v32 }
  0xe7   :  { %v1273_v43 = vmax.f32 %v691_v39, 0.0  ;;  %v706_v44 = vadd.f32 %v4725_v42, %v6066_v41  ;;  %4870 = vmatprep.mubr.msk.f32.mxu0 %vm165_vm1, %v142_v38 }
  0xe8   :  { %v700_v46 = vpop.f32.mrf.mxu0 }
  0xe9   :  { %v701_v48 = vadd.f32 %v6066_v41, %v700_v46  ;;  %4920 = vmatprep.mubr.msk.f32.mxu1 %vm1398_vm2, %v1273_v43  ;;  %v1276_v49 = vmax.f32 %v706_v44, 0.0 }
  0xea   :  { %v4728_v50 = vpop.f32.mrf.mxu0  ;;  %4871 = vmatmul.mubr.msk.f32.gmra.mxu0 %vm165_vm1, %v143_v45  ;;  %4921 = vmatmul.mubr.msk.f32.gmra.mxu1 %vm1398_vm2, %v1274_v40 }
  0xeb   :  { %v1275_v51 = vmax.f32 %v701_v48, 0.0  ;;  %v716_v52 = vadd.f32 %v4728_v50, %v6066_v41  ;;  %4873 = vmatprep.mubr.msk.f32.mxu0 %vm165_vm1, %v144_v47 }
  0xec   :  { %v710_v54 = vpop.f32.mrf.mxu0 }
  0xed   :  { %v711_v56 = vadd.f32 %v6066_v41, %v710_v54  ;;  %4923 = vmatprep.mubr.msk.f32.mxu1 %vm1398_vm2, %v1275_v51  ;;  %v1278_v57 = vmax.f32 %v716_v52, 0.0 }
  0xee   :  { %v4731_v58 = vpop.f32.mrf.mxu0  ;;  %4874 = vmatmul.mubr.msk.f32.gmra.mxu0 %vm165_vm1, %v145_v53  ;;  %4924 = vmatmul.mubr.msk.f32.gmra.mxu1 %vm1398_vm2, %v1276_v49 }
  0xef   :  { %v1277_v59 = vmax.f32 %v711_v56, 0.0  ;;  %v726_v60 = vadd.f32 %v4731_v58, %v6066_v41  ;;  %4876 = vmatprep.mubr.msk.f32.mxu0 %vm165_vm1, %v146_v55 }
  0xf0   :  { %v720_v62 = vpop.f32.mrf.mxu0 }
  0xf1   :  { %v721_v0 = vadd.f32 %v6066_v41, %v720_v62  ;;  %4926 = vmatprep.mubr.msk.f32.mxu1 %vm1398_vm2, %v1277_v59  ;;  %v1280_v1 = vmax.f32 %v726_v60, 0.0 }
  0xf2   :  { %v4734_v2 = vpop.f32.mrf.mxu0  ;;  %4877 = vmatmul.mubr.msk.f32.gmra.mxu0 %vm165_vm1, %v147_v61  ;;  %4927 = vmatmul.mubr.msk.f32.gmra.mxu1 %vm1398_vm2, %v1278_v57 }
  0xf3   :  { %v1279_v3 = vmax.f32 %v721_v0, 0.0  ;;  %v736_v4 = vadd.f32 %v4734_v2, %v6066_v41  ;;  %4879 = vmatprep.mubr.msk.f32.mxu0 %vm165_vm1, %v148_v63 }
  0xf4   :  { %v730_v6 = vpop.f32.mrf.mxu0 }
  0xf5   :  { %v731_v8 = vadd.f32 %v6066_v41, %v730_v6  ;;  %4929 = vmatprep.mubr.msk.f32.mxu1 %vm1398_vm2, %v1279_v3  ;;  %v1282_v9 = vmax.f32 %v736_v4, 0.0 }
  0xf6   :  { %v4737_v10 = vpop.f32.mrf.mxu0  ;;  %4880 = vmatmul.mubr.msk.f32.gmra.mxu0 %vm165_vm1, %v149_v5  ;;  %4930 = vmatmul.mubr.msk.f32.gmra.mxu1 %vm1398_vm2, %v1280_v1 }
  0xf7   :  { %v1281_v11 = vmax.f32 %v731_v8, 0.0  ;;  %v746_v12 = vadd.f32 %v4737_v10, %v6066_v41  ;;  %4882 = vmatprep.mubr.msk.f32.mxu0 %vm165_vm1, %v150_v7 }
  0xf8   :  { %v740_v14 = vpop.f32.mrf.mxu0 }
  0xf9   :  { %v741_v16 = vadd.f32 %v6066_v41, %v740_v14  ;;  %4932 = vmatprep.mubr.msk.f32.mxu1 %vm1398_vm2, %v1281_v11  ;;  %v1284_v17 = vmax.f32 %v746_v12, 0.0 }
  0xfa   :  { %v4740_v18 = vpop.f32.mrf.mxu0  ;;  %4883 = vmatmul.mubr.msk.f32.gmra.mxu0 %vm165_vm1, %v151_v13  ;;  %4933 = vmatmul.mubr.msk.f32.gmra.mxu1 %vm1398_vm2, %v1282_v9 }
  0xfb   :  { %v1283_v19 = vmax.f32 %v741_v16, 0.0  ;;  %v756_v20 = vadd.f32 %v4740_v18, %v6066_v41  ;;  %4885 = vmatprep.mubr.msk.f32.mxu0 %vm165_vm1, %v152_v15 }
  0xfc   :  { %v750_v22 = vpop.f32.mrf.mxu0 }
  0xfd   :  { %v751_v24 = vadd.f32 %v6066_v41, %v750_v22  ;;  %4935 = vmatprep.mubr.msk.f32.mxu1 %vm1398_vm2, %v1283_v19  ;;  %v1286_v25 = vmax.f32 %v756_v20, 0.0 }
  0xfe   :  { %v4743_v26 = vpop.f32.mrf.mxu0  ;;  %4886 = vmatmul.mubr.msk.f32.gmra.mxu0 %vm165_vm1, %v153_v21  ;;  %4936 = vmatmul.mubr.msk.f32.gmra.mxu1 %vm1398_vm2, %v1284_v17 }
  0xff   :  { %v1285_v27 = vmax.f32 %v751_v24, 0.0  ;;  %v766_v28 = vadd.f32 %v4743_v26, %v6066_v41  ;;  %4888 = vmatprep.mubr.msk.f32.mxu0 %vm165_vm1, %v154_v23 }
 0x100   :  { %v760_v30 = vpop.f32.mrf.mxu0 }
 0x101   :  { %v761_v31 = vadd.f32 %v6066_v41, %v760_v30  ;;  %4938 = vmatprep.mubr.msk.f32.mxu1 %vm1398_vm2, %v1285_v27  ;;  %v1288_v32 = vmax.f32 %v766_v28, 0.0 }
 0x102   :  { %v4746_v33 = vpop.f32.mrf.mxu0  ;;  %4889 = vmatmul.mubr.msk.f32.gmra.mxu0 %vm165_vm1, %v155_v29  ;;  %4939 = vmatmul.mubr.msk.f32.gmra.mxu1 %vm1398_vm2, %v1286_v25 }
 0x103   :  { %v1287_v34 = vmax.f32 %v761_v31, 0.0  ;;  %v776_v35 = vadd.f32 %v4746_v33, %v6066_v41 }
 0x104   :  { %v770_v36 = vpop.f32.mrf.mxu0 }
 0x105   :  { %v771_v37 = vadd.f32 %v6066_v41, %v770_v36  ;;  %4941 = vmatprep.mubr.msk.f32.mxu1 %vm1398_vm2, %v1287_v34  ;;  %v1290_v38 = vmax.f32 %v776_v35, 0.0 }
 0x106   :  { %v4749_v39 = vpop.f32.mrf.mxu0  ;;  %4942 = vmatmul.mubr.msk.f32.gmra.mxu1 %vm1398_vm2, %v1288_v32 }
 0x107   :  { %v1289_v40 = vmax.f32 %v771_v37, 0.0  ;;  %v786_v42 = vadd.f32 %v4749_v39, %v6066_v41 }
 0x108   :  { %v780_v43 = vpop.f32.mrf.mxu0 }
 0x109   :  { %v781_v44 = vadd.f32 %v6066_v41, %v780_v43  ;;  %4944 = vmatprep.mubr.msk.f32.mxu1 %vm1398_vm2, %v1289_v40  ;;  %v1292_v45 = vmax.f32 %v786_v42, 0.0 }
 0x10a   :  { %v4752_v46 = vpop.f32.mrf.mxu0  ;;  %4945 = vmatmul.mubr.msk.f32.gmra.mxu1 %vm1398_vm2, %v1290_v38 }
 0x10b   :  { %v1291_v47 = vmax.f32 %v781_v44, 0.0  ;;  %v796_v48 = vadd.f32 %v4752_v46, %v6066_v41 }
 0x10c   :  { %v790_v49 = vpop.f32.mrf.mxu0 }
 0x10d   :  { %v791_v50 = vadd.f32 %v6066_v41, %v790_v49  ;;  %4947 = vmatprep.mubr.msk.f32.mxu1 %vm1398_vm2, %v1291_v47  ;;  %v1294_v51 = vmax.f32 %v796_v48, 0.0 }
 0x10e   :  { %v4755_v52 = vpop.f32.mrf.mxu0  ;;  %4948 = vmatmul.mubr.msk.f32.gmra.mxu1 %vm1398_vm2, %v1292_v45 }
 0x10f   :  { %v1293_v53 = vmax.f32 %v791_v50, 0.0  ;;  %v806_v54 = vadd.f32 %v4755_v52, %v6066_v41 }
 0x110   :  { %v800_v55 = vpop.f32.mrf.mxu0 }
 0x111   :  { %v801_v56 = vadd.f32 %v6066_v41, %v800_v55  ;;  %4950 = vmatprep.mubr.msk.f32.mxu1 %vm1398_vm2, %v1293_v53  ;;  %v1296_v57 = vmax.f32 %v806_v54, 0.0 }
 0x112   :  { %v4758_v58 = vpop.f32.mrf.mxu0  ;;  %4951 = vmatmul.mubr.msk.f32.gmra.mxu1 %vm1398_vm2, %v1294_v51 }
 0x113   :  { %v1295_v59 = vmax.f32 %v801_v56, 0.0  ;;  %v816_v60 = vadd.f32 %v4758_v58, %v6066_v41 }
 0x114   :  { %v810_v61 = vpop.f32.mrf.mxu0 }
 0x115   :  { %v811_v62 = vadd.f32 %v6066_v41, %v810_v61  ;;  %4953 = vmatprep.mubr.msk.f32.mxu1 %vm1398_vm2, %v1295_v59  ;;  %v1298_v63 = vmax.f32 %v816_v60, 0.0 }
 0x116   :  { %v4761_v0 = vpop.f32.mrf.mxu0  ;;  %4954 = vmatmul.mubr.msk.f32.gmra.mxu1 %vm1398_vm2, %v1296_v57 }
 0x117   :  { %v1297_v1 = vmax.f32 %v811_v62, 0.0  ;;  %v826_v2 = vadd.f32 %v4761_v0, %v6066_v41 }
 0x118   :  { %v820_v3 = vpop.f32.mrf.mxu0 }
 0x119   :  { %v821_v4 = vadd.f32 %v6066_v41, %v820_v3  ;;  %4956 = vmatprep.mubr.msk.f32.mxu1 %vm1398_vm2, %v1297_v1  ;;  %v1300_v5 = vmax.f32 %v826_v2, 0.0 }
 0x11a   :  { %v4764_v6 = vpop.f32.mrf.mxu0  ;;  %4957 = vmatmul.mubr.msk.f32.gmra.mxu1 %vm1398_vm2, %v1298_v63 }
 0x11b   :  { %v1299_v7 = vmax.f32 %v821_v4, 0.0  ;;  %v836_v8 = vadd.f32 %v4764_v6, %v6066_v41 }
 0x11c   :  { %v830_v9 = vpop.f32.mrf.mxu0 }
 0x11d   :  { %v831_v10 = vadd.f32 %v6066_v41, %v830_v9  ;;  %4959 = vmatprep.mubr.msk.f32.mxu1 %vm1398_vm2, %v1299_v7  ;;  %v1302_v11 = vmax.f32 %v836_v8, 0.0 }
 0x11e   :  { %v4767_v12 = vpop.f32.mrf.mxu0  ;;  %4960 = vmatmul.mubr.msk.f32.gmra.mxu1 %vm1398_vm2, %v1300_v5 }
 0x11f   :  { %v1301_v13 = vmax.f32 %v831_v10, 0.0  ;;  %v846_v14 = vadd.f32 %v4767_v12, %v6066_v41 }
 0x120   :  { %v840_v15 = vpop.f32.mrf.mxu0 }
 0x121   :  { %v841_v16 = vadd.f32 %v6066_v41, %v840_v15  ;;  %4962 = vmatprep.mubr.msk.f32.mxu1 %vm1398_vm2, %v1301_v13  ;;  %v1304_v17 = vmax.f32 %v846_v14, 0.0 }
 0x122   :  { %v4770_v18 = vpop.f32.mrf.mxu0  ;;  %4963 = vmatmul.mubr.msk.f32.gmra.mxu1 %vm1398_vm2, %v1302_v11 }
 0x123   :  { %v1303_v19 = vmax.f32 %v841_v16, 0.0  ;;  %v856_v20 = vadd.f32 %v4770_v18, %v6066_v41 }
 0x124   :  { %v850_v21 = vpop.f32.mrf.mxu0 }
 0x125   :  { %v851_v22 = vadd.f32 %v6066_v41, %v850_v21  ;;  %4965 = vmatprep.mubr.msk.f32.mxu1 %vm1398_vm2, %v1303_v19  ;;  %v1306_v23 = vmax.f32 %v856_v20, 0.0 }
 0x126   :  { %v4773_v24 = vpop.f32.mrf.mxu0  ;;  %4966 = vmatmul.mubr.msk.f32.gmra.mxu1 %vm1398_vm2, %v1304_v17 }
 0x127   :  { %v1305_v25 = vmax.f32 %v851_v22, 0.0  ;;  %v866_v26 = vadd.f32 %v4773_v24, %v6066_v41 }
 0x128   :  { %v860_v27 = vpop.f32.mrf.mxu0 }
 0x129   :  { %v861_v28 = vadd.f32 %v6066_v41, %v860_v27  ;;  %4968 = vmatprep.mubr.msk.f32.mxu1 %vm1398_vm2, %v1305_v25  ;;  %v1308_v29 = vmax.f32 %v866_v26, 0.0 }
 0x12a   :  { %v4776_v30 = vpop.f32.mrf.mxu0  ;;  %4969 = vmatmul.mubr.msk.f32.gmra.mxu1 %vm1398_vm2, %v1306_v23 }
 0x12b   :  { %v1307_v31 = vmax.f32 %v861_v28, 0.0  ;;  %v876_v32 = vadd.f32 %v4776_v30, %v6066_v41 }
 0x12c   :  { %v870_v33 = vpop.f32.mrf.mxu0 }
 0x12d   :  { %v871_v34 = vadd.f32 %v6066_v41, %v870_v33  ;;  %4971 = vmatprep.mubr.msk.f32.mxu1 %vm1398_vm2, %v1307_v31  ;;  %v1310_v35 = vmax.f32 %v876_v32, 0.0 }
 0x12e   :  { %v4779_v36 = vpop.f32.mrf.mxu0  ;;  %4972 = vmatmul.mubr.msk.f32.gmra.mxu1 %vm1398_vm2, %v1308_v29 }
 0x12f   :  { %v1309_v37 = vmax.f32 %v871_v34, 0.0  ;;  %v886_v38 = vadd.f32 %v4779_v36, %v6066_v41 }
 0x130   :  { %v880_v39 = vpop.f32.mrf.mxu0 }
 0x131   :  { %v881_v40 = vadd.f32 %v6066_v41, %v880_v39  ;;  %4974 = vmatprep.mubr.msk.f32.mxu1 %vm1398_vm2, %v1309_v37  ;;  %v1312_v42 = vmax.f32 %v886_v38, 0.0 }
 0x132   :  { %v4782_v43 = vpop.f32.mrf.mxu0  ;;  %4975 = vmatmul.mubr.msk.f32.gmra.mxu1 %vm1398_vm2, %v1310_v35 }
 0x133   :  { %v1311_v44 = vmax.f32 %v881_v40, 0.0  ;;  %v896_v45 = vadd.f32 %v4782_v43, %v6066_v41 }
 0x134   :  { %v890_v46 = vpop.f32.mrf.mxu0 }
 0x135   :  { %v891_v47 = vadd.f32 %v6066_v41, %v890_v46  ;;  %4977 = vmatprep.mubr.msk.f32.mxu1 %vm1398_vm2, %v1311_v44  ;;  %v1314_v48 = vmax.f32 %v896_v45, 0.0 }
 0x136   :  { %v4785_v49 = vpop.f32.mrf.mxu0  ;;  %4978 = vmatmul.mubr.msk.f32.gmra.mxu1 %vm1398_vm2, %v1312_v42 }
 0x137   :  { %v1313_v50 = vmax.f32 %v891_v47, 0.0  ;;  %v906_v51 = vadd.f32 %v4785_v49, %v6066_v41 }
 0x138   :  { %v900_v52 = vpop.f32.mrf.mxu0 }
 0x139   :  { %v901_v53 = vadd.f32 %v6066_v41, %v900_v52  ;;  %4980 = vmatprep.mubr.msk.f32.mxu1 %vm1398_vm2, %v1313_v50  ;;  %v1316_v54 = vmax.f32 %v906_v51, 0.0 }
 0x13a   :  { %v4788_v55 = vpop.f32.mrf.mxu0  ;;  %4981 = vmatmul.mubr.msk.f32.gmra.mxu1 %vm1398_vm2, %v1314_v48 }
 0x13b   :  { %v1315_v56 = vmax.f32 %v901_v53, 0.0  ;;  %v916_v57 = vadd.f32 %v4788_v55, %v6066_v41 }
 0x13c   :  { %v910_v58 = vpop.f32.mrf.mxu0 }
 0x13d   :  { %v911_v59 = vadd.f32 %v6066_v41, %v910_v58  ;;  %4983 = vmatprep.mubr.msk.f32.mxu1 %vm1398_vm2, %v1315_v56  ;;  %v1318_v60 = vmax.f32 %v916_v57, 0.0 }
 0x13e   :  { %v4791_v61 = vpop.f32.mrf.mxu0  ;;  %4984 = vmatmul.mubr.msk.f32.gmra.mxu1 %vm1398_vm2, %v1316_v54 }
 0x13f   :  { %v1317_v62 = vmax.f32 %v911_v59, 0.0  ;;  %v926_v63 = vadd.f32 %v4791_v61, %v6066_v41 }
 0x140   :  { %v920_v0 = vpop.f32.mrf.mxu0 }
 0x141   :  { %v921_v1 = vadd.f32 %v6066_v41, %v920_v0  ;;  %4986 = vmatprep.mubr.msk.f32.mxu1 %vm1398_vm2, %v1317_v62  ;;  %v1320_v2 = vmax.f32 %v926_v63, 0.0 }
 0x142   :  { %v4794_v3 = vpop.f32.mrf.mxu0  ;;  %4987 = vmatmul.mubr.msk.f32.gmra.mxu1 %vm1398_vm2, %v1318_v60 }
 0x143   :  { %v1319_v4 = vmax.f32 %v921_v1, 0.0  ;;  %v936_v5 = vadd.f32 %v4794_v3, %v6066_v41 }
 0x144   :  { %v930_v6 = vpop.f32.mrf.mxu0 }
 0x145   :  { %v931_v7 = vadd.f32 %v6066_v41, %v930_v6  ;;  %4989 = vmatprep.mubr.msk.f32.mxu1 %vm1398_vm2, %v1319_v4  ;;  %v1322_v8 = vmax.f32 %v936_v5, 0.0 }
 0x146   :  { %v4797_v9 = vpop.f32.mrf.mxu0  ;;  %4990 = vmatmul.mubr.msk.f32.gmra.mxu1 %vm1398_vm2, %v1320_v2 }
 0x147   :  { %v1321_v10 = vmax.f32 %v931_v7, 0.0  ;;  %v946_v11 = vadd.f32 %v4797_v9, %v6066_v41 }
 0x148   :  { %v940_v12 = vpop.f32.mrf.mxu0 }
 0x149   :  { %v941_v13 = vadd.f32 %v6066_v41, %v940_v12  ;;  %4992 = vmatprep.mubr.msk.f32.mxu1 %vm1398_vm2, %v1321_v10  ;;  %v1324_v14 = vmax.f32 %v946_v11, 0.0 }
 0x14a   :  { %v4800_v15 = vpop.f32.mrf.mxu0  ;;  %4993 = vmatmul.mubr.msk.f32.gmra.mxu1 %vm1398_vm2, %v1322_v8 }
 0x14b   :  { %v1323_v16 = vmax.f32 %v941_v13, 0.0  ;;  %v956_v17 = vadd.f32 %v4800_v15, %v6066_v41 }
 0x14c   :  { %v950_v18 = vpop.f32.mrf.mxu0 }
 0x14d   :  { %v951_v19 = vadd.f32 %v6066_v41, %v950_v18  ;;  %4995 = vmatprep.mubr.msk.f32.mxu1 %vm1398_vm2, %v1323_v16  ;;  %v1326_v20 = vmax.f32 %v956_v17, 0.0 }
 0x14e   :  { %v4803_v21 = vpop.f32.mrf.mxu0  ;;  %4996 = vmatmul.mubr.msk.f32.gmra.mxu1 %vm1398_vm2, %v1324_v14 }
 0x14f   :  { %v1325_v22 = vmax.f32 %v951_v19, 0.0  ;;  %v966_v23 = vadd.f32 %v4803_v21, %v6066_v41 }
 0x150   :  { %v960_v24 = vpop.f32.mrf.mxu0 }
 0x151   :  { %v961_v25 = vadd.f32 %v6066_v41, %v960_v24  ;;  %4998 = vmatprep.mubr.msk.f32.mxu1 %vm1398_vm2, %v1325_v22  ;;  %v1328_v26 = vmax.f32 %v966_v23, 0.0 }
 0x152   :  { %v4806_v27 = vpop.f32.mrf.mxu0  ;;  %4999 = vmatmul.mubr.msk.f32.gmra.mxu1 %vm1398_vm2, %v1326_v20 }
 0x153   :  { %v1327_v28 = vmax.f32 %v961_v25, 0.0  ;;  %v976_v29 = vadd.f32 %v4806_v27, %v6066_v41 }
 0x154   :  { %v970_v30 = vpop.f32.mrf.mxu0 }
 0x155   :  { %v971_v31 = vadd.f32 %v6066_v41, %v970_v30  ;;  %5001 = vmatprep.mubr.msk.f32.mxu1 %vm1398_vm2, %v1327_v28  ;;  %v1330_v32 = vmax.f32 %v976_v29, 0.0 }
 0x156   :  { %v4809_v33 = vpop.f32.mrf.mxu0  ;;  %5002 = vmatmul.mubr.msk.f32.gmra.mxu1 %vm1398_vm2, %v1328_v26 }
 0x157   :  { %v1329_v34 = vmax.f32 %v971_v31, 0.0  ;;  %v986_v35 = vadd.f32 %v4809_v33, %v6066_v41 }
 0x158   :  { %v980_v36 = vpop.f32.mrf.mxu0 }
 0x159   :  { %v981_v37 = vadd.f32 %v6066_v41, %v980_v36  ;;  %5004 = vmatprep.mubr.msk.f32.mxu1 %vm1398_vm2, %v1329_v34  ;;  %v1332_v38 = vmax.f32 %v986_v35, 0.0 }
 0x15a   :  { %v4812_v39 = vpop.f32.mrf.mxu0  ;;  %5005 = vmatmul.mubr.msk.f32.gmra.mxu1 %vm1398_vm2, %v1330_v32 }
 0x15b   :  { %v1331_v40 = vmax.f32 %v981_v37, 0.0  ;;  %v996_v42 = vadd.f32 %v4812_v39, %v6066_v41 }
 0x15c   :  { %v990_v43 = vpop.f32.mrf.mxu0 }
 0x15d   :  { %v991_v44 = vadd.f32 %v6066_v41, %v990_v43  ;;  %5007 = vmatprep.mubr.msk.f32.mxu1 %vm1398_vm2, %v1331_v40  ;;  %v1334_v45 = vmax.f32 %v996_v42, 0.0 }
 0x15e   :  { %v4815_v46 = vpop.f32.mrf.mxu0  ;;  %5008 = vmatmul.mubr.msk.f32.gmra.mxu1 %vm1398_vm2, %v1332_v38 }
 0x15f   :  { %v1333_v47 = vmax.f32 %v991_v44, 0.0  ;;  %v1006_v48 = vadd.f32 %v4815_v46, %v6066_v41 }
 0x160   :  { %v1000_v49 = vpop.f32.mrf.mxu0 }
 0x161   :  { %v1001_v50 = vadd.f32 %v6066_v41, %v1000_v49  ;;  %5010 = vmatprep.mubr.msk.f32.mxu1 %vm1398_vm2, %v1333_v47  ;;  %v1336_v51 = vmax.f32 %v1006_v48, 0.0 }
 0x162   :  { %v4818_v52 = vpop.f32.mrf.mxu0  ;;  %5011 = vmatmul.mubr.msk.f32.gmra.mxu1 %vm1398_vm2, %v1334_v45 }
 0x163   :  { %v1335_v53 = vmax.f32 %v1001_v50, 0.0  ;;  %v1016_v54 = vadd.f32 %v4818_v52, %v6066_v41 }
 0x164   :  { %v1010_v55 = vpop.f32.mrf.mxu0 }
 0x165   :  { %v1011_v56 = vadd.f32 %v6066_v41, %v1010_v55  ;;  %5013 = vmatprep.mubr.msk.f32.mxu1 %vm1398_vm2, %v1335_v53  ;;  %v1338_v57 = vmax.f32 %v1016_v54, 0.0  ;;  %v6384_v53 = vld [vmem:[%s7851_s4] ss:$0 sm:$0xff] }
 0x166   :  { %v4821_v58 = vpop.f32.mrf.mxu0  ;;  %5014 = vmatmul.mubr.msk.f32.gmra.mxu1 %vm1398_vm2, %v1336_v51 }
 0x167   :  { %v1337_v59 = vmax.f32 %v1011_v56, 0.0  ;;  %v1026_v60 = vadd.f32 %v4821_v58, %v6066_v41 }
 0x168   :  { %v1020_v61 = vpop.f32.mrf.mxu0 }
 0x169   :  { %v1021_v62 = vadd.f32 %v6066_v41, %v1020_v61  ;;  %5016 = vmatprep.mubr.msk.f32.mxu1 %vm1398_vm2, %v1337_v59  ;;  %v1340_v63 = vmax.f32 %v1026_v60, 0.0 }
 0x16a   :  { %v4824_v0 = vpop.f32.mrf.mxu0  ;;  %5017 = vmatmul.mubr.msk.f32.gmra.mxu1 %vm1398_vm2, %v1338_v57 }
 0x16b   :  { %v1339_v1 = vmax.f32 %v1021_v62, 0.0  ;;  %v1036_v2 = vadd.f32 %v4824_v0, %v6066_v41 }
 0x16c   :  { %v1030_v3 = vpop.f32.mrf.mxu0 }
 0x16d   :  { %v1031_v4 = vadd.f32 %v6066_v41, %v1030_v3  ;;  %5019 = vmatprep.mubr.msk.f32.mxu1 %vm1398_vm2, %v1339_v1  ;;  %v1342_v5 = vmax.f32 %v1036_v2, 0.0  ;;  %v6397_v2 = vld [vmem:[%s7852_s5] ss:$0 sm:$0xff] }
 0x16e   :  { %v4827_v6 = vpop.f32.mrf.mxu0  ;;  %5020 = vmatmul.mubr.msk.f32.gmra.mxu1 %vm1398_vm2, %v1340_v63 }
 0x16f   :  { %v1341_v7 = vmax.f32 %v1031_v4, 0.0  ;;  %v1046_v8 = vadd.f32 %v4827_v6, %v6066_v41 }
 0x170   :  { %v1040_v9 = vpop.f32.mrf.mxu0 }
 0x171   :  { %v1041_v10 = vadd.f32 %v6066_v41, %v1040_v9  ;;  %5022 = vmatprep.mubr.msk.f32.mxu1 %vm1398_vm2, %v1341_v7  ;;  %v1344_v11 = vmax.f32 %v1046_v8, 0.0 }
 0x172   :  { %v4830_v12 = vpop.f32.mrf.mxu0  ;;  %5023 = vmatmul.mubr.msk.f32.gmra.mxu1 %vm1398_vm2, %v1342_v5 }
 0x173   :  { %v1343_v13 = vmax.f32 %v1041_v10, 0.0  ;;  %v1056_v14 = vadd.f32 %v4830_v12, %v6066_v41 }
 0x174   :  { %v1050_v15 = vpop.f32.mrf.mxu0 }
 0x175   :  { %v1051_v16 = vadd.f32 %v6066_v41, %v1050_v15  ;;  %5025 = vmatprep.mubr.msk.f32.mxu1 %vm1398_vm2, %v1343_v13  ;;  %v1346_v17 = vmax.f32 %v1056_v14, 0.0 }
 0x176   :  { %v4833_v18 = vpop.f32.mrf.mxu0  ;;  %5026 = vmatmul.mubr.msk.f32.gmra.mxu1 %vm1398_vm2, %v1344_v11 }
 0x177   :  { %v1345_v19 = vmax.f32 %v1051_v16, 0.0  ;;  %v1066_v20 = vadd.f32 %v4833_v18, %v6066_v41 }
 0x178   :  { %v1060_v21 = vpop.f32.mrf.mxu0 }
 0x179   :  { %v1061_v22 = vadd.f32 %v6066_v41, %v1060_v21  ;;  %5028 = vmatprep.mubr.msk.f32.mxu1 %vm1398_vm2, %v1345_v19  ;;  %v1348_v23 = vmax.f32 %v1066_v20, 0.0 }
 0x17a   :  { %v4836_v24 = vpop.f32.mrf.mxu0  ;;  %5029 = vmatmul.mubr.msk.f32.gmra.mxu1 %vm1398_vm2, %v1346_v17 }
 0x17b   :  { %v1347_v25 = vmax.f32 %v1061_v22, 0.0  ;;  %v1076_v26 = vadd.f32 %v4836_v24, %v6066_v41 }
 0x17c   :  { %v1070_v27 = vpop.f32.mrf.mxu0 }
 0x17d   :  { %v1071_v28 = vadd.f32 %v6066_v41, %v1070_v27  ;;  %5031 = vmatprep.mubr.msk.f32.mxu1 %vm1398_vm2, %v1347_v25  ;;  %v1350_v29 = vmax.f32 %v1076_v26, 0.0 }
 0x17e   :  { %v4839_v30 = vpop.f32.mrf.mxu0  ;;  %5032 = vmatmul.mubr.msk.f32.gmra.mxu1 %vm1398_vm2, %v1348_v23 }
 0x17f   :  { %v1349_v31 = vmax.f32 %v1071_v28, 0.0  ;;  %v1086_v32 = vadd.f32 %v4839_v30, %v6066_v41  ;;  %v12_v28 = vstv %s7853_s6 }
 0x180   :  { %v1080_v33 = vpop.f32.mrf.mxu0  ;;  %13 = vst [vmem:[#allocation2] sm:$0x1] %v12_v28 }
 0x181   :  { %v1081_v34 = vadd.f32 %v6066_v41, %v1080_v33  ;;  %5034 = vmatprep.mubr.msk.f32.mxu1 %vm1398_vm2, %v1349_v31  ;;  %v1352_v35 = vmax.f32 %v1086_v32, 0.0 }
 0x182   :  { %v4842_v36 = vpop.f32.mrf.mxu0  ;;  %5035 = vmatmul.mubr.msk.f32.gmra.mxu1 %vm1398_vm2, %v1350_v29 }
 0x183   :  { %v1351_v37 = vmax.f32 %v1081_v34, 0.0  ;;  %v1096_v38 = vadd.f32 %v4842_v36, %v6066_v41 }
 0x184   :  { %v1090_v39 = vpop.f32.mrf.mxu0 }
 0x185   :  { %v1091_v40 = vadd.f32 %v6066_v41, %v1090_v39  ;;  %5037 = vmatprep.mubr.msk.f32.mxu1 %vm1398_vm2, %v1351_v37  ;;  %v1354_v42 = vmax.f32 %v1096_v38, 0.0 }
 0x186   :  { %v4845_v43 = vpop.f32.mrf.mxu0  ;;  %5038 = vmatmul.mubr.msk.f32.gmra.mxu1 %vm1398_vm2, %v1352_v35 }
 0x187   :  { %v1353_v44 = vmax.f32 %v1091_v40, 0.0  ;;  %v1106_v45 = vadd.f32 %v4845_v43, %v6066_v41 }
 0x188   :  { %v1100_v46 = vpop.f32.mrf.mxu0 }
 0x189   :  { %v1101_v47 = vadd.f32 %v6066_v41, %v1100_v46  ;;  %5040 = vmatprep.mubr.msk.f32.mxu1 %vm1398_vm2, %v1353_v44  ;;  %v1356_v48 = vmax.f32 %v1106_v45, 0.0 }
 0x18a   :  { %v4848_v49 = vpop.f32.mrf.mxu0  ;;  %5041 = vmatmul.mubr.msk.f32.gmra.mxu1 %vm1398_vm2, %v1354_v42 }
 0x18b   :  { %v1355_v50 = vmax.f32 %v1101_v47, 0.0  ;;  %v1116_v51 = vadd.f32 %v4848_v49, %v6066_v41 }
 0x18c   :  { %v1110_v52 = vpop.f32.mrf.mxu0 }
 0x18d   :  { %v1111_v54 = vadd.f32 %v6066_v41, %v1110_v52  ;;  %5043 = vmatprep.mubr.msk.f32.mxu1 %vm1398_vm2, %v1355_v50  ;;  %v1358_v55 = vmax.f32 %v1116_v51, 0.0 }
 0x18e   :  { %v4851_v56 = vpop.f32.mrf.mxu0  ;;  %v4901_v57 = vpop.f32.mrf.mxu1  ;;  %5044 = vmatmul.mubr.msk.f32.gmra.mxu1 %vm1398_vm2, %v1356_v48 }
 0x18f   :  { %v1357_v58 = vmax.f32 %v1111_v54, 0.0  ;;  %v1126_v59 = vadd.f32 %v4851_v56, %v6066_v41  ;;  %v1855_v60 = vadd.f32 %v4901_v57, %v6384_v53 }
 0x190   :  { %v1120_v61 = vpop.f32.mrf.mxu0  ;;  %v1849_v62 = vpop.f32.mrf.mxu1 }
 0x191   :  { %v2489_v63 = vmax.f32 %v1855_v60, 0.0  ;;  %v1121_v0 = vadd.f32 %v6066_v41, %v1120_v61  ;;  %v1850_v1 = vadd.f32 %v6384_v53, %v1849_v62  ;;  %5046 = vmatprep.mubr.msk.f32.mxu1 %vm1398_vm2, %v1357_v58  ;;  %v1360_v3 = vmax.f32 %v1126_v59, 0.0 }
 0x192   :  { %v4854_v4 = vpop.f32.mrf.mxu0  ;;  %v4904_v5 = vpop.f32.mrf.mxu1  ;;  %5047 = vmatmul.mubr.msk.f32.gmra.mxu1 %vm1398_vm2, %v1358_v55 }
 0x193   :  { %v1359_v6 = vmax.f32 %v1121_v0, 0.0  ;;  %v2488_v7 = vmax.f32 %v1850_v1, 0.0  ;;  %v1136_v8 = vadd.f32 %v4854_v4, %v6066_v41  ;;  %v1865_v9 = vadd.f32 %v4904_v5, %v6384_v53 }
 0x194   :  { %v1130_v10 = vpop.f32.mrf.mxu0  ;;  %v1859_v11 = vpop.f32.mrf.mxu1  ;;  %v2624_v12 = vmul.f32 %v6397_v2, %v2489_v63 }
 0x195   :  { %v2491_v13 = vmax.f32 %v1865_v9, 0.0  ;;  %v1131_v14 = vadd.f32 %v6066_v41, %v1130_v10  ;;  %v1860_v15 = vadd.f32 %v6384_v53, %v1859_v11  ;;  %5049 = vmatprep.mubr.msk.f32.mxu1 %vm1398_vm2, %v1359_v6  ;;  %v1362_v16 = vmax.f32 %v1136_v8, 0.0 }
 0x196   :  { %v4857_v17 = vpop.f32.mrf.mxu0  ;;  %5050 = vmatmul.mubr.msk.f32.gmra.mxu1 %vm1398_vm2, %v1360_v3  ;;  %v2755_v18 = vsel %vm2751_vm3, %v2624_v12, 0.0  ;;  %v4907_v19 = vpop.f32.mrf.mxu1  ;;  %v2623_v20 = vmul.f32 %v6397_v2, %v2488_v7 }
 0x197   :  { %v1361_v21 = vmax.f32 %v1131_v14, 0.0  ;;  %v2490_v22 = vmax.f32 %v1860_v15, 0.0  ;;  %v1146_v23 = vadd.f32 %v4857_v17, %v6066_v41  ;;  %2756 = vadd.xlane.f32.xlu0 %v2755_v18  ;;  %v1875_v24 = vadd.f32 %v4907_v19, %v6384_v53 }
 0x198   :  { %v1140_v25 = vpop.f32.mrf.mxu0  ;;  %v1869_v26 = vpop.f32.mrf.mxu1  ;;  %v2626_v27 = vmul.f32 %v6397_v2, %v2491_v13  ;;  %v2752_v36 = vsel %vm2751_vm3, %v2623_v20, 0.0 }
 0x199   :  { %v2493_v29 = vmax.f32 %v1875_v24, 0.0  ;;  %v1141_v30 = vadd.f32 %v6066_v41, %v1140_v25  ;;  %v1870_v31 = vadd.f32 %v6384_v53, %v1869_v26  ;;  %5052 = vmatprep.mubr.msk.f32.mxu1 %vm1398_vm2, %v1361_v21  ;;  %v1364_v32 = vmax.f32 %v1146_v23, 0.0  ;;  %v6425_v41 = vld [vmem:[%s7850_s2] ss:$0 sm:$0xff] }
 0x19a   :  { %v4860_v33 = vpop.f32.mrf.mxu0  ;;  %5053 = vmatmul.mubr.msk.f32.gmra.mxu1 %vm1398_vm2, %v1362_v16  ;;  %v2761_v34 = vsel %vm2751_vm3, %v2626_v27, 0.0  ;;  %v4910_v35 = vpop.f32.mrf.mxu1  ;;  %v2625_v37 = vmul.f32 %v6397_v2, %v2490_v22 }
 0x19b   :  { %v1363_v38 = vmax.f32 %v1141_v30, 0.0  ;;  %v2492_v39 = vmax.f32 %v1870_v31, 0.0  ;;  %v1156_v40 = vadd.f32 %v6425_v41, %v4860_v33  ;;  %2762 = vadd.xlane.f32.xlu1 %v2761_v34  ;;  %v1885_v42 = vadd.f32 %v4910_v35, %v6384_v53  ;;  %2753 = vadd.xlane.f32.xlu0 %v2752_v36 }
 0x19c   :  { %v1150_v43 = vpop.f32.mrf.mxu0  ;;  %v1879_v44 = vpop.f32.mrf.mxu1  ;;  %v2628_v47 = vmul.f32 %v6397_v2, %v2493_v29  ;;  %v2758_v52 = vsel %vm2751_vm3, %v2625_v37, 0.0 }
 0x19d   :  { %v1151_v45 = vadd.f32 %v6425_v41, %v1150_v43  ;;  %v1880_v46 = vadd.f32 %v6384_v53, %v1879_v44  ;;  %5055 = vmatprep.mubr.msk.f32.mxu1 %vm1398_vm2, %v1363_v38  ;;  %v1366_v48 = vmax.f32 %v1156_v40, 0.0  ;;  %v2495_v49 = vmax.f32 %v1885_v42, 0.0 }
 0x19e   :  { %v4863_v50 = vpop.f32.mrf.mxu0  ;;  %v4913_v51 = vpop.f32.mrf.mxu1  ;;  %5056 = vmatmul.mubr.msk.f32.gmra.mxu1 %vm1398_vm2, %v1364_v32  ;;  %v2627_v54 = vmul.f32 %v6397_v2, %v2492_v39  ;;  %v2767_v0 = vsel %vm2751_vm3, %v2628_v47, 0.0 }
 0x19f   :  { %v1365_v55 = vmax.f32 %v1151_v45, 0.0  ;;  %v2494_v56 = vmax.f32 %v1880_v46, 0.0  ;;  %v1166_v57 = vadd.f32 %v6425_v41, %v4863_v50  ;;  %v1895_v58 = vadd.f32 %v4913_v51, %v6384_v53  ;;  %2759 = vadd.xlane.f32.xlu1 %v2758_v52 }
 0x1a0   :  { %v1160_v59 = vpop.f32.mrf.mxu0  ;;  %v1889_v60 = vpop.f32.mrf.mxu1  ;;  %v2764_v61 = vsel %vm2751_vm3, %v2627_v54, 0.0  ;;  %v2630_v7 = vmul.f32 %v6397_v2, %v2495_v49 }
 0x1a1   :  { %v1161_v62 = vadd.f32 %v6425_v41, %v1160_v59  ;;  %v1890_v63 = vadd.f32 %v6384_v53, %v1889_v60  ;;  %2765 = vadd.xlane.f32.xlu0 %v2764_v61  ;;  %5058 = vmatprep.mubr.msk.f32.mxu1 %vm1398_vm2, %v1365_v55  ;;  %v1368_v1 = vmax.f32 %v1166_v57, 0.0  ;;  %v2497_v3 = vmax.f32 %v1895_v58, 0.0 }
 0x1a2   :  { %v4866_v4 = vpop.f32.mrf.mxu0  ;;  %v4916_v5 = vpop.f32.mrf.mxu1  ;;  %5059 = vmatmul.mubr.msk.f32.gmra.mxu1 %vm1398_vm2, %v1366_v48  ;;  %v2629_v6 = vmul.f32 %v6397_v2, %v2494_v56  ;;  %v2773_v21 = vsel %vm2751_vm3, %v2630_v7, 0.0 }
 0x1a3   :  { %v1367_v8 = vmax.f32 %v1161_v62, 0.0  ;;  %v2496_v9 = vmax.f32 %v1890_v63, 0.0  ;;  %v1176_v10 = vadd.f32 %v6425_v41, %v4866_v4  ;;  %v1905_v11 = vadd.f32 %v4916_v5, %v6384_v53  ;;  %2768 = vadd.xlane.f32.xlu1 %v2767_v0 }
 0x1a4   :  { %v1170_v12 = vpop.f32.mrf.mxu0  ;;  %v1899_v13 = vpop.f32.mrf.mxu1  ;;  %v2770_v14 = vsel %vm2751_vm3, %v2629_v6, 0.0  ;;  %v2632_v23 = vmul.f32 %v6397_v2, %v2497_v3 }
 0x1a5   :  { %v2499_v15 = vmax.f32 %v1905_v11, 0.0  ;;  %v1171_v16 = vadd.f32 %v6425_v41, %v1170_v12  ;;  %v1900_v17 = vadd.f32 %v6384_v53, %v1899_v13  ;;  %2771 = vadd.xlane.f32.xlu0 %v2770_v14  ;;  %5061 = vmatprep.mubr.msk.f32.mxu1 %vm1398_vm2, %v1367_v8  ;;  %v1370_v18 = vmax.f32 %v1176_v10, 0.0 }
 0x1a6   :  { %v4869_v19 = vpop.f32.mrf.mxu0  ;;  %v4919_v20 = vpop.f32.mrf.mxu1  ;;  %5062 = vmatmul.mubr.msk.f32.gmra.mxu1 %vm1398_vm2, %v1368_v1  ;;  %v2631_v22 = vmul.f32 %v6397_v2, %v2496_v9  ;;  %v2779_v38 = vsel %vm2751_vm3, %v2632_v23, 0.0 }
 0x1a7   :  { %v1369_v24 = vmax.f32 %v1171_v16, 0.0  ;;  %v2498_v25 = vmax.f32 %v1900_v17, 0.0  ;;  %v1186_v26 = vadd.f32 %v6425_v41, %v4869_v19  ;;  %v1915_v27 = vadd.f32 %v4919_v20, %v6384_v53  ;;  %2774 = vadd.xlane.f32.xlu1 %v2773_v21 }
 0x1a8   :  { %v1180_v28 = vpop.f32.mrf.mxu0  ;;  %v1909_v29 = vpop.f32.mrf.mxu1  ;;  %v2776_v30 = vsel %vm2751_vm3, %v2631_v22, 0.0  ;;  %v2634_v33 = vmul.f32 %v6397_v2, %v2499_v15 }
 0x1a9   :  { %v1181_v31 = vadd.f32 %v6425_v41, %v1180_v28  ;;  %v1910_v32 = vadd.f32 %v6384_v53, %v1909_v29  ;;  %2777 = vadd.xlane.f32.xlu0 %v2776_v30  ;;  %5064 = vmatprep.mubr.msk.f32.mxu1 %vm1398_vm2, %v1369_v24  ;;  %v1372_v34 = vmax.f32 %v1186_v26, 0.0  ;;  %v2501_v35 = vmax.f32 %v1915_v27, 0.0 }
 0x1aa   :  { %v4872_v36 = vpop.f32.mrf.mxu0  ;;  %v4922_v37 = vpop.f32.mrf.mxu1  ;;  %5065 = vmatmul.mubr.msk.f32.gmra.mxu1 %vm1398_vm2, %v1370_v18  ;;  %v2633_v39 = vmul.f32 %v6397_v2, %v2498_v25  ;;  %v2785_v50 = vsel %vm2751_vm3, %v2634_v33, 0.0 }
 0x1ab   :  { %v1371_v40 = vmax.f32 %v1181_v31, 0.0  ;;  %v2500_v42 = vmax.f32 %v1910_v32, 0.0  ;;  %v1196_v43 = vadd.f32 %v6425_v41, %v4872_v36  ;;  %v1925_v44 = vadd.f32 %v4922_v37, %v6384_v53  ;;  %2780 = vadd.xlane.f32.xlu1 %v2779_v38 }
 0x1ac   :  { %v1190_v45 = vpop.f32.mrf.mxu0  ;;  %v1919_v46 = vpop.f32.mrf.mxu1  ;;  %v2782_v47 = vsel %vm2751_vm3, %v2633_v39, 0.0  ;;  %v2636_v57 = vmul.f32 %v6397_v2, %v2501_v35 }
 0x1ad   :  { %v1191_v48 = vadd.f32 %v6425_v41, %v1190_v45  ;;  %v1920_v49 = vadd.f32 %v6384_v53, %v1919_v46  ;;  %2783 = vadd.xlane.f32.xlu0 %v2782_v47  ;;  %5067 = vmatprep.mubr.msk.f32.mxu1 %vm1398_vm2, %v1371_v40  ;;  %v1374_v51 = vmax.f32 %v1196_v43, 0.0  ;;  %v2503_v52 = vmax.f32 %v1925_v44, 0.0 }
 0x1ae   :  { %v4875_v54 = vpop.f32.mrf.mxu0  ;;  %v4925_v55 = vpop.f32.mrf.mxu1  ;;  %5068 = vmatmul.mubr.msk.f32.gmra.mxu1 %vm1398_vm2, %v1372_v34  ;;  %v2635_v56 = vmul.f32 %v6397_v2, %v2500_v42  ;;  %v2791_v8 = vsel %vm2751_vm3, %v2636_v57, 0.0 }
 0x1af   :  { %v1373_v58 = vmax.f32 %v1191_v48, 0.0  ;;  %v2502_v59 = vmax.f32 %v1920_v49, 0.0  ;;  %v1206_v60 = vadd.f32 %v6425_v41, %v4875_v54  ;;  %v1935_v61 = vadd.f32 %v4925_v55, %v6384_v53  ;;  %2786 = vadd.xlane.f32.xlu1 %v2785_v50 }
 0x1b0   :  { %v1200_v62 = vpop.f32.mrf.mxu0  ;;  %v1929_v63 = vpop.f32.mrf.mxu1  ;;  %v2788_v0 = vsel %vm2751_vm3, %v2635_v56, 0.0  ;;  %v2638_v10 = vmul.f32 %v6397_v2, %v2503_v52 }
 0x1b1   :  { %v2505_v1 = vmax.f32 %v1935_v61, 0.0  ;;  %v1201_v3 = vadd.f32 %v6425_v41, %v1200_v62  ;;  %v1930_v4 = vadd.f32 %v6384_v53, %v1929_v63  ;;  %2789 = vadd.xlane.f32.xlu0 %v2788_v0  ;;  %5070 = vmatprep.mubr.msk.f32.mxu1 %vm1398_vm2, %v1373_v58  ;;  %v1376_v5 = vmax.f32 %v1206_v60, 0.0 }
 0x1b2   :  { %v4878_v6 = vpop.f32.mrf.mxu0  ;;  %v4928_v7 = vpop.f32.mrf.mxu1  ;;  %5071 = vmatmul.mubr.msk.f32.gmra.mxu1 %vm1398_vm2, %v1374_v51  ;;  %v2637_v9 = vmul.f32 %v6397_v2, %v2502_v59  ;;  %v2797_v25 = vsel %vm2751_vm3, %v2638_v10, 0.0 }
 0x1b3   :  { %v1375_v11 = vmax.f32 %v1201_v3, 0.0  ;;  %v2504_v12 = vmax.f32 %v1930_v4, 0.0  ;;  %v1216_v13 = vadd.f32 %v6425_v41, %v4878_v6  ;;  %v1945_v14 = vadd.f32 %v4928_v7, %v6384_v53  ;;  %2792 = vadd.xlane.f32.xlu1 %v2791_v8 }
 0x1b4   :  { %v1210_v15 = vpop.f32.mrf.mxu0  ;;  %v1939_v16 = vpop.f32.mrf.mxu1  ;;  %v2794_v17 = vsel %vm2751_vm3, %v2637_v9, 0.0  ;;  %v2640_v20 = vmul.f32 %v6397_v2, %v2505_v1 }
 0x1b5   :  { %v1211_v18 = vadd.f32 %v6425_v41, %v1210_v15  ;;  %v1940_v19 = vadd.f32 %v6384_v53, %v1939_v16  ;;  %2795 = vadd.xlane.f32.xlu0 %v2794_v17  ;;  %5073 = vmatprep.mubr.msk.f32.mxu1 %vm1398_vm2, %v1375_v11  ;;  %v1378_v21 = vmax.f32 %v1216_v13, 0.0  ;;  %v2507_v22 = vmax.f32 %v1945_v14, 0.0 }
 0x1b6   :  { %v4881_v23 = vpop.f32.mrf.mxu0  ;;  %v4931_v24 = vpop.f32.mrf.mxu1  ;;  %5074 = vmatmul.mubr.msk.f32.gmra.mxu1 %vm1398_vm2, %v1376_v5  ;;  %v2639_v26 = vmul.f32 %v6397_v2, %v2504_v12  ;;  %v2803_v36 = vsel %vm2751_vm3, %v2640_v20, 0.0 }
 0x1b7   :  { %v1377_v27 = vmax.f32 %v1211_v18, 0.0  ;;  %v2506_v28 = vmax.f32 %v1940_v19, 0.0  ;;  %v1226_v29 = vadd.f32 %v6425_v41, %v4881_v23  ;;  %v1955_v30 = vadd.f32 %v4931_v24, %v6384_v53  ;;  %2798 = vadd.xlane.f32.xlu1 %v2797_v25 }
 0x1b8   :  { %v1220_v31 = vpop.f32.mrf.mxu0  ;;  %v1949_v32 = vpop.f32.mrf.mxu1  ;;  %v2800_v33 = vsel %vm2751_vm3, %v2639_v26, 0.0  ;;  %v2642_v43 = vmul.f32 %v6397_v2, %v2507_v22 }
 0x1b9   :  { %v1221_v34 = vadd.f32 %v6425_v41, %v1220_v31  ;;  %v1950_v35 = vadd.f32 %v6384_v53, %v1949_v32  ;;  %2801 = vadd.xlane.f32.xlu0 %v2800_v33  ;;  %5076 = vmatprep.mubr.msk.f32.mxu1 %vm1398_vm2, %v1377_v27  ;;  %v1380_v37 = vmax.f32 %v1226_v29, 0.0  ;;  %v2509_v38 = vmax.f32 %v1955_v30, 0.0 }
 0x1ba   :  { %v4884_v39 = vpop.f32.mrf.mxu0  ;;  %v4934_v40 = vpop.f32.mrf.mxu1  ;;  %5077 = vmatmul.mubr.msk.f32.gmra.mxu1 %vm1398_vm2, %v1378_v21  ;;  %v2641_v42 = vmul.f32 %v6397_v2, %v2506_v28  ;;  %v2809_v58 = vsel %vm2751_vm3, %v2642_v43, 0.0 }
 0x1bb   :  { %v1379_v44 = vmax.f32 %v1221_v34, 0.0  ;;  %v2508_v45 = vmax.f32 %v1950_v35, 0.0  ;;  %v1236_v46 = vadd.f32 %v6425_v41, %v4884_v39  ;;  %v1965_v47 = vadd.f32 %v4934_v40, %v6384_v53  ;;  %2804 = vadd.xlane.f32.xlu1 %v2803_v36 }
 0x1bc   :  { %v1230_v48 = vpop.f32.mrf.mxu0  ;;  %v1959_v49 = vpop.f32.mrf.mxu1  ;;  %v2806_v50 = vsel %vm2751_vm3, %v2641_v42, 0.0  ;;  %v2644_v60 = vmul.f32 %v6397_v2, %v2509_v38 }
 0x1bd   :  { %v2511_v51 = vmax.f32 %v1965_v47, 0.0  ;;  %v1231_v52 = vadd.f32 %v6425_v41, %v1230_v48  ;;  %v1960_v54 = vadd.f32 %v6384_v53, %v1959_v49  ;;  %2807 = vadd.xlane.f32.xlu0 %v2806_v50  ;;  %5079 = vmatprep.mubr.msk.f32.mxu1 %vm1398_vm2, %v1379_v44  ;;  %v1382_v55 = vmax.f32 %v1236_v46, 0.0 }
 0x1be   :  { %v4887_v56 = vpop.f32.mrf.mxu0  ;;  %v4937_v57 = vpop.f32.mrf.mxu1  ;;  %5080 = vmatmul.mubr.msk.f32.gmra.mxu1 %vm1398_vm2, %v1380_v37  ;;  %v2643_v59 = vmul.f32 %v6397_v2, %v2508_v45  ;;  %v2815_v12 = vsel %vm2751_vm3, %v2644_v60, 0.0 }
 0x1bf   :  { %v1381_v61 = vmax.f32 %v1231_v52, 0.0  ;;  %v2510_v62 = vmax.f32 %v1960_v54, 0.0  ;;  %v1246_v63 = vadd.f32 %v6425_v41, %v4887_v56  ;;  %v1975_v0 = vadd.f32 %v4937_v57, %v6384_v53  ;;  %2810 = vadd.xlane.f32.xlu1 %v2809_v58 }
 0x1c0   :  { %v1240_v1 = vpop.f32.mrf.mxu0  ;;  %v1969_v3 = vpop.f32.mrf.mxu1  ;;  %v2812_v4 = vsel %vm2751_vm3, %v2643_v59, 0.0  ;;  %v2646_v7 = vmul.f32 %v6397_v2, %v2511_v51 }
 0x1c1   :  { %v1241_v5 = vadd.f32 %v6425_v41, %v1240_v1  ;;  %v1970_v6 = vadd.f32 %v6384_v53, %v1969_v3  ;;  %2813 = vadd.xlane.f32.xlu0 %v2812_v4  ;;  %5082 = vmatprep.mubr.msk.f32.mxu1 %vm1398_vm2, %v1381_v61  ;;  %v1384_v8 = vmax.f32 %v1246_v63, 0.0  ;;  %v2513_v9 = vmax.f32 %v1975_v0, 0.0 }
 0x1c2   :  { %v4890_v10 = vpop.f32.mrf.mxu0  ;;  %v4940_v11 = vpop.f32.mrf.mxu1  ;;  %5083 = vmatmul.mubr.msk.f32.gmra.mxu1 %vm1398_vm2, %v1382_v55  ;;  %v2645_v13 = vmul.f32 %v6397_v2, %v2510_v62  ;;  %v2821_v23 = vsel %vm2751_vm3, %v2646_v7, 0.0 }
 0x1c3   :  { %v1383_v14 = vmax.f32 %v1241_v5, 0.0  ;;  %v2512_v15 = vmax.f32 %v1970_v6, 0.0  ;;  %v1256_v16 = vadd.f32 %v6425_v41, %v4890_v10  ;;  %v1985_v17 = vadd.f32 %v4940_v11, %v6384_v53  ;;  %2816 = vadd.xlane.f32.xlu1 %v2815_v12 }
 0x1c4   :  { %v1250_v18 = vpop.f32.mrf.mxu0  ;;  %v1979_v19 = vpop.f32.mrf.mxu1  ;;  %v2818_v20 = vsel %vm2751_vm3, %v2645_v13, 0.0  ;;  %v2648_v28 = vmul.f32 %v6397_v2, %v2513_v9 }
 0x1c5   :  { %v1251_v21 = vadd.f32 %v6425_v41, %v1250_v18  ;;  %v1980_v22 = vadd.f32 %v6384_v53, %v1979_v19  ;;  %2819 = vadd.xlane.f32.xlu0 %v2818_v20  ;;  %5085 = vmatprep.mubr.msk.f32.mxu1 %vm1398_vm2, %v1383_v14  ;;  %v1386_v24 = vmax.f32 %v1256_v16, 0.0  ;;  %v2515_v25 = vmax.f32 %v1985_v17, 0.0 }
 0x1c6   :  { %v4943_v26 = vpop.f32.mrf.mxu1  ;;  %5086 = vmatmul.mubr.msk.f32.gmra.mxu1 %vm1398_vm2, %v1384_v8  ;;  %v2647_v27 = vmul.f32 %v6397_v2, %v2512_v15  ;;  %v2827_v37 = vsel %vm2751_vm3, %v2648_v28, 0.0 }
 0x1c7   :  { %v1385_v29 = vmax.f32 %v1251_v21, 0.0  ;;  %v2514_v30 = vmax.f32 %v1980_v22, 0.0  ;;  %v1995_v41 = vadd.f32 %v4943_v26, %v6384_v53  ;;  %2822 = vadd.xlane.f32.xlu1 %v2821_v23  ;;  %v2650_v38 = vmul.f32 %v6397_v2, %v2515_v25 }
 0x1c8   :  { %v1989_v31 = vpop.f32.mrf.mxu1  ;;  %v2824_v32 = vsel %vm2751_vm3, %v2647_v27, 0.0 }
 0x1c9   :  { %v1990_v33 = vadd.f32 %v6384_v53, %v1989_v31  ;;  %2825 = vadd.xlane.f32.xlu0 %v2824_v32  ;;  %5088 = vmatprep.mubr.msk.f32.mxu1 %vm1398_vm2, %v1385_v29  ;;  %v2649_v34 = vmul.f32 %v6397_v2, %v2514_v30  ;;  %v2517_v35 = vmax.f32 %v1995_v41, 0.0  ;;  %v2833_v48 = vsel %vm2751_vm3, %v2650_v38, 0.0 }
 0x1ca   :  { %v4946_v36 = vpop.f32.mrf.mxu1  ;;  %5089 = vmatmul.mubr.msk.f32.gmra.mxu1 %vm1398_vm2, %v1386_v24 }
 0x1cb   :  { %v2516_v39 = vmax.f32 %v1990_v33, 0.0  ;;  %v2005_v40 = vadd.f32 %v4946_v36, %v6384_v53  ;;  %2828 = vadd.xlane.f32.xlu1 %v2827_v37  ;;  %v2830_v42 = vsel %vm2751_vm3, %v2649_v34, 0.0  ;;  %v2652_v49 = vmul.f32 %v6397_v2, %v2517_v35 }
 0x1cc   :  { %v1999_v43 = vpop.f32.mrf.mxu1 }
 0x1cd   :  { %v2000_v44 = vadd.f32 %v6384_v53, %v1999_v43  ;;  %2831 = vadd.xlane.f32.xlu0 %v2830_v42  ;;  %v2651_v45 = vmul.f32 %v6397_v2, %v2516_v39  ;;  %v2519_v46 = vmax.f32 %v2005_v40, 0.0  ;;  %v2839_v59 = vsel %vm2751_vm3, %v2652_v49, 0.0 }
 0x1ce   :  { %v4949_v47 = vpop.f32.mrf.mxu1 }
 0x1cf   :  { %v2518_v50 = vmax.f32 %v2000_v44, 0.0  ;;  %v2015_v51 = vadd.f32 %v4949_v47, %v6384_v53  ;;  %2834 = vadd.xlane.f32.xlu1 %v2833_v48  ;;  %v2836_v52 = vsel %vm2751_vm3, %v2651_v45, 0.0  ;;  %v2654_v60 = vmul.f32 %v6397_v2, %v2519_v46 }
 0x1d0   :  { %v2009_v54 = vpop.f32.mrf.mxu1 }
 0x1d1   :  { %v2010_v55 = vadd.f32 %v6384_v53, %v2009_v54  ;;  %2837 = vadd.xlane.f32.xlu0 %v2836_v52  ;;  %v2653_v56 = vmul.f32 %v6397_v2, %v2518_v50  ;;  %v2521_v57 = vmax.f32 %v2015_v51, 0.0  ;;  %v2845_v6 = vsel %vm2751_vm3, %v2654_v60, 0.0 }
 0x1d2   :  { %v4952_v58 = vpop.f32.mrf.mxu1 }
 0x1d3   :  { %v2520_v61 = vmax.f32 %v2010_v55, 0.0  ;;  %v2025_v62 = vadd.f32 %v4952_v58, %v6384_v53  ;;  %2840 = vadd.xlane.f32.xlu1 %v2839_v59  ;;  %v2842_v63 = vsel %vm2751_vm3, %v2653_v56, 0.0  ;;  %v2656_v7 = vmul.f32 %v6397_v2, %v2521_v57 }
 0x1d4   :  { %v2019_v0 = vpop.f32.mrf.mxu1 }
 0x1d5   :  { %v2020_v1 = vadd.f32 %v6384_v53, %v2019_v0  ;;  %2843 = vadd.xlane.f32.xlu0 %v2842_v63  ;;  %v2655_v3 = vmul.f32 %v6397_v2, %v2520_v61  ;;  %v2523_v4 = vmax.f32 %v2025_v62, 0.0  ;;  %v2851_v16 = vsel %vm2751_vm3, %v2656_v7, 0.0 }
 0x1d6   :  { %v4955_v5 = vpop.f32.mrf.mxu1 }
 0x1d7   :  { %v2522_v8 = vmax.f32 %v2020_v1, 0.0  ;;  %v2035_v9 = vadd.f32 %v4955_v5, %v6384_v53  ;;  %2846 = vadd.xlane.f32.xlu1 %v2845_v6  ;;  %v2848_v10 = vsel %vm2751_vm3, %v2655_v3, 0.0  ;;  %v2658_v17 = vmul.f32 %v6397_v2, %v2523_v4 }
 0x1d8   :  { %v2029_v11 = vpop.f32.mrf.mxu1 }
 0x1d9   :  { %v2030_v12 = vadd.f32 %v6384_v53, %v2029_v11  ;;  %2849 = vadd.xlane.f32.xlu0 %v2848_v10  ;;  %v2657_v13 = vmul.f32 %v6397_v2, %v2522_v8  ;;  %v2525_v14 = vmax.f32 %v2035_v9, 0.0  ;;  %v2857_v26 = vsel %vm2751_vm3, %v2658_v17, 0.0 }
 0x1da   :  { %v4958_v15 = vpop.f32.mrf.mxu1 }
 0x1db   :  { %v2524_v18 = vmax.f32 %v2030_v12, 0.0  ;;  %v2045_v19 = vadd.f32 %v4958_v15, %v6384_v53  ;;  %2852 = vadd.xlane.f32.xlu1 %v2851_v16  ;;  %v2854_v20 = vsel %vm2751_vm3, %v2657_v13, 0.0  ;;  %v2660_v27 = vmul.f32 %v6397_v2, %v2525_v14 }
 0x1dc   :  { %v2039_v21 = vpop.f32.mrf.mxu1 }
 0x1dd   :  { %v2040_v22 = vadd.f32 %v6384_v53, %v2039_v21  ;;  %2855 = vadd.xlane.f32.xlu0 %v2854_v20  ;;  %v2659_v23 = vmul.f32 %v6397_v2, %v2524_v18  ;;  %v2527_v24 = vmax.f32 %v2045_v19, 0.0  ;;  %v2863_v35 = vsel %vm2751_vm3, %v2660_v27, 0.0 }
 0x1de   :  { %v4961_v25 = vpop.f32.mrf.mxu1 }
 0x1df   :  { %v2526_v28 = vmax.f32 %v2040_v22, 0.0  ;;  %v2055_v29 = vadd.f32 %v4961_v25, %v6384_v53  ;;  %2858 = vadd.xlane.f32.xlu1 %v2857_v26  ;;  %v2860_v30 = vsel %vm2751_vm3, %v2659_v23, 0.0  ;;  %v2662_v36 = vmul.f32 %v6397_v2, %v2527_v24 }
 0x1e0   :  { %v2049_v41 = vpop.f32.mrf.mxu1 }
 0x1e1   :  { %v2050_v31 = vadd.f32 %v6384_v53, %v2049_v41  ;;  %2861 = vadd.xlane.f32.xlu0 %v2860_v30  ;;  %v2661_v32 = vmul.f32 %v6397_v2, %v2526_v28  ;;  %v2529_v33 = vmax.f32 %v2055_v29, 0.0  ;;  %v2869_v46 = vsel %vm2751_vm3, %v2662_v36, 0.0 }
 0x1e2   :  { %v4964_v34 = vpop.f32.mrf.mxu1 }
 0x1e3   :  { %v2528_v37 = vmax.f32 %v2050_v31, 0.0  ;;  %v2065_v38 = vadd.f32 %v4964_v34, %v6384_v53  ;;  %2864 = vadd.xlane.f32.xlu1 %v2863_v35  ;;  %v2866_v39 = vsel %vm2751_vm3, %v2661_v32, 0.0  ;;  %v2664_v47 = vmul.f32 %v6397_v2, %v2529_v33 }
 0x1e4   :  { %v2059_v40 = vpop.f32.mrf.mxu1 }
 0x1e5   :  { %v2060_v42 = vadd.f32 %v6384_v53, %v2059_v40  ;;  %2867 = vadd.xlane.f32.xlu0 %v2866_v39  ;;  %v2663_v43 = vmul.f32 %v6397_v2, %v2528_v37  ;;  %v2531_v44 = vmax.f32 %v2065_v38, 0.0  ;;  %v2875_v57 = vsel %vm2751_vm3, %v2664_v47, 0.0 }
 0x1e6   :  { %v4967_v45 = vpop.f32.mrf.mxu1 }
 0x1e7   :  { %v2530_v48 = vmax.f32 %v2060_v42, 0.0  ;;  %v2075_v49 = vadd.f32 %v4967_v45, %v6384_v53  ;;  %2870 = vadd.xlane.f32.xlu1 %v2869_v46  ;;  %v2872_v50 = vsel %vm2751_vm3, %v2663_v43, 0.0  ;;  %v2666_v58 = vmul.f32 %v6397_v2, %v2531_v44 }
 0x1e8   :  { %v2069_v51 = vpop.f32.mrf.mxu1 }
 0x1e9   :  { %v2070_v52 = vadd.f32 %v6384_v53, %v2069_v51  ;;  %2873 = vadd.xlane.f32.xlu0 %v2872_v50  ;;  %v2665_v54 = vmul.f32 %v6397_v2, %v2530_v48  ;;  %v2533_v55 = vmax.f32 %v2075_v49, 0.0  ;;  %v2881_v4 = vsel %vm2751_vm3, %v2666_v58, 0.0 }
 0x1ea   :  { %v4970_v56 = vpop.f32.mrf.mxu1 }
 0x1eb   :  { %v2532_v59 = vmax.f32 %v2070_v52, 0.0  ;;  %v2085_v60 = vadd.f32 %v4970_v56, %v6384_v53  ;;  %2876 = vadd.xlane.f32.xlu1 %v2875_v57  ;;  %v2878_v61 = vsel %vm2751_vm3, %v2665_v54, 0.0  ;;  %v2668_v5 = vmul.f32 %v6397_v2, %v2533_v55 }
 0x1ec   :  { %v2079_v62 = vpop.f32.mrf.mxu1 }
 0x1ed   :  { %v2080_v63 = vadd.f32 %v6384_v53, %v2079_v62  ;;  %2879 = vadd.xlane.f32.xlu0 %v2878_v61  ;;  %v2667_v0 = vmul.f32 %v6397_v2, %v2532_v59  ;;  %v2535_v1 = vmax.f32 %v2085_v60, 0.0  ;;  %v2887_v14 = vsel %vm2751_vm3, %v2668_v5, 0.0 }
 0x1ee   :  { %v4973_v3 = vpop.f32.mrf.mxu1 }
 0x1ef   :  { %v2534_v6 = vmax.f32 %v2080_v63, 0.0  ;;  %v2095_v7 = vadd.f32 %v4973_v3, %v6384_v53  ;;  %2882 = vadd.xlane.f32.xlu1 %v2881_v4  ;;  %v2884_v8 = vsel %vm2751_vm3, %v2667_v0, 0.0  ;;  %v2670_v15 = vmul.f32 %v6397_v2, %v2535_v1 }
 0x1f0   :  { %v2089_v9 = vpop.f32.mrf.mxu1 }
 0x1f1   :  { %v2090_v10 = vadd.f32 %v6384_v53, %v2089_v9  ;;  %2885 = vadd.xlane.f32.xlu0 %v2884_v8  ;;  %v2669_v11 = vmul.f32 %v6397_v2, %v2534_v6  ;;  %v2537_v12 = vmax.f32 %v2095_v7, 0.0  ;;  %v2893_v24 = vsel %vm2751_vm3, %v2670_v15, 0.0 }
 0x1f2   :  { %v4976_v13 = vpop.f32.mrf.mxu1 }
 0x1f3   :  { %v2536_v16 = vmax.f32 %v2090_v10, 0.0  ;;  %v2105_v17 = vadd.f32 %v4976_v13, %v6384_v53  ;;  %2888 = vadd.xlane.f32.xlu1 %v2887_v14  ;;  %v2890_v18 = vsel %vm2751_vm3, %v2669_v11, 0.0  ;;  %v2672_v25 = vmul.f32 %v6397_v2, %v2537_v12 }
 0x1f4   :  { %v2099_v19 = vpop.f32.mrf.mxu1 }
 0x1f5   :  { %v2100_v20 = vadd.f32 %v6384_v53, %v2099_v19  ;;  %2891 = vadd.xlane.f32.xlu0 %v2890_v18  ;;  %v2671_v21 = vmul.f32 %v6397_v2, %v2536_v16  ;;  %v2539_v22 = vmax.f32 %v2105_v17, 0.0  ;;  %v2899_v33 = vsel %vm2751_vm3, %v2672_v25, 0.0 }
 0x1f6   :  { %v4979_v23 = vpop.f32.mrf.mxu1 }
 0x1f7   :  { %v2538_v26 = vmax.f32 %v2100_v20, 0.0  ;;  %v2115_v27 = vadd.f32 %v4979_v23, %v6384_v53  ;;  %2894 = vadd.xlane.f32.xlu1 %v2893_v24  ;;  %v2896_v28 = vsel %vm2751_vm3, %v2671_v21, 0.0  ;;  %v2674_v34 = vmul.f32 %v6397_v2, %v2539_v22 }
 0x1f8   :  { %v2109_v29 = vpop.f32.mrf.mxu1 }
 0x1f9   :  { %v2110_v30 = vadd.f32 %v6384_v53, %v2109_v29  ;;  %2897 = vadd.xlane.f32.xlu0 %v2896_v28  ;;  %v2673_v41 = vmul.f32 %v6397_v2, %v2538_v26  ;;  %v2541_v31 = vmax.f32 %v2115_v27, 0.0  ;;  %v2905_v44 = vsel %vm2751_vm3, %v2674_v34, 0.0  ;;  %v6655_v34 = vld [vmem:[%s7851_s4] ss:$0 sm:$0xff] }
 0x1fa   :  { %v4982_v32 = vpop.f32.mrf.mxu1 }
 0x1fb   :  { %v2540_v35 = vmax.f32 %v2110_v30, 0.0  ;;  %v2125_v36 = vadd.f32 %v4982_v32, %v6384_v53  ;;  %2900 = vadd.xlane.f32.xlu1 %v2899_v33  ;;  %v2902_v37 = vsel %vm2751_vm3, %v2673_v41, 0.0  ;;  %v2676_v45 = vmul.f32 %v6397_v2, %v2541_v31 }
 0x1fc   :  { %v2119_v38 = vpop.f32.mrf.mxu1 }
 0x1fd   :  { %v2120_v39 = vadd.f32 %v6384_v53, %v2119_v38  ;;  %2903 = vadd.xlane.f32.xlu0 %v2902_v37  ;;  %v2675_v40 = vmul.f32 %v6397_v2, %v2540_v35  ;;  %v2543_v42 = vmax.f32 %v2125_v36, 0.0  ;;  %v2911_v55 = vsel %vm2751_vm3, %v2676_v45, 0.0 }
 0x1fe   :  { %v4985_v43 = vpop.f32.mrf.mxu1 }
 0x1ff   :  { %v2542_v46 = vmax.f32 %v2120_v39, 0.0  ;;  %v2135_v47 = vadd.f32 %v4985_v43, %v6384_v53  ;;  %2906 = vadd.xlane.f32.xlu1 %v2905_v44  ;;  %v2908_v48 = vsel %vm2751_vm3, %v2675_v40, 0.0  ;;  %v2678_v56 = vmul.f32 %v6397_v2, %v2543_v42 }
 0x200   :  { %v2129_v49 = vpop.f32.mrf.mxu1 }
 0x201   :  { %v2130_v50 = vadd.f32 %v6384_v53, %v2129_v49  ;;  %2909 = vadd.xlane.f32.xlu0 %v2908_v48  ;;  %v2677_v51 = vmul.f32 %v6397_v2, %v2542_v46  ;;  %v2545_v52 = vmax.f32 %v2135_v47, 0.0  ;;  %v2917_v1 = vsel %vm2751_vm3, %v2678_v56, 0.0  ;;  %v6669_v49 = vld [vmem:[%s7852_s5] ss:$0 sm:$0xff] }
 0x202   :  { %v4988_v54 = vpop.f32.mrf.mxu1 }
 0x203   :  { %v2544_v57 = vmax.f32 %v2130_v50, 0.0  ;;  %v2145_v58 = vadd.f32 %v4988_v54, %v6384_v53  ;;  %2912 = vadd.xlane.f32.xlu1 %v2911_v55  ;;  %v2914_v59 = vsel %vm2751_vm3, %v2677_v51, 0.0  ;;  %v2680_v3 = vmul.f32 %v6397_v2, %v2545_v52 }
 0x204   :  { %v2139_v60 = vpop.f32.mrf.mxu1 }
 0x205   :  { %v2140_v61 = vadd.f32 %v6384_v53, %v2139_v60  ;;  %2915 = vadd.xlane.f32.xlu0 %v2914_v59  ;;  %v2679_v62 = vmul.f32 %v6397_v2, %v2544_v57  ;;  %v2547_v63 = vmax.f32 %v2145_v58, 0.0  ;;  %v2923_v12 = vsel %vm2751_vm3, %v2680_v3, 0.0 }
 0x206   :  { %v4991_v0 = vpop.f32.mrf.mxu1 }
 0x207   :  { %v2546_v4 = vmax.f32 %v2140_v61, 0.0  ;;  %v2155_v5 = vadd.f32 %v4991_v0, %v6384_v53  ;;  %2918 = vadd.xlane.f32.xlu1 %v2917_v1  ;;  %v2920_v6 = vsel %vm2751_vm3, %v2679_v62, 0.0  ;;  %v2682_v13 = vmul.f32 %v6397_v2, %v2547_v63  ;;  %v6679_v0 = vld [vmem:[#allocation2] ss:$0 sm:$0xff] }
 0x208   :  { %v2149_v7 = vpop.f32.mrf.mxu1 }
 0x209   :  { %v2150_v8 = vadd.f32 %v6384_v53, %v2149_v7  ;;  %2921 = vadd.xlane.f32.xlu0 %v2920_v6  ;;  %v2681_v9 = vmul.f32 %v6397_v2, %v2546_v4  ;;  %v2549_v10 = vmax.f32 %v2155_v5, 0.0  ;;  %v2929_v22 = vsel %vm2751_vm3, %v2682_v13, 0.0 }
 0x20a   :  { %v4994_v11 = vpop.f32.mrf.mxu1 }
 0x20b   :  { %v2548_v14 = vmax.f32 %v2150_v8, 0.0  ;;  %v2165_v15 = vadd.f32 %v4994_v11, %v6384_v53  ;;  %2924 = vadd.xlane.f32.xlu1 %v2923_v12  ;;  %v2926_v16 = vsel %vm2751_vm3, %v2681_v9, 0.0  ;;  %v2684_v23 = vmul.f32 %v6397_v2, %v2549_v10 }
 0x20c   :  { %v2159_v17 = vpop.f32.mrf.mxu1 }
 0x20d   :  { %v2160_v18 = vadd.f32 %v6384_v53, %v2159_v17  ;;  %2927 = vadd.xlane.f32.xlu0 %v2926_v16  ;;  %v2683_v19 = vmul.f32 %v6397_v2, %v2548_v14  ;;  %v2551_v20 = vmax.f32 %v2165_v15, 0.0  ;;  %v2935_v31 = vsel %vm2751_vm3, %v2684_v23, 0.0 }
 0x20e   :  { %v4997_v21 = vpop.f32.mrf.mxu1 }
 0x20f   :  { %v2550_v24 = vmax.f32 %v2160_v18, 0.0  ;;  %v2175_v25 = vadd.f32 %v4997_v21, %v6384_v53  ;;  %2930 = vadd.xlane.f32.xlu1 %v2929_v22  ;;  %v2932_v26 = vsel %vm2751_vm3, %v2683_v19, 0.0  ;;  %v2686_v32 = vmul.f32 %v6397_v2, %v2551_v20 }
 0x210   :  { %v2169_v27 = vpop.f32.mrf.mxu1 }
 0x211   :  { %v2170_v28 = vadd.f32 %v6384_v53, %v2169_v27  ;;  %2933 = vadd.xlane.f32.xlu0 %v2932_v26  ;;  %v2685_v29 = vmul.f32 %v6397_v2, %v2550_v24  ;;  %v2553_v30 = vmax.f32 %v2175_v25, 0.0  ;;  %v2941_v42 = vsel %vm2751_vm3, %v2686_v32, 0.0 }
 0x212   :  { %v5000_v41 = vpop.f32.mrf.mxu1 }
 0x213   :  { %v2552_v33 = vmax.f32 %v2170_v28, 0.0  ;;  %v2185_v35 = vadd.f32 %v6655_v34, %v5000_v41  ;;  %2936 = vadd.xlane.f32.xlu1 %v2935_v31  ;;  %v2938_v53 = vsel %vm2751_vm3, %v2685_v29, 0.0  ;;  %v2688_v43 = vmul.f32 %v6397_v2, %v2553_v30 }
 0x214   :  { %v2179_v36 = vpop.f32.mrf.mxu1 }
 0x215   :  { %v2180_v37 = vadd.f32 %v6655_v34, %v2179_v36  ;;  %2939 = vadd.xlane.f32.xlu0 %v2938_v53  ;;  %v2687_v38 = vmul.f32 %v6397_v2, %v2552_v33  ;;  %v2555_v39 = vmax.f32 %v2185_v35, 0.0  ;;  %v2947_v2 = vsel %vm2751_vm3, %v2688_v43, 0.0 }
 0x216   :  { %v5003_v40 = vpop.f32.mrf.mxu1 }
 0x217   :  { %v2554_v44 = vmax.f32 %v2180_v37, 0.0  ;;  %v2195_v45 = vadd.f32 %v6655_v34, %v5003_v40  ;;  %2942 = vadd.xlane.f32.xlu1 %v2941_v42  ;;  %v2944_v46 = vsel %vm2751_vm3, %v2687_v38, 0.0  ;;  %v2690_v54 = vmul.f32 %v6669_v49, %v2555_v39 }
 0x218   :  { %v2189_v47 = vpop.f32.mrf.mxu1 }
 0x219   :  { %v2190_v48 = vadd.f32 %v6655_v34, %v2189_v47  ;;  %2945 = vadd.xlane.f32.xlu0 %v2944_v46  ;;  %v2689_v50 = vmul.f32 %v6669_v49, %v2554_v44  ;;  %v2557_v51 = vmax.f32 %v2195_v45, 0.0  ;;  %v2953_v63 = vsel %vm2751_vm3, %v2690_v54, 0.0 }
 0x21a   :  { %v5006_v52 = vpop.f32.mrf.mxu1 }
 0x21b   :  { %v2556_v55 = vmax.f32 %v2190_v48, 0.0  ;;  %v2205_v56 = vadd.f32 %v6655_v34, %v5006_v52  ;;  %2948 = vadd.xlane.f32.xlu1 %v2947_v2  ;;  %v2950_v57 = vsel %vm2751_vm3, %v2689_v50, 0.0  ;;  %v2692_v1 = vmul.f32 %v6669_v49, %v2557_v51 }
 0x21c   :  { %v2199_v58 = vpop.f32.mrf.mxu1 }
 0x21d   :  { %v2200_v59 = vadd.f32 %v6655_v34, %v2199_v58  ;;  %2951 = vadd.xlane.f32.xlu0 %v2950_v57  ;;  %v2691_v60 = vmul.f32 %v6669_v49, %v2556_v55  ;;  %v2559_v61 = vmax.f32 %v2205_v56, 0.0  ;;  %v2959_v13 = vsel %vm2751_vm3, %v2692_v1, 0.0 }
 0x21e   :  { %v5009_v62 = vpop.f32.mrf.mxu1 }
 0x21f   :  { %v2558_v3 = vmax.f32 %v2200_v59, 0.0  ;;  %v2215_v4 = vadd.f32 %v6655_v34, %v5009_v62  ;;  %2954 = vadd.xlane.f32.xlu1 %v2953_v63  ;;  %v2956_v5 = vsel %vm2751_vm3, %v2691_v60, 0.0  ;;  %v2694_v14 = vmul.f32 %v6669_v49, %v2559_v61 }
 0x220   :  { %v2757_v6 = vpop.xlane.xlu0 %2756  ;;  %v2209_v7 = vpop.f32.mrf.mxu1 }
 0x221   :  { %v2561_v8 = vmax.f32 %v2215_v4, 0.0  ;;  %v3144_v9 = vadd.f32 %v6679_v0, %v2757_v6  ;;  %v2210_v10 = vadd.f32 %v6655_v34, %v2209_v7  ;;  %2957 = vadd.xlane.f32.xlu0 %v2956_v5  ;;  %v2693_v11 = vmul.f32 %v6669_v49, %v2558_v3 }
 0x222   :  { %v5012_v12 = vpop.f32.mrf.mxu1  ;;  %v2965_v28 = vsel %vm2751_vm3, %v2694_v14, 0.0 }
 0x223   :  { %v3272_v15 = vsub.f32 0.0, %v3144_v9  ;;  %v2560_v16 = vmax.f32 %v2210_v10, 0.0  ;;  %v2225_v17 = vadd.f32 %v6655_v34, %v5012_v12  ;;  %2960 = vadd.xlane.f32.xlu1 %v2959_v13  ;;  %v2962_v18 = vsel %vm2751_vm3, %v2693_v11, 0.0 }
 0x224   :  { %v2763_v19 = vpop.xlane.xlu1 %2762  ;;  %v2754_v20 = vpop.xlane.xlu0 %2753  ;;  %v2696_v25 = vmul.f32 %v6669_v49, %v2561_v8 }
 0x225   :  { %v3401_v21 = vmul.f32 1.442695, %v3272_v15  ;;  %v3146_v22 = vadd.f32 %v6679_v0, %v2763_v19  ;;  %v3143_v23 = vadd.f32 %v6679_v0, %v2754_v20  ;;  %v2219_v24 = vpop.f32.mrf.mxu1  ;;  %2963 = vadd.xlane.f32.xlu0 %v2962_v18  ;;  %v2563_v26 = vmax.f32 %v2225_v17, 0.0 }
 0x226   :  { %v2220_v27 = vadd.f32 %v6655_v34, %v2219_v24  ;;  %v2695_v29 = vmul.f32 %v6669_v49, %v2560_v16  ;;  %v2971_v40 = vsel %vm2751_vm3, %v2696_v25, 0.0 }
 0x227   :  { %5091 = vpow2.f32 %v3401_v21  ;;  %v3274_v30 = vsub.f32 0.0, %v3146_v22  ;;  %v3271_v41 = vsub.f32 0.0, %v3143_v23  ;;  %v5015_v31 = vpop.f32.mrf.mxu1  ;;  %2966 = vadd.xlane.f32.xlu1 %v2965_v28  ;;  %v2698_v46 = vmul.f32 %v6669_v49, %v2563_v26 }
 0x228   :  { %v2562_v32 = vmax.f32 %v2220_v27, 0.0  ;;  %v2235_v33 = vadd.f32 %v6655_v34, %v5015_v31  ;;  %v2760_v35 = vpop.xlane.xlu1 %2759  ;;  %v2968_v53 = vsel %vm2751_vm3, %v2695_v29, 0.0 }
 0x229   :  { %v3405_v36 = vmul.f32 1.442695, %v3274_v30  ;;  %v3399_v37 = vmul.f32 1.442695, %v3271_v41  ;;  %v3145_v38 = vadd.f32 %v6679_v0, %v2760_v35  ;;  %v2229_v39 = vpop.f32.mrf.mxu1  ;;  %2969 = vadd.xlane.f32.xlu0 %v2968_v53  ;;  %v2977_v63 = vsel %vm2751_vm3, %v2698_v46, 0.0 }
 0x22a   :  { %v2565_v42 = vmax.f32 %v2235_v33, 0.0  ;;  %v2230_v43 = vadd.f32 %v6655_v34, %v2229_v39  ;;  %v2766_v44 = vpop.xlane.xlu0 %2765  ;;  %v2697_v45 = vmul.f32 %v6669_v49, %v2562_v32 }
 0x22b   :  { %5093 = vpow2.f32 %v3405_v36  ;;  %v3273_v47 = vsub.f32 0.0, %v3145_v38  ;;  %v3147_v48 = vadd.f32 %v6679_v0, %v2766_v44  ;;  %v5018_v50 = vpop.f32.mrf.mxu1  ;;  %2972 = vadd.xlane.f32.xlu1 %v2971_v40 }
 0x22c   :  { %5095 = vpow2.f32 %v3399_v37  ;;  %v2564_v51 = vmax.f32 %v2230_v43, 0.0  ;;  %v2245_v52 = vadd.f32 %v6655_v34, %v5018_v50  ;;  %v2769_v2 = vpop.xlane.xlu1 %2768  ;;  %v2974_v54 = vsel %vm2751_vm3, %v2697_v45, 0.0 }
 0x22d   :  { %v3403_v55 = vmul.f32 1.442695, %v3273_v47  ;;  %v3275_v56 = vsub.f32 0.0, %v3147_v48  ;;  %v3148_v57 = vadd.f32 %v6679_v0, %v2769_v2  ;;  %v2239_v58 = vpop.f32.mrf.mxu1  ;;  %2975 = vadd.xlane.f32.xlu0 %v2974_v54  ;;  %v2700_v59 = vmul.f32 %v6669_v49, %v2565_v42 }
 0x22e   :  { %v2567_v60 = vmax.f32 %v2245_v52, 0.0  ;;  %v2240_v61 = vadd.f32 %v6655_v34, %v2239_v58  ;;  %v2772_v62 = vpop.xlane.xlu0 %2771  ;;  %v2699_v1 = vmul.f32 %v6669_v49, %v2564_v51 }
 0x22f   :  { %5097 = vpow2.f32 %v3403_v55  ;;  %v3407_v3 = vmul.f32 1.442695, %v3275_v56  ;;  %v3276_v4 = vsub.f32 0.0, %v3148_v57  ;;  %v3149_v5 = vadd.f32 %v6679_v0, %v2772_v62  ;;  %v5021_v6 = vpop.f32.mrf.mxu1  ;;  %2978 = vadd.xlane.f32.xlu1 %v2977_v63 }
 0x230   :  { %v2566_v7 = vmax.f32 %v2240_v61, 0.0  ;;  %v2255_v8 = vadd.f32 %v6655_v34, %v5021_v6  ;;  %v2775_v9 = vpop.xlane.xlu1 %2774  ;;  %v2980_v10 = vsel %vm2751_vm3, %v2699_v1, 0.0  ;;  %v2983_v11 = vsel %vm2751_vm3, %v2700_v59, 0.0 }
 0x231   :  { %5099 = vpow2.f32 %v3407_v3  ;;  %v3409_v12 = vmul.f32 1.442695, %v3276_v4  ;;  %v3277_v13 = vsub.f32 0.0, %v3149_v5  ;;  %v3150_v14 = vadd.f32 %v6679_v0, %v2775_v9  ;;  %v2249_v15 = vpop.f32.mrf.mxu1  ;;  %2981 = vadd.xlane.f32.xlu0 %v2980_v10 }
 0x232   :  { %v2569_v16 = vmax.f32 %v2255_v8, 0.0  ;;  %v2250_v17 = vadd.f32 %v6655_v34, %v2249_v15  ;;  %v2778_v18 = vpop.xlane.xlu0 %2777  ;;  %v2701_v19 = vmul.f32 %v6669_v49, %v2566_v7  ;;  %v2702_v20 = vmul.f32 %v6669_v49, %v2567_v60 }
 0x233   :  { %5101 = vpow2.f32 %v3409_v12  ;;  %v3411_v21 = vmul.f32 1.442695, %v3277_v13  ;;  %v3278_v22 = vsub.f32 0.0, %v3150_v14  ;;  %v3151_v23 = vadd.f32 %v6679_v0, %v2778_v18  ;;  %v5024_v24 = vpop.f32.mrf.mxu1  ;;  %2984 = vadd.xlane.f32.xlu1 %v2983_v11 }
 0x234   :  { %v5092_v25 = vpop.eup %5091  ;;  %v2568_v26 = vmax.f32 %v2250_v17, 0.0  ;;  %v6722_v27 = vadd.f32 %v6655_v34, %v5024_v24  ;;  %v2781_v28 = vpop.xlane.xlu1 %2780  ;;  %v2986_v29 = vsel %vm2751_vm3, %v2701_v19, 0.0  ;;  %v2989_v30 = vsel %vm2751_vm3, %v2702_v20, 0.0 }
 0x235   :  { %v3656_v41 = vadd.f32 1.0, %v5092_v25  ;;  %5103 = vpow2.f32 %v3411_v21  ;;  %v3413_v31 = vmul.f32 1.442695, %v3278_v22  ;;  %v3279_v32 = vsub.f32 0.0, %v3151_v23  ;;  %v2259_v33 = vpop.f32.mrf.mxu1  ;;  %2987 = vadd.xlane.f32.xlu0 %v2986_v29 }
 0x236   :  { %v2571_v35 = vmax.f32 %v6722_v27, 0.0  ;;  %v3152_v53 = vadd.f32 %v6679_v0, %v2781_v28  ;;  %v2260_v36 = vadd.f32 %v6655_v34, %v2259_v33  ;;  %v2784_v37 = vpop.xlane.xlu0 %2783  ;;  %v2703_v38 = vmul.f32 %v6669_v49, %v2568_v26 }
 0x237   :  { %5105 = vrcp.f32 %v3656_v41  ;;  %v3415_v39 = vmul.f32 1.442695, %v3279_v32  ;;  %v3153_v40 = vadd.f32 %v6679_v0, %v2784_v37  ;;  %v5027_v42 = vpop.f32.mrf.mxu1  ;;  %2990 = vadd.xlane.f32.xlu1 %v2989_v30  ;;  %v2704_v43 = vmul.f32 %v6669_v49, %v2569_v16 }
 0x238   :  { %v5094_v44 = vpop.eup %5093  ;;  %5107 = vpow2.f32 %v3413_v31  ;;  %v3280_v45 = vsub.f32 0.0, %v3152_v53  ;;  %v2570_v46 = vmax.f32 %v2260_v36, 0.0  ;;  %v6733_v47 = vadd.f32 %v6655_v34, %v5027_v42  ;;  %v2787_v48 = vpop.xlane.xlu1 %2786 }
 0x239   :  { %v5096_v50 = vpop.eup %5095  ;;  %v3658_v51 = vadd.f32 1.0, %v5094_v44  ;;  %5109 = vpow2.f32 %v3415_v39  ;;  %v3281_v52 = vsub.f32 0.0, %v3153_v40  ;;  %v3154_v2 = vadd.f32 %v6679_v0, %v2787_v48  ;;  %v2269_v54 = vpop.f32.mrf.mxu1 }
 0x23a   :  { %v3655_v55 = vadd.f32 1.0, %v5096_v50  ;;  %v3417_v56 = vmul.f32 1.442695, %v3280_v45  ;;  %v2573_v57 = vmax.f32 %v6733_v47, 0.0  ;;  %v6738_v58 = vadd.f32 %v6655_v34, %v2269_v54  ;;  %v2790_v59 = vpop.xlane.xlu0 %2789 }
 0x23b   :  { %5111 = vrcp.f32 %v3658_v51  ;;  %v3419_v60 = vmul.f32 1.442695, %v3281_v52  ;;  %v3282_v61 = vsub.f32 0.0, %v3154_v2  ;;  %v2992_v62 = vsel %vm2751_vm3, %v2703_v38, 0.0  ;;  %v5030_v63 = vpop.f32.mrf.mxu1 }
 0x23c   :  { %v5098_v1 = vpop.eup %5097  ;;  %5113 = vrcp.f32 %v3655_v55  ;;  %v2572_v3 = vmax.f32 %v6738_v58, 0.0  ;;  %2993 = vadd.xlane.f32.xlu0 %v2992_v62  ;;  %v3155_v4 = vadd.f32 %v6679_v0, %v2790_v59  ;;  %v6744_v5 = vadd.f32 %v6655_v34, %v5030_v63  ;;  %v2793_v6 = vpop.xlane.xlu1 %2792 }
 0x23d   :  { %v3657_v7 = vadd.f32 1.0, %v5098_v1  ;;  %5115 = vpow2.f32 %v3417_v56  ;;  %v3421_v8 = vmul.f32 1.442695, %v3282_v61  ;;  %v2995_v9 = vsel %vm2751_vm3, %v2704_v43, 0.0  ;;  %v2279_v10 = vpop.f32.mrf.mxu1 }
 0x23e   :  { %v5100_v11 = vpop.eup %5099  ;;  %5117 = vpow2.f32 %v3419_v60  ;;  %v3283_v12 = vsub.f32 0.0, %v3155_v4  ;;  %v2575_v13 = vmax.f32 %v6744_v5, 0.0  ;;  %2996 = vadd.xlane.f32.xlu1 %v2995_v9  ;;  %v3156_v14 = vadd.f32 %v6679_v0, %v2793_v6  ;;  %v2796_v15 = vpop.xlane.xlu0 %2795 }
 0x23f   :  { %5119 = vrcp.f32 %v3657_v7  ;;  %v3659_v16 = vadd.f32 1.0, %v5100_v11  ;;  %v6750_v17 = vadd.f32 %v6655_v34, %v2279_v10  ;;  %v2705_v18 = vmul.f32 %v6669_v49, %v2570_v46  ;;  %v5033_v19 = vpop.f32.mrf.mxu1 }
 0x240   :  { %v5102_v20 = vpop.eup %5101  ;;  %5121 = vpow2.f32 %v3421_v8  ;;  %v3423_v21 = vmul.f32 1.442695, %v3283_v12  ;;  %v3284_v22 = vsub.f32 0.0, %v3156_v14  ;;  %v3157_v23 = vadd.f32 %v6679_v0, %v2796_v15  ;;  %v2799_v24 = vpop.xlane.xlu1 %2798 }
 0x241   :  { %5123 = vrcp.f32 %v3659_v16  ;;  %v3660_v25 = vadd.f32 1.0, %v5102_v20  ;;  %v2574_v26 = vmax.f32 %v6750_v17, 0.0  ;;  %v2998_v28 = vsel %vm2751_vm3, %v2705_v18, 0.0  ;;  %v2289_v29 = vpop.f32.mrf.mxu1 }
 0x242   :  { %v5104_v30 = vpop.eup %5103  ;;  %5125 = vpow2.f32 %v3423_v21  ;;  %v3425_v41 = vmul.f32 1.442695, %v3284_v22  ;;  %2999 = vadd.xlane.f32.xlu0 %v2998_v28  ;;  %v3285_v31 = vsub.f32 0.0, %v3157_v23  ;;  %v6757_v32 = vadd.f32 %v6655_v34, %v5033_v19  ;;  %v2802_v33 = vpop.xlane.xlu0 %2801 }
 0x243   :  { %5127 = vrcp.f32 %v3660_v25  ;;  %v3661_v53 = vadd.f32 1.0, %v5104_v30  ;;  %v2706_v36 = vmul.f32 %v6669_v49, %v2571_v35  ;;  %v3158_v37 = vadd.f32 %v6679_v0, %v2799_v24  ;;  %v5036_v38 = vpop.f32.mrf.mxu1 }
 0x244   :  { %v5106_v39 = vpop.eup %5105  ;;  %5129 = vpow2.f32 %v3425_v41  ;;  %v3427_v40 = vmul.f32 1.442695, %v3285_v31  ;;  %v2577_v42 = vmax.f32 %v6757_v32, 0.0  ;;  %v6765_v43 = vadd.f32 %v6655_v34, %v2289_v29  ;;  %v2805_v44 = vpop.xlane.xlu1 %2804 }
 0x245   :  { %v5108_v45 = vpop.eup %5107  ;;  %4041 = vst.msk [vmem:[%s7854_s7 + $0x8] sm:$0xff] %vm4039_vm4, %v5106_v39  ;;  %5131 = vrcp.f32 %v3661_v53  ;;  %v3001_v27 = vsel %vm2751_vm3, %v2706_v36, 0.0  ;;  %v3286_v35 = vsub.f32 0.0, %v3158_v37  ;;  %v2707_v46 = vmul.f32 %v6669_v49, %v2572_v3  ;;  %v2299_v48 = vpop.f32.mrf.mxu1 }
 0x246   :  { %v5110_v50 = vpop.eup %5109  ;;  %v3662_v51 = vadd.f32 1.0, %v5108_v45  ;;  %5133 = vpow2.f32 %v3427_v40  ;;  %3002 = vadd.xlane.f32.xlu1 %v3001_v27  ;;  %v2576_v52 = vmax.f32 %v6765_v43, 0.0  ;;  %v3159_v2 = vadd.f32 %v6679_v0, %v2802_v33  ;;  %v2808_v54 = vpop.xlane.xlu0 %2807 }
 0x247   :  { %v3663_v55 = vadd.f32 1.0, %v5110_v50  ;;  %v3429_v56 = vmul.f32 1.442695, %v3286_v35  ;;  %v3004_v58 = vsel %vm2751_vm3, %v2707_v46, 0.0  ;;  %v6777_v59 = vadd.f32 %v6655_v34, %v5036_v38  ;;  %v5039_v60 = vpop.f32.mrf.mxu1 }
 0x248   :  { %v5112_v61 = vpop.eup %5111  ;;  %5135 = vrcp.f32 %v3662_v51  ;;  %3005 = vadd.xlane.f32.xlu0 %v3004_v58  ;;  %v3287_v62 = vsub.f32 0.0, %v3159_v2  ;;  %v2708_v63 = vmul.f32 %v6669_v49, %v2573_v57  ;;  %v3160_v1 = vadd.f32 %v6679_v0, %v2805_v44  ;;  %v2811_v3 = vpop.xlane.xlu1 %2810 }
 0x249   :  { %v5114_v4 = vpop.eup %5113  ;;  %4043 = vst.msk [vmem:[%s7854_s7 + $0x18] sm:$0xff] %vm4039_vm4, %v5112_v61  ;;  %5137 = vrcp.f32 %v3663_v55  ;;  %v2579_v6 = vmax.f32 %v6777_v59, 0.0  ;;  %v6789_v7 = vadd.f32 %v6655_v34, %v2299_v48  ;;  %v2709_v8 = vmul.f32 %v6669_v49, %v2574_v26  ;;  %v2309_v47 = vpop.f32.mrf.mxu1 }
 0x24a   :  { %v5116_v9 = vpop.eup %5115  ;;  %4040 = vst.msk [vmem:[%s7854_s7] sm:$0xff] %vm4039_vm4, %v5114_v4  ;;  %5139 = vpow2.f32 %v3429_v56  ;;  %v3431_v57 = vmul.f32 1.442695, %v3287_v62  ;;  %v3007_v10 = vsel %vm2751_vm3, %v2708_v63, 0.0  ;;  %v3288_v11 = vsub.f32 0.0, %v3160_v1  ;;  %v2814_v12 = vpop.xlane.xlu0 %2813 }
 0x24b   :  { %v5118_v14 = vpop.eup %5117  ;;  %v3664_v15 = vadd.f32 1.0, %v5116_v9  ;;  %3008 = vadd.xlane.f32.xlu1 %v3007_v10  ;;  %v2578_v16 = vmax.f32 %v6789_v7, 0.0  ;;  %v3010_v17 = vsel %vm2751_vm3, %v2709_v8, 0.0  ;;  %v3161_v18 = vadd.f32 %v6679_v0, %v2808_v54  ;;  %v5042_v19 = vpop.f32.mrf.mxu1 }
 0x24c   :  { %v5120_v20 = vpop.eup %5119  ;;  %v3665_v21 = vadd.f32 1.0, %v5118_v14  ;;  %5141 = vpow2.f32 %v3431_v57  ;;  %v3433_v22 = vmul.f32 1.442695, %v3288_v11  ;;  %3011 = vadd.xlane.f32.xlu0 %v3010_v17  ;;  %v6801_v23 = vadd.f32 %v6655_v34, %v5039_v60  ;;  %v2817_v24 = vpop.xlane.xlu1 %2816 }
 0x24d   :  { %v5122_v25 = vpop.eup %5121  ;;  %4042 = vst.msk [vmem:[%s7854_s7 + $0x10] sm:$0xff] %vm4039_vm4, %v5120_v20  ;;  %5143 = vrcp.f32 %v3664_v15  ;;  %v3289_v26 = vsub.f32 0.0, %v3161_v18  ;;  %v2710_v28 = vmul.f32 %v6669_v49, %v2575_v13  ;;  %v3162_v29 = vadd.f32 %v6679_v0, %v2811_v3  ;;  %v2319_v30 = vpop.f32.mrf.mxu1 }
 0x24e   :  { %v5124_v41 = vpop.eup %5123  ;;  %5145 = vrcp.f32 %v3665_v21  ;;  %v3666_v31 = vadd.f32 1.0, %v5122_v25  ;;  %v2581_v33 = vmax.f32 %v6801_v23, 0.0  ;;  %v6813_v53 = vadd.f32 %v6655_v34, %v2309_v47  ;;  %v2820_v36 = vpop.xlane.xlu0 %2819 }
 0x24f   :  { %v5126_v37 = vpop.eup %5125  ;;  %4044 = vst.msk [vmem:[%s7854_s7 + $0x20] sm:$0xff] %vm4039_vm4, %v5124_v41  ;;  %5147 = vpow2.f32 %v3433_v22  ;;  %v3435_v5 = vmul.f32 1.442695, %v3289_v26  ;;  %v3013_v13 = vsel %vm2751_vm3, %v2710_v28, 0.0  ;;  %v3290_v38 = vsub.f32 0.0, %v3162_v29  ;;  %v5045_v39 = vpop.f32.mrf.mxu1 }
 0x250   :  { %v5128_v40 = vpop.eup %5127  ;;  %5149 = vrcp.f32 %v3666_v31  ;;  %v3667_v44 = vadd.f32 1.0, %v5126_v37  ;;  %3014 = vadd.xlane.f32.xlu1 %v3013_v13  ;;  %v2580_v45 = vmax.f32 %v6813_v53, 0.0  ;;  %v2711_v27 = vmul.f32 %v6669_v49, %v2576_v52  ;;  %v2823_v35 = vpop.xlane.xlu1 %2822 }
 0x251   :  { %v5130_v46 = vpop.eup %5129  ;;  %4045 = vst.msk [vmem:[%s7854_s7 + $0x28] sm:$0xff] %vm4039_vm4, %v5128_v40  ;;  %5151 = vpow2.f32 %v3435_v5  ;;  %v3437_v48 = vmul.f32 1.442695, %v3290_v38  ;;  %v3163_v50 = vadd.f32 %v6679_v0, %v2814_v12  ;;  %v6830_v51 = vadd.f32 %v6655_v34, %v5042_v19  ;;  %v2329_v2 = vpop.f32.mrf.mxu1 }
 0x252   :  { %v5132_v54 = vpop.eup %5131  ;;  %5153 = vrcp.f32 %v3667_v44  ;;  %v3668_v43 = vadd.f32 1.0, %v5130_v46  ;;  %v3016_v52 = vsel %vm2751_vm3, %v2711_v27, 0.0  ;;  %v2712_v55 = vmul.f32 %v6669_v49, %v2577_v42  ;;  %v2826_v56 = vpop.xlane.xlu0 %2825 }
 0x253   :  { %v5134_v58 = vpop.eup %5133  ;;  %4046 = vst.msk [vmem:[%s7854_s7 + $0x30] sm:$0xff] %vm4039_vm4, %v5132_v54  ;;  %5155 = vpow2.f32 %v3437_v48  ;;  %3017 = vadd.xlane.f32.xlu0 %v3016_v52  ;;  %v3291_v60 = vsub.f32 0.0, %v3163_v50  ;;  %v2583_v61 = vmax.f32 %v6830_v51, 0.0  ;;  %v3164_v62 = vadd.f32 %v6679_v0, %v2817_v24  ;;  %v5048_v63 = vpop.f32.mrf.mxu1 }
 0x254   :  { %5157 = vrcp.f32 %v3668_v43  ;;  %v3669_v1 = vadd.f32 1.0, %v5134_v58  ;;  %v3019_v32 = vsel %vm2751_vm3, %v2712_v55, 0.0  ;;  %v6844_v42 = vadd.f32 %v6655_v34, %v2319_v30  ;;  %v2829_v3 = vpop.xlane.xlu1 %2828 }
 0x255   :  { %v5136_v4 = vpop.eup %5135  ;;  %v3439_v8 = vmul.f32 1.442695, %v3291_v60  ;;  %3020 = vadd.xlane.f32.xlu1 %v3019_v32  ;;  %v3292_v47 = vsub.f32 0.0, %v3164_v62  ;;  %v2713_v9 = vmul.f32 %v6669_v49, %v2578_v16  ;;  %v3165_v57 = vadd.f32 %v6679_v0, %v2820_v36  ;;  %v2339_v10 = vpop.f32.mrf.mxu1 }
 0x256   :  { %v5138_v11 = vpop.eup %5137  ;;  %4047 = vst.msk [vmem:[%s7854_s7 + $0x38] sm:$0xff] %vm4039_vm4, %v5136_v4  ;;  %5159 = vrcp.f32 %v3669_v1  ;;  %v2582_v12 = vmax.f32 %v6844_v42, 0.0  ;;  %v6856_v14 = vadd.f32 %v6655_v34, %v5045_v39  ;;  %v2714_v7 = vmul.f32 %v6669_v49, %v2579_v6  ;;  %v6861_v15 = vpop.xlane.xlu0 %2831 }
 0x257   :  { %v5140_v16 = vpop.eup %5139  ;;  %4048 = vst.msk [vmem:[%s7854_s7 + $0x40] sm:$0xff] %vm4039_vm4, %v5138_v11  ;;  %5161 = vpow2.f32 %v3439_v8  ;;  %v3441_v17 = vmul.f32 1.442695, %v3292_v47  ;;  %v3022_v18 = vsel %vm2751_vm3, %v2713_v9, 0.0  ;;  %v3293_v19 = vsub.f32 0.0, %v3165_v57  ;;  %v6868_v20 = vpop.f32.mrf.mxu1 }
 0x258   :  { %v3670_v21 = vadd.f32 1.0, %v5140_v16  ;;  %3023 = vadd.xlane.f32.xlu0 %v3022_v18  ;;  %v2585_v59 = vmax.f32 %v6856_v14, 0.0  ;;  %v3025_v6 = vsel %vm2751_vm3, %v2714_v7, 0.0  ;;  %v3166_v22 = vadd.f32 %v6679_v0, %v2823_v35  ;;  %v6873_v24 = vpop.xlane.xlu1 %2834 }
 0x259   :  { %v5142_v25 = vpop.eup %5141  ;;  %5163 = vpow2.f32 %v3441_v17  ;;  %v3443_v26 = vmul.f32 1.442695, %v3293_v19  ;;  %3026 = vadd.xlane.f32.xlu1 %v3025_v6  ;;  %v6876_v28 = vadd.f32 %v6655_v34, %v2329_v2  ;;  %v2715_v29 = vmul.f32 %v6669_v49, %v2580_v45  ;;  %v6879_v30 = vpop.f32.mrf.mxu1 }
 0x25a   :  { %v5144_v41 = vpop.eup %5143  ;;  %5165 = vrcp.f32 %v3670_v21  ;;  %v3671_v31 = vadd.f32 1.0, %v5142_v25  ;;  %v3294_v53 = vsub.f32 0.0, %v3166_v22  ;;  %v3167_v36 = vadd.f32 %v6679_v0, %v2826_v56  ;;  %v6882_v37 = vpop.xlane.xlu0 %2837 }
 0x25b   :  { %v5146_v5 = vpop.eup %5145  ;;  %4049 = vst.msk [vmem:[%s7854_s7 + $0x48] sm:$0xff] %vm4039_vm4, %v5144_v41  ;;  %5167 = vpow2.f32 %v3443_v26  ;;  %v2584_v13 = vmax.f32 %v6876_v28, 0.0  ;;  %v3028_v38 = vsel %vm2751_vm3, %v2715_v29, 0.0  ;;  %v2345_v39 = vadd.f32 %v6655_v34, %v5048_v63  ;;  %v6891_v40 = vpop.f32.mrf.mxu1 }
 0x25c   :  { %v5148_v44 = vpop.eup %5147  ;;  %4050 = vst.msk [vmem:[%s7854_s7 + $0x50] sm:$0xff] %vm4039_vm4, %v5146_v5  ;;  %5169 = vrcp.f32 %v3671_v31  ;;  %v3445_v45 = vmul.f32 1.442695, %v3294_v53  ;;  %3029 = vadd.xlane.f32.xlu0 %v3028_v38  ;;  %v3295_v27 = vsub.f32 0.0, %v3167_v36  ;;  %v2716_v35 = vmul.f32 %v6669_v49, %v2581_v33  ;;  %v6900_v46 = vpop.xlane.xlu1 %2840 }
 0x25d   :  { %v5150_v48 = vpop.eup %5149  ;;  %v3672_v50 = vadd.f32 1.0, %v5148_v44  ;;  %v2587_v2 = vmax.f32 %v2345_v39, 0.0  ;;  %v3168_v54 = vadd.f32 %v6679_v0, %v2829_v3  ;;  %v2340_v43 = vadd.f32 %v6655_v34, %v2339_v10  ;;  %v6904_v52 = vpop.f32.mrf.mxu1 }
 0x25e   :  { %v5152_v55 = vpop.eup %5151  ;;  %4051 = vst.msk [vmem:[%s7854_s7 + $0x58] sm:$0xff] %vm4039_vm4, %v5150_v48  ;;  %5171 = vpow2.f32 %v3445_v45  ;;  %v3447_v23 = vmul.f32 1.442695, %v3295_v27  ;;  %v3031_v33 = vsel %vm2751_vm3, %v2716_v35, 0.0  ;;  %v2717_v56 = vmul.f32 %v6669_v49, %v2582_v12  ;;  %v6912_v58 = vpop.xlane.xlu0 %2843 }
 0x25f   :  { %v5154_v60 = vpop.eup %5153  ;;  %5173 = vrcp.f32 %v3672_v50  ;;  %v3673_v62 = vadd.f32 1.0, %v5152_v55  ;;  %v6915_v63 = vmul.f32 %v6669_v49, %v2587_v2  ;;  %3032 = vadd.xlane.f32.xlu1 %v3031_v33  ;;  %v3296_v1 = vsub.f32 0.0, %v3168_v54  ;;  %v6917_v32 = vpop.f32.mrf.mxu1 }
 0x260   :  { %v5156_v42 = vpop.eup %5155  ;;  %4052 = vst.msk [vmem:[%s7854_s7 + $0x60] sm:$0xff] %vm4039_vm4, %v5154_v60  ;;  %5175 = vpow2.f32 %v3447_v23  ;;  %v2586_v3 = vmax.f32 %v2340_v43, 0.0  ;;  %v3034_v4 = vsel %vm2751_vm3, %v2717_v56, 0.0  ;;  %v3169_v8 = vadd.f32 %v6679_v0, %v6861_v15  ;;  %v6926_v47 = vpop.xlane.xlu1 %2846 }
 0x261   :  { %v5158_v9 = vpop.eup %5157  ;;  %5177 = vrcp.f32 %v3673_v62  ;;  %v3674_v57 = vadd.f32 1.0, %v5156_v42  ;;  %v3449_v10 = vmul.f32 1.442695, %v3296_v1  ;;  %3035 = vadd.xlane.f32.xlu0 %v3034_v4  ;;  %v2355_v11 = vadd.f32 %v6655_v34, %v6868_v20  ;;  %v6930_v12 = vpop.f32.mrf.mxu1 }
 0x262   :  { %4053 = vst.msk [vmem:[%s7854_s7 + $0x68] sm:$0xff] %vm4039_vm4, %v5158_v9  ;;  %v2721_v7 = vmul.f32 %v6669_v49, %v2586_v3  ;;  %v3297_v15 = vsub.f32 0.0, %v3169_v8  ;;  %v2718_v16 = vmul.f32 %v6669_v49, %v2583_v61  ;;  %v3170_v17 = vadd.f32 %v6679_v0, %v6873_v24  ;;  %v6942_v18 = vpop.xlane.xlu0 %2849 }
 0x263   :  { %v5160_v19 = vpop.eup %5159  ;;  %5179 = vrcp.f32 %v3674_v57  ;;  %v2589_v20 = vmax.f32 %v2355_v11, 0.0  ;;  %v2350_v21 = vadd.f32 %v6655_v34, %v6879_v30  ;;  %v2719_v6 = vmul.f32 %v6669_v49, %v2584_v13  ;;  %v6947_v22 = vpop.f32.mrf.mxu1 }
 0x264   :  { %v5162_v25 = vpop.eup %5161  ;;  %4054 = vst.msk [vmem:[%s7854_s7 + $0x70] sm:$0xff] %vm4039_vm4, %v5160_v19  ;;  %5181 = vpow2.f32 %v3449_v10  ;;  %v3451_v51 = vmul.f32 1.442695, %v3297_v15  ;;  %v3037_v61 = vsel %vm2751_vm3, %v2718_v16, 0.0  ;;  %v3298_v24 = vsub.f32 0.0, %v3170_v17  ;;  %v6954_v26 = vpop.xlane.xlu1 %2852 }
 0x265   :  { %v3675_v28 = vadd.f32 1.0, %v5162_v25  ;;  %v6957_v29 = vmul.f32 %v6669_v49, %v2589_v20  ;;  %3038 = vadd.xlane.f32.xlu1 %v3037_v61  ;;  %v2588_v30 = vmax.f32 %v2350_v21, 0.0  ;;  %v3040_v41 = vsel %vm2751_vm3, %v2719_v6, 0.0  ;;  %v6960_v31 = vpop.f32.mrf.mxu1  ;;  %v7019_v17 = vld [vmem:[%s7851_s4] ss:$0 sm:$0xff] }
 0x266   :  { %v5164_v53 = vpop.eup %5163  ;;  %5183 = vpow2.f32 %v3451_v51  ;;  %v3453_v36 = vmul.f32 1.442695, %v3298_v24  ;;  %3041 = vadd.xlane.f32.xlu0 %v3040_v41  ;;  %v3171_v5 = vadd.f32 %v6679_v0, %v6882_v37  ;;  %v2365_v13 = vadd.f32 %v6655_v34, %v6891_v40  ;;  %v6966_v38 = vpop.xlane.xlu0 %2855 }
 0x267   :  { %v5166_v39 = vpop.eup %5165  ;;  %5185 = vrcp.f32 %v3675_v28  ;;  %v3676_v44 = vadd.f32 1.0, %v5164_v53  ;;  %v2723_v45 = vmul.f32 %v6669_v49, %v2588_v30  ;;  %v2720_v27 = vmul.f32 %v6669_v49, %v2585_v59  ;;  %v6972_v35 = vpop.f32.mrf.mxu1 }
 0x268   :  { %v5168_v48 = vpop.eup %5167  ;;  %4055 = vst.msk [vmem:[%s7854_s7 + $0x78] sm:$0xff] %vm4039_vm4, %v5166_v39  ;;  %5187 = vpow2.f32 %v3453_v36  ;;  %v3299_v37 = vsub.f32 0.0, %v3171_v5  ;;  %v2591_v40 = vmax.f32 %v2365_v13, 0.0  ;;  %v3172_v50 = vadd.f32 %v6679_v0, %v6900_v46  ;;  %v6980_v2 = vpop.xlane.xlu1 %2858 }
 0x269   :  { %v5170_v54 = vpop.eup %5169  ;;  %5189 = vrcp.f32 %v3676_v44  ;;  %v3677_v14 = vadd.f32 1.0, %v5168_v48  ;;  %v3043_v59 = vsel %vm2751_vm3, %v2720_v27, 0.0  ;;  %v2360_v43 = vadd.f32 %v6655_v34, %v6904_v52  ;;  %v6985_v55 = vpop.f32.mrf.mxu1 }
 0x26a   :  { %4056 = vst.msk [vmem:[%s7854_s7 + $0x80] sm:$0xff] %vm4039_vm4, %v5170_v54  ;;  %v3455_v23 = vmul.f32 1.442695, %v3299_v37  ;;  %v6992_v46 = vmul.f32 %v6669_v49, %v2591_v40  ;;  %3044 = vadd.xlane.f32.xlu1 %v3043_v59  ;;  %v3300_v33 = vsub.f32 0.0, %v3172_v50  ;;  %v3046_v56 = vsel %vm2751_vm3, %v2721_v7, 0.0  ;;  %v6995_v60 = vpop.xlane.xlu0 %2861 }
 0x26b   :  { %v5172_v62 = vpop.eup %5171  ;;  %5191 = vrcp.f32 %v3677_v14  ;;  %v2590_v52 = vmax.f32 %v2360_v43, 0.0  ;;  %3047 = vadd.xlane.f32.xlu0 %v3046_v56  ;;  %v3173_v1 = vadd.f32 %v6679_v0, %v6912_v58  ;;  %v2375_v42 = vadd.f32 %v6655_v34, %v6917_v32  ;;  %v7001_v3 = vpop.f32.mrf.mxu1 }
 0x26c   :  { %v5174_v4 = vpop.eup %5173  ;;  %v3678_v8 = vadd.f32 1.0, %v5172_v62  ;;  %5193 = vpow2.f32 %v3455_v23  ;;  %v3457_v9 = vmul.f32 1.442695, %v3300_v33  ;;  %v3049_v57 = vsel %vm2751_vm3, %v6915_v63, 0.0  ;;  %v7005_v10 = vpop.xlane.xlu1 %2864  ;;  %v7073_v23 = vld [vmem:[#allocation2] ss:$0 sm:$0xff] }
 0x26d   :  { %v5176_v11 = vpop.eup %5175  ;;  %4057 = vst.msk [vmem:[%s7854_s7 + $0x88] sm:$0xff] %vm4039_vm4, %v5174_v4  ;;  %v2725_v58 = vmul.f32 %v6669_v49, %v2590_v52  ;;  %v3301_v34 = vsub.f32 0.0, %v3173_v1  ;;  %v2593_v32 = vmax.f32 %v2375_v42, 0.0  ;;  %v3174_v7 = vadd.f32 %v6679_v0, %v6926_v47  ;;  %v7014_v15 = vpop.f32.mrf.mxu1 }
 0x26e   :  { %v5178_v16 = vpop.eup %5177  ;;  %5195 = vrcp.f32 %v3678_v8  ;;  %v3679_v63 = vadd.f32 1.0, %v5176_v11  ;;  %3050 = vadd.xlane.f32.xlu1 %v3049_v57  ;;  %v2370_v19 = vadd.f32 %v7019_v17, %v6930_v12  ;;  %v3052_v20 = vsel %vm2751_vm3, %v2723_v45, 0.0  ;;  %v7024_v21 = vpop.xlane.xlu0 %2867 }
 0x26f   :  { %4058 = vst.msk [vmem:[%s7854_s7 + $0x90] sm:$0xff] %vm4039_vm4, %v5178_v16  ;;  %5197 = vpow2.f32 %v3457_v9  ;;  %v3459_v47 = vmul.f32 1.442695, %v3301_v34  ;;  %v7031_v6 = vmul.f32 %v6669_v49, %v2593_v32  ;;  %v3302_v25 = vsub.f32 0.0, %v3174_v7  ;;  %3053 = vadd.xlane.f32.xlu0 %v3052_v20  ;;  %v7033_v51 = vpop.f32.mrf.mxu1 }
 0x270   :  { %v5180_v61 = vpop.eup %5179  ;;  %5199 = vrcp.f32 %v3679_v63  ;;  %v2592_v12 = vmax.f32 %v2370_v19, 0.0  ;;  %v3175_v24 = vadd.f32 %v6679_v0, %v6942_v18  ;;  %v2385_v28 = vadd.f32 %v7019_v17, %v6947_v22  ;;  %v7039_v30 = vpop.xlane.xlu1 %2870  ;;  %v7054_v22 = vld [vmem:[%s7852_s5] ss:$0 sm:$0xff] }
 0x271   :  { %v5182_v41 = vpop.eup %5181  ;;  %4059 = vst.msk [vmem:[%s7854_s7 + $0x98] sm:$0xff] %vm4039_vm4, %v5180_v61  ;;  %5201 = vpow2.f32 %v3459_v47  ;;  %v3461_v49 = vmul.f32 1.442695, %v3302_v25  ;;  %v3055_v53 = vsel %vm2751_vm3, %v6957_v29, 0.0  ;;  %v3176_v36 = vadd.f32 %v6679_v0, %v6954_v26  ;;  %v7049_v18 = vpop.f32.mrf.mxu1 }
 0x272   :  { %v3680_v5 = vadd.f32 1.0, %v5182_v41  ;;  %v2727_v13 = vmul.f32 %v7054_v22, %v2592_v12  ;;  %v3303_v39 = vsub.f32 0.0, %v3175_v24  ;;  %v2595_v44 = vmax.f32 %v2385_v28, 0.0  ;;  %3056 = vadd.xlane.f32.xlu1 %v3055_v53  ;;  %v7057_v45 = vpop.xlane.xlu0 %2873 }
 0x273   :  { %v5184_v27 = vpop.eup %5183  ;;  %5203 = vpow2.f32 %v3461_v49  ;;  %v3304_v29 = vsub.f32 0.0, %v3176_v36  ;;  %v2380_v0 = vadd.f32 %v7019_v17, %v6960_v31  ;;  %v3058_v26 = vsel %vm2751_vm3, %v2725_v58, 0.0  ;;  %v7062_v48 = vpop.f32.mrf.mxu1 }
 0x274   :  { %v5186_v37 = vpop.eup %5185  ;;  %5205 = vrcp.f32 %v3680_v5  ;;  %v3681_v40 = vadd.f32 1.0, %v5184_v27  ;;  %v3463_v50 = vmul.f32 1.442695, %v3303_v39  ;;  %v7065_v54 = vmul.f32 %v7054_v22, %v2595_v44  ;;  %3059 = vadd.xlane.f32.xlu0 %v3058_v26  ;;  %v7067_v14 = vpop.xlane.xlu1 %2876 }
 0x275   :  { %v5188_v59 = vpop.eup %5187  ;;  %4060 = vst.msk [vmem:[%s7854_s7 + $0xa0] sm:$0xff] %vm4039_vm4, %v5186_v37  ;;  %v3465_v31 = vmul.f32 1.442695, %v3304_v29  ;;  %v2594_v43 = vmax.f32 %v2380_v0, 0.0  ;;  %v3177_v33 = vadd.f32 %v7073_v23, %v6966_v38  ;;  %v2395_v56 = vadd.f32 %v7019_v17, %v6972_v35  ;;  %v7079_v62 = vpop.f32.mrf.mxu1 }
 0x276   :  { %v5190_v52 = vpop.eup %5189  ;;  %5207 = vrcp.f32 %v3681_v40  ;;  %v3682_v1 = vadd.f32 1.0, %v5188_v59  ;;  %v3061_v42 = vsel %vm2751_vm3, %v6992_v46, 0.0  ;;  %v3178_v4 = vadd.f32 %v7073_v23, %v6980_v2  ;;  %v7085_v8 = vpop.xlane.xlu0 %2879 }
 0x277   :  { %4061 = vst.msk [vmem:[%s7854_s7 + $0xa8] sm:$0xff] %vm4039_vm4, %v5190_v52  ;;  %5209 = vpow2.f32 %v3463_v50  ;;  %v2729_v38 = vmul.f32 %v7054_v22, %v2594_v43  ;;  %v3305_v35 = vsub.f32 0.0, %v3177_v33  ;;  %v2597_v9 = vmax.f32 %v2395_v56, 0.0  ;;  %3062 = vadd.xlane.f32.xlu1 %v3061_v42  ;;  %v7092_v57 = vpop.f32.mrf.mxu1 }
 0x278   :  { %v5192_v11 = vpop.eup %5191  ;;  %5211 = vrcp.f32 %v3682_v1  ;;  %v3306_v46 = vsub.f32 0.0, %v3178_v4  ;;  %v2390_v2 = vadd.f32 %v7019_v17, %v6985_v55  ;;  %v3064_v58 = vsel %vm2751_vm3, %v2727_v13, 0.0  ;;  %v7097_v34 = vpop.xlane.xlu1 %2882 }
 0x279   :  { %v5194_v32 = vpop.eup %5193  ;;  %4062 = vst.msk [vmem:[%s7854_s7 + $0xb0] sm:$0xff] %vm4039_vm4, %v5192_v11  ;;  %5213 = vpow2.f32 %v3465_v31  ;;  %v3467_v7 = vmul.f32 1.442695, %v3305_v35  ;;  %v7104_v16 = vmul.f32 %v7054_v22, %v2597_v9  ;;  %3065 = vadd.xlane.f32.xlu0 %v3064_v58  ;;  %v3179_v63 = vadd.f32 %v7073_v23, %v6995_v60  ;;  %v7110_v25 = vpop.f32.mrf.mxu1 }
 0x27a   :  { %v3683_v55 = vadd.f32 1.0, %v5194_v32  ;;  %v3469_v19 = vmul.f32 1.442695, %v3306_v46  ;;  %v2596_v20 = vmax.f32 %v2390_v2, 0.0  ;;  %v2405_v47 = vadd.f32 %v7019_v17, %v7001_v3  ;;  %v7112_v61 = vpop.xlane.xlu0 %2885 }
 0x27b   :  { %v5196_v12 = vpop.eup %5195  ;;  %5215 = vpow2.f32 %v3467_v7  ;;  %v3307_v24 = vsub.f32 0.0, %v3179_v63  ;;  %v3067_v28 = vsel %vm2751_vm3, %v7031_v6, 0.0  ;;  %v3180_v41 = vadd.f32 %v7073_v23, %v7005_v10  ;;  %v7137_v0 = vpop.f32.mrf.mxu1 }
 0x27c   :  { %v5198_v60 = vpop.eup %5197  ;;  %4063 = vst.msk [vmem:[%s7854_s7 + $0xb8] sm:$0xff] %vm4039_vm4, %v5196_v12  ;;  %5217 = vrcp.f32 %v3683_v55  ;;  %v2731_v3 = vmul.f32 %v7054_v22, %v2596_v20  ;;  %v2599_v49 = vmax.f32 %v2405_v47, 0.0  ;;  %3068 = vadd.xlane.f32.xlu1 %v3067_v28  ;;  %v2400_v53 = vadd.f32 %v7019_v17, %v7014_v15  ;;  %v7125_v36 = vpop.xlane.xlu1 %2888 }
 0x27d   :  { %v5200_v6 = vpop.eup %5199  ;;  %v3684_v5 = vadd.f32 1.0, %v5198_v60  ;;  %5219 = vpow2.f32 %v3469_v19  ;;  %v3471_v10 = vmul.f32 1.442695, %v3307_v24  ;;  %v3308_v13 = vsub.f32 0.0, %v3180_v41 }
 0x27e   :  { %v5202_v39 = vpop.eup %5201  ;;  %4064 = vst.msk [vmem:[%s7854_s7 + $0xc0] sm:$0xff] %vm4039_vm4, %v5200_v6  ;;  %v7132_v44 = vmul.f32 %v7054_v22, %v2599_v49  ;;  %v2598_v27 = vmax.f32 %v2400_v53, 0.0  ;;  %v3070_v29 = vsel %vm2751_vm3, %v2729_v38, 0.0  ;;  %v3181_v15 = vadd.f32 %v7073_v23, %v7024_v21  ;;  %v7139_v26 = vpop.xlane.xlu0 %2891 }
 0x27f   :  { %5221 = vrcp.f32 %v3684_v5  ;;  %v3685_v37 = vadd.f32 1.0, %v5202_v39  ;;  %v3473_v40 = vmul.f32 1.442695, %v3308_v13  ;;  %3071 = vadd.xlane.f32.xlu0 %v3070_v29  ;;  %v2415_v50 = vadd.f32 %v7019_v17, %v7033_v51  ;;  %v7157_v38 = vpop.f32.mrf.mxu1 }
 0x280   :  { %v5204_v59 = vpop.eup %5203  ;;  %5223 = vpow2.f32 %v3471_v10  ;;  %v2733_v31 = vmul.f32 %v7054_v22, %v2598_v27  ;;  %v3309_v43 = vsub.f32 0.0, %v3181_v15  ;;  %v3073_v33 = vsel %vm2751_vm3, %v7065_v54, 0.0  ;;  %v7146_v21 = vpop.xlane.xlu1 %2894 }
 0x281   :  { %v5206_v56 = vpop.eup %5205  ;;  %5225 = vrcp.f32 %v3685_v37  ;;  %v3686_v52 = vadd.f32 1.0, %v5204_v59  ;;  %v2601_v1 = vmax.f32 %v2415_v50, 0.0  ;;  %3074 = vadd.xlane.f32.xlu1 %v3073_v33  ;;  %v3182_v42 = vadd.f32 %v7073_v23, %v7039_v30  ;;  %v7186_v28 = vpop.f32.mrf.mxu1 }
 0x282   :  { %4065 = vst.msk [vmem:[%s7854_s7 + $0xc8] sm:$0xff] %vm4039_vm4, %v5206_v56  ;;  %5227 = vpow2.f32 %v3473_v40  ;;  %v3475_v51 = vmul.f32 1.442695, %v3309_v43  ;;  %v2410_v54 = vadd.f32 %v7019_v17, %v7049_v18  ;;  %v3076_v4 = vsel %vm2751_vm3, %v2731_v3, 0.0  ;;  %v7159_v35 = vpop.xlane.xlu0 %2897 }
 0x283   :  { %v5208_v9 = vpop.eup %5207  ;;  %5229 = vrcp.f32 %v3686_v52  ;;  %v7162_v30 = vmul.f32 %v7054_v22, %v2601_v1  ;;  %v3310_v11 = vsub.f32 0.0, %v3182_v42  ;;  %3077 = vadd.xlane.f32.xlu0 %v3076_v4  ;;  %v3183_v46 = vadd.f32 %v7073_v23, %v7057_v45  ;;  %v7206_v40 = vpop.f32.mrf.mxu1 }
 0x284   :  { %v5210_v2 = vpop.eup %5209  ;;  %4066 = vst.msk [vmem:[%s7854_s7 + $0xd0] sm:$0xff] %vm4039_vm4, %v5208_v9  ;;  %5231 = vpow2.f32 %v3475_v51  ;;  %v2600_v18 = vmax.f32 %v2410_v54, 0.0  ;;  %v2425_v58 = vadd.f32 %v7019_v17, %v7062_v48  ;;  %v3079_v32 = vsel %vm2751_vm3, %v7104_v16, 0.0  ;;  %v7174_v7 = vpop.xlane.xlu1 %2900 }
 0x285   :  { %v5212_v63 = vpop.eup %5211  ;;  %v3687_v55 = vadd.f32 1.0, %v5210_v2  ;;  %v3477_v19 = vmul.f32 1.442695, %v3310_v11  ;;  %v3311_v45 = vsub.f32 0.0, %v3183_v46  ;;  %3080 = vadd.xlane.f32.xlu1 %v3079_v32  ;;  %v3184_v20 = vadd.f32 %v7073_v23, %v7067_v14  ;;  %v5084_v11 = vpop.f32.mrf.mxu1 }
 0x286   :  { %v5214_v47 = vpop.eup %5213  ;;  %4067 = vst.msk [vmem:[%s7854_s7 + $0xd8] sm:$0xff] %vm4039_vm4, %v5212_v63  ;;  %v2735_v48 = vmul.f32 %v7054_v22, %v2600_v18  ;;  %v2603_v12 = vmax.f32 %v2425_v58, 0.0  ;;  %v2420_v16 = vadd.f32 %v7019_v17, %v7079_v62  ;;  %v3082_v24 = vsel %vm2751_vm3, %v2733_v31, 0.0  ;;  %v7188_v41 = vpop.xlane.xlu0 %2903 }
 0x287   :  { %5233 = vrcp.f32 %v3687_v55  ;;  %v3688_v14 = vadd.f32 1.0, %v5214_v47  ;;  %v3479_v60 = vmul.f32 1.442695, %v3311_v45  ;;  %v3312_v3 = vsub.f32 0.0, %v3184_v20  ;;  %3083 = vadd.xlane.f32.xlu0 %v3082_v24  ;;  %v2459_v24 = vpop.f32.mrf.mxu1 }
 0x288   :  { %v5216_v49 = vpop.eup %5215  ;;  %5235 = vpow2.f32 %v3477_v19  ;;  %v7191_v53 = vmul.f32 %v7054_v22, %v2603_v12  ;;  %v2602_v6 = vmax.f32 %v2420_v16, 0.0  ;;  %v3185_v62 = vadd.f32 %v7073_v23, %v7085_v8  ;;  %v7195_v5 = vpop.xlane.xlu1 %2906 }
 0x289   :  { %v5218_v10 = vpop.eup %5217  ;;  %5237 = vrcp.f32 %v3688_v14  ;;  %v3689_v13 = vadd.f32 1.0, %v5216_v49  ;;  %v3481_v39 = vmul.f32 1.442695, %v3312_v3  ;;  %v2435_v27 = vadd.f32 %v7019_v17, %v7092_v57 }
 0x28a   :  { %v5220_v29 = vpop.eup %5219  ;;  %4068 = vst.msk [vmem:[%s7854_s7 + $0xe0] sm:$0xff] %vm4039_vm4, %v5218_v10  ;;  %5239 = vpow2.f32 %v3479_v60  ;;  %v2737_v15 = vmul.f32 %v7054_v22, %v2602_v6  ;;  %v3313_v37 = vsub.f32 0.0, %v3185_v62  ;;  %v3085_v8 = vsel %vm2751_vm3, %v7132_v44, 0.0  ;;  %v7208_v50 = vpop.xlane.xlu0 %2909 }
 0x28b   :  { %5241 = vrcp.f32 %v3689_v13  ;;  %v3690_v59 = vadd.f32 1.0, %v5220_v29  ;;  %v2605_v57 = vmax.f32 %v2435_v27, 0.0  ;;  %3086 = vadd.xlane.f32.xlu1 %v3085_v8  ;;  %v3186_v31 = vadd.f32 %v7073_v23, %v7097_v34  ;;  %v5087_v8 = vpop.f32.mrf.mxu1 }
 0x28c   :  { %v5222_v43 = vpop.eup %5221  ;;  %5243 = vpow2.f32 %v3481_v39  ;;  %v3483_v33 = vmul.f32 1.442695, %v3313_v37  ;;  %v2430_v56 = vadd.f32 %v7019_v17, %v7110_v25  ;;  %v3088_v52 = vsel %vm2751_vm3, %v2735_v48, 0.0  ;;  %v7215_v44 = vpop.xlane.xlu1 %2912 }
 0x28d   :  { %v5224_v1 = vpop.eup %5223  ;;  %4069 = vst.msk [vmem:[%s7854_s7 + $0xe8] sm:$0xff] %vm4039_vm4, %v5222_v43  ;;  %5245 = vrcp.f32 %v3690_v59  ;;  %v7222_v42 = vmul.f32 %v7054_v22, %v2605_v57  ;;  %v3314_v34 = vsub.f32 0.0, %v3186_v31  ;;  %3089 = vadd.xlane.f32.xlu0 %v3088_v52  ;;  %v3187_v51 = vadd.f32 %v7073_v23, %v7112_v61 }
 0x28e   :  { %v5226_v25 = vpop.eup %5225  ;;  %v3691_v54 = vadd.f32 1.0, %v5224_v1  ;;  %5247 = vpow2.f32 %v3483_v33  ;;  %v2604_v4 = vmax.f32 %v2430_v56, 0.0  ;;  %v2445_v9 = vadd.f32 %v7019_v17, %v7137_v0  ;;  %v7228_v46 = vpop.xlane.xlu0 %2915 }
 0x28f   :  { %v5228_v2 = vpop.eup %5227  ;;  %4070 = vst.msk [vmem:[%s7854_s7 + $0xf0] sm:$0xff] %vm4039_vm4, %v5226_v25  ;;  %v3485_v18 = vmul.f32 1.442695, %v3314_v34  ;;  %v3315_v58 = vsub.f32 0.0, %v3187_v51  ;;  %v3091_v61 = vsel %vm2751_vm3, %v7162_v30, 0.0  ;;  %v3188_v32 = vadd.f32 %v7073_v23, %v7125_v36 }
 0x290   :  { %v5230_v63 = vpop.eup %5229  ;;  %5249 = vrcp.f32 %v3691_v54  ;;  %v3692_v0 = vadd.f32 1.0, %v5228_v2  ;;  %v2739_v55 = vmul.f32 %v7054_v22, %v2604_v4  ;;  %v2607_v19 = vmax.f32 %v2445_v9, 0.0  ;;  %3092 = vadd.xlane.f32.xlu1 %v3091_v61  ;;  %v7239_v45 = vpop.xlane.xlu1 %2918 }
 0x291   :  { %v5232_v20 = vpop.eup %5231  ;;  %4071 = vst.msk [vmem:[%s7854_s7 + $0xf8] sm:$0xff] %vm4039_vm4, %v5230_v63  ;;  %5251 = vpow2.f32 %v3485_v18  ;;  %v3487_v30 = vmul.f32 1.442695, %v3315_v58  ;;  %v3316_v47 = vsub.f32 0.0, %v3188_v32  ;;  %v2440_v36 = vadd.f32 %v7019_v17, %v7157_v38  ;;  %v2469_v58 = vpop.f32.mrf.mxu1 }
 0x292   :  { %5253 = vrcp.f32 %v3692_v0  ;;  %v3693_v48 = vadd.f32 1.0, %v5232_v20  ;;  %v7248_v12 = vmul.f32 %v7054_v22, %v2607_v19  ;;  %v3094_v16 = vsel %vm2751_vm3, %v2737_v15, 0.0  ;;  %v7251_v14 = vpop.xlane.xlu0 %2921 }
 0x293   :  { %5255 = vpow2.f32 %v3487_v30  ;;  %v3489_v60 = vmul.f32 1.442695, %v3316_v47  ;;  %v2606_v3 = vmax.f32 %v2440_v36, 0.0  ;;  %3095 = vadd.xlane.f32.xlu0 %v3094_v16  ;;  %v3189_v49 = vadd.f32 %v7073_v23, %v7139_v26 }
 0x294   :  { %v5234_v6 = vpop.eup %5233  ;;  %5257 = vrcp.f32 %v3693_v48  ;;  %v2455_v38 = vadd.f32 %v7019_v17, %v7186_v28  ;;  %v3097_v62 = vsel %vm2751_vm3, %v7191_v53, 0.0  ;;  %v3190_v10 = vadd.f32 %v7073_v23, %v7146_v21  ;;  %v7261_v13 = vpop.xlane.xlu1 %2924 }
 0x295   :  { %v5236_v39 = vpop.eup %5235  ;;  %4072 = vst.msk [vmem:[%s7854_s7 + $0x100] sm:$0xff] %vm4039_vm4, %v5234_v6  ;;  %5259 = vpow2.f32 %v3489_v60  ;;  %v2741_v26 = vmul.f32 %v7054_v22, %v2606_v3  ;;  %v3317_v27 = vsub.f32 0.0, %v3189_v49  ;;  %3098 = vadd.xlane.f32.xlu1 %v3097_v62  ;;  %v2450_v28 = vadd.f32 %v7019_v17, %v7206_v40  ;;  %v5090_v49 = vpop.f32.mrf.mxu1 }
 0x296   :  { %v5238_v53 = vpop.eup %5237  ;;  %v3694_v29 = vadd.f32 1.0, %v5236_v39  ;;  %v2609_v15 = vmax.f32 %v2455_v38, 0.0  ;;  %v3318_v21 = vsub.f32 0.0, %v3190_v10  ;;  %v3100_v37 = vsel %vm2751_vm3, %v2739_v55, 0.0  ;;  %v7271_v59 = vpop.xlane.xlu0 %2927 }
 0x297   :  { %v5240_v57 = vpop.eup %5239  ;;  %4073 = vst.msk [vmem:[%s7854_s7 + $0x108] sm:$0xff] %vm4039_vm4, %v5238_v53  ;;  %v3491_v31 = vmul.f32 1.442695, %v3317_v27  ;;  %v2608_v43 = vmax.f32 %v2450_v28, 0.0  ;;  %3101 = vadd.xlane.f32.xlu0 %v3100_v37  ;;  %v3191_v40 = vadd.f32 %v7073_v23, %v7159_v35  ;;  %v2465_v33 = vadd.f32 %v7019_v17, %v5084_v11 }
 0x298   :  { %v5242_v56 = vpop.eup %5241  ;;  %5261 = vrcp.f32 %v3694_v29  ;;  %v3695_v52 = vadd.f32 1.0, %v5240_v57  ;;  %v7281_v1 = vmul.f32 %v7054_v22, %v2609_v15  ;;  %v3493_v34 = vmul.f32 1.442695, %v3318_v21  ;;  %v7283_v51 = vpop.xlane.xlu1 %2930 }
 0x299   :  { %v5244_v25 = vpop.eup %5243  ;;  %4074 = vst.msk [vmem:[%s7854_s7 + $0x110] sm:$0xff] %vm4039_vm4, %v5242_v56  ;;  %5263 = vpow2.f32 %v3491_v31  ;;  %v2743_v35 = vmul.f32 %v7054_v22, %v2608_v43  ;;  %v3319_v54 = vsub.f32 0.0, %v3191_v40  ;;  %v2611_v4 = vmax.f32 %v2465_v33, 0.0  ;;  %v2479_v40 = vpop.f32.mrf.mxu1 }
 0x29a   :  { %v5246_v9 = vpop.eup %5245  ;;  %5265 = vrcp.f32 %v3695_v52  ;;  %v3696_v11 = vadd.f32 1.0, %v5244_v25  ;;  %v3103_v2 = vsel %vm2751_vm3, %v7222_v42, 0.0  ;;  %v3192_v18 = vadd.f32 %v7073_v23, %v7174_v7  ;;  %v7294_v61 = vpop.xlane.xlu0 %2933 }
 0x29b   :  { %v5248_v32 = vpop.eup %5247  ;;  %4075 = vst.msk [vmem:[%s7854_s7 + $0x118] sm:$0xff] %vm4039_vm4, %v5246_v9  ;;  %5267 = vpow2.f32 %v3493_v34  ;;  %v3495_v63 = vmul.f32 1.442695, %v3319_v54  ;;  %v7301_v0 = vmul.f32 %v7054_v22, %v2611_v4  ;;  %3104 = vadd.xlane.f32.xlu1 %v3103_v2  ;;  %v2460_v42 = vadd.f32 %v7019_v17, %v2459_v24 }
 0x29c   :  { %5269 = vrcp.f32 %v3696_v11  ;;  %v3697_v55 = vadd.f32 1.0, %v5248_v32  ;;  %v3320_v7 = vsub.f32 0.0, %v3192_v18  ;;  %v3106_v19 = vsel %vm2751_vm3, %v2741_v26, 0.0  ;;  %v7305_v20 = vpop.xlane.xlu1 %2936 }
 0x29d   :  { %v5250_v30 = vpop.eup %5249  ;;  %5271 = vpow2.f32 %v3495_v63  ;;  %v2610_v47 = vmax.f32 %v2460_v42, 0.0  ;;  %3107 = vadd.xlane.f32.xlu0 %v3106_v19  ;;  %v3193_v36 = vadd.f32 %v7073_v23, %v7188_v41  ;;  %v2475_v48 = vadd.f32 %v7019_v17, %v5087_v8 }
 0x29e   :  { %v5252_v16 = vpop.eup %5251  ;;  %4076 = vst.msk [vmem:[%s7854_s7 + $0x120] sm:$0xff] %vm4039_vm4, %v5250_v30  ;;  %5273 = vrcp.f32 %v3697_v55  ;;  %v3497_v24 = vmul.f32 1.442695, %v3320_v7  ;;  %v3109_v60 = vsel %vm2751_vm3, %v7248_v12, 0.0  ;;  %v3194_v3 = vadd.f32 %v7073_v23, %v7195_v5  ;;  %v7318_v6 = vpop.xlane.xlu0 %2939 }
 0x29f   :  { %v5254_v41 = vpop.eup %5253  ;;  %v3698_v38 = vadd.f32 1.0, %v5252_v16  ;;  %v2745_v62 = vmul.f32 %v7054_v22, %v2610_v47  ;;  %v3321_v10 = vsub.f32 0.0, %v3193_v36  ;;  %v2613_v39 = vmax.f32 %v2475_v48, 0.0  ;;  %3110 = vadd.xlane.f32.xlu1 %v3109_v60 }
 0x2a0   :  { %v5256_v26 = vpop.eup %5255  ;;  %4077 = vst.msk [vmem:[%s7854_s7 + $0x128] sm:$0xff] %vm4039_vm4, %v5254_v41  ;;  %5275 = vpow2.f32 %v3497_v24  ;;  %v3322_v12 = vsub.f32 0.0, %v3194_v3  ;;  %v2470_v5 = vadd.f32 %v7019_v17, %v2469_v58  ;;  %v3112_v27 = vsel %vm2751_vm3, %v2743_v35, 0.0  ;;  %v7327_v28 = vpop.xlane.xlu1 %2942 }
 0x2a1   :  { %v5258_v53 = vpop.eup %5257  ;;  %5277 = vrcp.f32 %v3698_v38  ;;  %v3699_v29 = vadd.f32 1.0, %v5256_v26  ;;  %v3499_v15 = vmul.f32 1.442695, %v3321_v10  ;;  %v2748_v21 = vmul.f32 %v7054_v22, %v2613_v39  ;;  %3113 = vadd.xlane.f32.xlu0 %v3112_v27 }
 0x2a2   :  { %v5260_v37 = vpop.eup %5259  ;;  %4078 = vst.msk [vmem:[%s7854_s7 + $0x130] sm:$0xff] %vm4039_vm4, %v5258_v53  ;;  %v3501_v8 = vmul.f32 1.442695, %v3322_v12  ;;  %v2612_v57 = vmax.f32 %v2470_v5, 0.0  ;;  %v3195_v31 = vadd.f32 %v7073_v23, %v7208_v50  ;;  %v2485_v43 = vadd.f32 %v7019_v17, %v5090_v49  ;;  %v7337_v33 = vpop.xlane.xlu0 %2945 }
 0x2a3   :  { %5279 = vrcp.f32 %v3699_v29  ;;  %v3700_v56 = vadd.f32 1.0, %v5260_v37  ;;  %v3115_v52 = vsel %vm2751_vm3, %v7281_v1, 0.0  ;;  %v3196_v34 = vadd.f32 %v7073_v23, %v7215_v44 }
 0x2a4   :  { %5281 = vpow2.f32 %v3499_v15  ;;  %v2747_v25 = vmul.f32 %v7054_v22, %v2612_v57  ;;  %v3323_v35 = vsub.f32 0.0, %v3195_v31  ;;  %v2615_v54 = vmax.f32 %v2485_v43, 0.0  ;;  %3116 = vadd.xlane.f32.xlu1 %v3115_v52  ;;  %v7344_v50 = vpop.xlane.xlu1 %2948 }
 0x2a5   :  { %v5262_v4 = vpop.eup %5261  ;;  %5283 = vrcp.f32 %v3700_v56  ;;  %v3324_v9 = vsub.f32 0.0, %v3196_v34  ;;  %v2480_v11 = vadd.f32 %v7019_v17, %v2479_v40  ;;  %v3118_v2 = vsel %vm2751_vm3, %v2745_v62, 0.0 }
 0x2a6   :  { %v5264_v18 = vpop.eup %5263  ;;  %4079 = vst.msk [vmem:[%s7854_s7 + $0x138] sm:$0xff] %vm4039_vm4, %v5262_v4  ;;  %5285 = vpow2.f32 %v3501_v8  ;;  %v3503_v44 = vmul.f32 1.442695, %v3323_v35  ;;  %v2750_v1 = vmul.f32 %v7054_v22, %v2615_v54  ;;  %3119 = vadd.xlane.f32.xlu0 %v3118_v2  ;;  %v3197_v58 = vadd.f32 %v7073_v23, %v7228_v46  ;;  %v7355_v32 = vpop.xlane.xlu0 %2951 }
 0x2a7   :  { %v5266_v63 = vpop.eup %5265  ;;  %v3701_v17 = vadd.f32 1.0, %v5264_v18  ;;  %v3505_v42 = vmul.f32 1.442695, %v3324_v9  ;;  %v2614_v55 = vmax.f32 %v2480_v11, 0.0  ;;  %v3121_v7 = vsel %vm2751_vm3, %v7301_v0, 0.0 }
 0x2a8   :  { %v5268_v19 = vpop.eup %5267  ;;  %4080 = vst.msk [vmem:[%s7854_s7 + $0x140] sm:$0xff] %vm4039_vm4, %v5266_v63  ;;  %5287 = vpow2.f32 %v3503_v44  ;;  %v3325_v30 = vsub.f32 0.0, %v3197_v58  ;;  %3122 = vadd.xlane.f32.xlu1 %v3121_v7  ;;  %v3198_v46 = vadd.f32 %v7073_v23, %v7239_v45  ;;  %v3124_v47 = vsel %vm2751_vm3, %v2747_v25, 0.0  ;;  %v7366_v36 = vpop.xlane.xlu1 %2954 }
 0x2a9   :  { %v5270_v48 = vpop.eup %5269  ;;  %5289 = vrcp.f32 %v3701_v17  ;;  %v3702_v16 = vadd.f32 1.0, %v5268_v19  ;;  %v2749_v0 = vmul.f32 %v7054_v22, %v2614_v55  ;;  %v3199_v24 = vadd.f32 %v7073_v23, %v7251_v14 }
 0x2aa   :  { %v5272_v60 = vpop.eup %5271  ;;  %4081 = vst.msk [vmem:[%s7854_s7 + $0x148] sm:$0xff] %vm4039_vm4, %v5270_v48  ;;  %5291 = vpow2.f32 %v3505_v42  ;;  %v3507_v45 = vmul.f32 1.442695, %v3325_v30  ;;  %v3326_v3 = vsub.f32 0.0, %v3198_v46  ;;  %3125 = vadd.xlane.f32.xlu0 %v3124_v47  ;;  %v3127_v49 = vsel %vm2751_vm3, %v2748_v21, 0.0  ;;  %v7376_v41 = vpop.xlane.xlu0 %2957 }
 0x2ab   :  { %v5274_v38 = vpop.eup %5273  ;;  %5293 = vrcp.f32 %v3702_v16  ;;  %v3703_v22 = vadd.f32 1.0, %v5272_v60  ;;  %v3327_v62 = vsub.f32 0.0, %v3199_v24  ;;  %v3200_v14 = vadd.f32 %v7073_v23, %v7261_v13 }
 0x2ac   :  { %4082 = vst.msk [vmem:[%s7854_s7 + $0x150] sm:$0xff] %vm4039_vm4, %v5274_v38  ;;  %5295 = vpow2.f32 %v3507_v45  ;;  %v3509_v10 = vmul.f32 1.442695, %v3326_v3  ;;  %3128 = vadd.xlane.f32.xlu1 %v3127_v49  ;;  %v3130_v39 = vsel %vm2751_vm3, %v2749_v0, 0.0  ;;  %v3201_v26 = vadd.f32 %v7073_v23, %v7271_v59  ;;  %v7387_v12 = vpop.xlane.xlu1 %2960 }
 0x2ad   :  { %v5276_v5 = vpop.eup %5275  ;;  %5297 = vrcp.f32 %v3703_v22  ;;  %v3511_v27 = vmul.f32 1.442695, %v3327_v62  ;;  %v3328_v53 = vsub.f32 0.0, %v3200_v14  ;;  %v3133_v13 = vsel %vm2751_vm3, %v2750_v1, 0.0 }
 0x2ae   :  { %v5278_v29 = vpop.eup %5277  ;;  %v3704_v15 = vadd.f32 1.0, %v5276_v5  ;;  %5299 = vpow2.f32 %v3509_v10  ;;  %3131 = vadd.xlane.f32.xlu0 %v3130_v39  ;;  %v3329_v21 = vsub.f32 0.0, %v3201_v26  ;;  %v3202_v37 = vadd.f32 %v7073_v23, %v7283_v51  ;;  %v7392_v8 = vpop.xlane.xlu0 %2963 }
 0x2af   :  { %4083 = vst.msk [vmem:[%s7854_s7 + $0x158] sm:$0xff] %vm4039_vm4, %v5278_v29  ;;  %5301 = vpow2.f32 %v3511_v27  ;;  %v3513_v59 = vmul.f32 1.442695, %v3328_v53  ;;  %v3203_v57 = vadd.f32 %v7073_v23, %v7294_v61  ;;  %v3204_v31 = vadd.f32 %v7073_v23, %v7305_v20 }
 0x2b0   :  { %v5280_v43 = vpop.eup %5279  ;;  %5303 = vrcp.f32 %v3704_v15  ;;  %v3515_v40 = vmul.f32 1.442695, %v3329_v21  ;;  %3134 = vadd.xlane.f32.xlu1 %v3133_v13  ;;  %v3330_v51 = vsub.f32 0.0, %v3202_v37  ;;  %v3205_v56 = vadd.f32 %v7073_v23, %v7318_v6  ;;  %v7404_v52 = vpop.xlane.xlu1 %2966 }
 0x2b1   :  { %v5282_v34 = vpop.eup %5281  ;;  %4084 = vst.msk [vmem:[%s7854_s7 + $0x160] sm:$0xff] %vm4039_vm4, %v5280_v43  ;;  %5305 = vpow2.f32 %v3513_v59  ;;  %v3331_v61 = vsub.f32 0.0, %v3203_v57  ;;  %v3332_v25 = vsub.f32 0.0, %v3204_v31  ;;  %v3206_v20 = vadd.f32 %v7073_v23, %v7327_v28 }
 0x2b2   :  { %v5284_v35 = vpop.eup %5283  ;;  %v3705_v54 = vadd.f32 1.0, %v5282_v34  ;;  %5307 = vpow2.f32 %v3515_v40  ;;  %v3517_v4 = vmul.f32 1.442695, %v3330_v51  ;;  %v7412_v9 = vpop.xlane.xlu0 %2969  ;;  %v3333_v2 = vsub.f32 0.0, %v3205_v56 }
 0x2b3   :  { %v5286_v6 = vpop.eup %5285  ;;  %4085 = vst.msk [vmem:[%s7854_s7 + $0x168] sm:$0xff] %vm4039_vm4, %v5284_v35  ;;  %v3519_v11 = vmul.f32 1.442695, %v3331_v61  ;;  %v3207_v44 = vadd.f32 %v7073_v23, %v7337_v33  ;;  %v3521_v58 = vmul.f32 1.442695, %v3332_v25  ;;  %v3334_v63 = vsub.f32 0.0, %v3206_v20 }
 0x2b4   :  { %5309 = vrcp.f32 %v3705_v54  ;;  %v3706_v18 = vadd.f32 1.0, %v5286_v6  ;;  %v7420_v28 = vpop.xlane.xlu1 %2972  ;;  %v3523_v19 = vmul.f32 1.442695, %v3333_v2  ;;  %v3208_v33 = vadd.f32 %v7073_v23, %v7344_v50 }
 0x2b5   :  { %v5288_v1 = vpop.eup %5287  ;;  %5311 = vpow2.f32 %v3517_v4  ;;  %v3209_v30 = vadd.f32 %v7073_v23, %v7355_v32  ;;  %v3335_v48 = vsub.f32 0.0, %v3207_v44  ;;  %v3525_v24 = vmul.f32 1.442695, %v3334_v63 }
 0x2b6   :  { %v5290_v17 = vpop.eup %5289  ;;  %5313 = vrcp.f32 %v3706_v18  ;;  %v3707_v42 = vadd.f32 1.0, %v5288_v1  ;;  %v7422_v55 = vpop.xlane.xlu0 %2975  ;;  %v3210_v32 = vadd.f32 %v7073_v23, %v7366_v36  ;;  %v3336_v49 = vsub.f32 0.0, %v3208_v33 }
 0x2b7   :  { %v5292_v7 = vpop.eup %5291  ;;  %4086 = vst.msk [vmem:[%s7854_s7 + $0x170] sm:$0xff] %vm4039_vm4, %v5290_v17  ;;  %5315 = vpow2.f32 %v3519_v11  ;;  %v3337_v38 = vsub.f32 0.0, %v3209_v30  ;;  %v3527_v14 = vmul.f32 1.442695, %v3335_v48  ;;  %v3211_v10 = vadd.f32 %v7073_v23, %v7376_v41 }
 0x2b8   :  { %v5294_v46 = vpop.eup %5293  ;;  %5317 = vrcp.f32 %v3707_v42  ;;  %v3708_v47 = vadd.f32 1.0, %v5292_v7  ;;  %v7432_v16 = vpop.xlane.xlu1 %2978  ;;  %v3338_v27 = vsub.f32 0.0, %v3210_v32  ;;  %v3212_v53 = vadd.f32 %v7073_v23, %v7387_v12 }
 0x2b9   :  { %v5296_v0 = vpop.eup %5295  ;;  %4087 = vst.msk [vmem:[%s7854_s7 + $0x178] sm:$0xff] %vm4039_vm4, %v5294_v46  ;;  %5319 = vpow2.f32 %v3521_v58  ;;  %v3529_v41 = vmul.f32 1.442695, %v3336_v49  ;;  %v3531_v15 = vmul.f32 1.442695, %v3337_v38  ;;  %v3339_v59 = vsub.f32 0.0, %v3211_v10 }
 0x2ba   :  { %v5298_v60 = vpop.eup %5297  ;;  %5321 = vrcp.f32 %v3708_v47  ;;  %v3709_v50 = vadd.f32 1.0, %v5296_v0  ;;  %v7440_v45 = vpop.xlane.xlu0 %2981  ;;  %v3213_v57 = vadd.f32 %v7073_v23, %v7392_v8  ;;  %v3533_v12 = vmul.f32 1.442695, %v3338_v27 }
 0x2bb   :  { %v5300_v3 = vpop.eup %5299  ;;  %4088 = vst.msk [vmem:[%s7854_s7 + $0x180] sm:$0xff] %vm4039_vm4, %v5298_v60  ;;  %5323 = vpow2.f32 %v3523_v19  ;;  %v3340_v40 = vsub.f32 0.0, %v3212_v53  ;;  %v3214_v51 = vadd.f32 %v7073_v23, %v7404_v52  ;;  %v3215_v8 = vadd.f32 %v7073_v23, %v7412_v9 }
 0x2bc   :  { %v5302_v22 = vpop.eup %5301  ;;  %5325 = vrcp.f32 %v3709_v50  ;;  %v3710_v62 = vadd.f32 1.0, %v5300_v3  ;;  %v7448_v26 = vpop.xlane.xlu1 %2984  ;;  %v3535_v20 = vmul.f32 1.442695, %v3339_v59  ;;  %v3341_v35 = vsub.f32 0.0, %v3213_v57 }
 0x2bd   :  { %v5304_v39 = vpop.eup %5303  ;;  %v3711_v36 = vadd.f32 1.0, %v5302_v22  ;;  %5327 = vpow2.f32 %v3525_v24  ;;  %v3216_v4 = vadd.f32 %v7073_v23, %v7420_v28  ;;  %v3537_v11 = vmul.f32 1.442695, %v3340_v40 }
 0x2be   :  { %v5306_v5 = vpop.eup %5305  ;;  %4089 = vst.msk [vmem:[%s7854_s7 + $0x188] sm:$0xff] %vm4039_vm4, %v5304_v39  ;;  %5329 = vrcp.f32 %v3710_v62  ;;  %v7456_v21 = vpop.xlane.xlu0 %2987  ;;  %v3342_v2 = vsub.f32 0.0, %v3214_v51  ;;  %v3217_v18 = vadd.f32 %v7073_v23, %v7422_v55  ;;  %v3343_v58 = vsub.f32 0.0, %v3215_v8 }
 0x2bf   :  { %v5308_v13 = vpop.eup %5307  ;;  %5331 = vrcp.f32 %v3711_v36  ;;  %v3712_v29 = vadd.f32 1.0, %v5306_v5  ;;  %v3539_v28 = vmul.f32 1.442695, %v3341_v35  ;;  %v3344_v7 = vsub.f32 0.0, %v3216_v4 }
 0x2c0   :  { %v3713_v37 = vadd.f32 1.0, %v5308_v13  ;;  %5333 = vpow2.f32 %v3527_v14  ;;  %v7468_v61 = vpop.xlane.xlu1 %2990  ;;  %v3218_v19 = vadd.f32 %v7073_v23, %v7432_v16  ;;  %v3541_v30 = vmul.f32 1.442695, %v3342_v2  ;;  %v7512_v14 = vld [vmem:[#allocation2] ss:$0 sm:$0xff] }
 0x2c1   :  { %v5310_v31 = vpop.eup %5309  ;;  %5335 = vrcp.f32 %v3712_v29  ;;  %v3345_v46 = vsub.f32 0.0, %v3217_v18  ;;  %v3543_v0 = vmul.f32 1.442695, %v3343_v58  ;;  %v3219_v24 = vadd.f32 %v7073_v23, %v7440_v45 }
 0x2c2   :  { %v5312_v43 = vpop.eup %5311  ;;  %4090 = vst.msk [vmem:[%s7854_s7 + $0x190] sm:$0xff] %vm4039_vm4, %v5310_v31  ;;  %5337 = vrcp.f32 %v3713_v37  ;;  %v3220_v50 = vadd.f32 %v7073_v23, %v7448_v26  ;;  %v3545_v3 = vmul.f32 1.442695, %v3344_v7  ;;  %v3346_v45 = vsub.f32 0.0, %v3218_v19 }
 0x2c3   :  { %v5314_v56 = vpop.eup %5313  ;;  %v3714_v34 = vadd.f32 1.0, %v5312_v43  ;;  %5339 = vpow2.f32 %v3529_v41  ;;  %v3547_v22 = vmul.f32 1.442695, %v3345_v46  ;;  %v3347_v23 = vsub.f32 0.0, %v3219_v24 }
 0x2c4   :  { %v5316_v25 = vpop.eup %5315  ;;  %4091 = vst.msk [vmem:[%s7854_s7 + $0x198] sm:$0xff] %vm4039_vm4, %v5314_v56  ;;  %5341 = vpow2.f32 %v3531_v15  ;;  %v3221_v10 = vadd.f32 %v7512_v14, %v7456_v21  ;;  %v3348_v26 = vsub.f32 0.0, %v3220_v50  ;;  %v3549_v53 = vmul.f32 1.442695, %v3346_v45 }
 0x2c5   :  { %v5318_v54 = vpop.eup %5317  ;;  %5343 = vrcp.f32 %v3714_v34  ;;  %v3715_v52 = vadd.f32 1.0, %v5316_v25  ;;  %v7476_v6 = vpop.xlane.xlu0 %2993  ;;  %v3222_v13 = vadd.f32 %v7512_v14, %v7468_v61  ;;  %v3551_v37 = vmul.f32 1.442695, %v3347_v23 }
 0x2c6   :  { %v5320_v9 = vpop.eup %5319  ;;  %4092 = vst.msk [vmem:[%s7854_s7 + $0x1a0] sm:$0xff] %vm4039_vm4, %v5318_v54  ;;  %5345 = vpow2.f32 %v3533_v12  ;;  %v3349_v59 = vsub.f32 0.0, %v3221_v10  ;;  %v3223_v43 = vadd.f32 %v7512_v14, %v7476_v6  ;;  %v3553_v51 = vmul.f32 1.442695, %v3348_v26 }
 0x2c7   :  { %v5322_v44 = vpop.eup %5321  ;;  %5347 = vrcp.f32 %v3715_v52  ;;  %v3716_v1 = vadd.f32 1.0, %v5320_v9  ;;  %v7490_v55 = vpop.xlane.xlu1 %2996  ;;  %v3350_v56 = vsub.f32 0.0, %v3222_v13 }
 0x2c8   :  { %v5324_v63 = vpop.eup %5323  ;;  %4093 = vst.msk [vmem:[%s7854_s7 + $0x1a8] sm:$0xff] %vm4039_vm4, %v5322_v44  ;;  %5349 = vpow2.f32 %v3535_v20  ;;  %v3555_v20 = vmul.f32 1.442695, %v3349_v59  ;;  %v3224_v35 = vadd.f32 %v7512_v14, %v7490_v55  ;;  %v3351_v6 = vsub.f32 0.0, %v3223_v43 }
 0x2c9   :  { %v5326_v17 = vpop.eup %5325  ;;  %5351 = vrcp.f32 %v3716_v1  ;;  %v3717_v42 = vadd.f32 1.0, %v5324_v63 }
 0x2ca   :  { %v5328_v33 = vpop.eup %5327  ;;  %4094 = vst.msk [vmem:[%s7854_s7 + $0x1b0] sm:$0xff] %vm4039_vm4, %v5326_v17  ;;  %5353 = vpow2.f32 %v3537_v11  ;;  %v3557_v11 = vmul.f32 1.442695, %v3350_v56  ;;  %v3352_v63 = vsub.f32 0.0, %v3224_v35  ;;  %v3559_v7 = vmul.f32 1.442695, %v3351_v6 }
 0x2cb   :  { %v5330_v47 = vpop.eup %5329  ;;  %5355 = vrcp.f32 %v3717_v42  ;;  %v3718_v48 = vadd.f32 1.0, %v5328_v33  ;;  %v3000_v60 = vpop.xlane.xlu0 %2999 }
 0x2cc   :  { %v5332_v16 = vpop.eup %5331  ;;  %4095 = vst.msk [vmem:[%s7854_s7 + $0x1b8] sm:$0xff] %vm4039_vm4, %v5330_v47  ;;  %5357 = vpow2.f32 %v3539_v28  ;;  %v3225_v54 = vadd.f32 %v7512_v14, %v3000_v60 }
 0x2cd   :  { %v5334_v32 = vpop.eup %5333  ;;  %4096 = vst.msk [vmem:[%s7854_s7 + $0x1c0] sm:$0xff] %vm4039_vm4, %v5332_v16  ;;  %5359 = vrcp.f32 %v3718_v48  ;;  %v3561_v16 = vmul.f32 1.442695, %v3352_v63 }
 0x2ce   :  { %v5336_v49 = vpop.eup %5335  ;;  %v3719_v38 = vadd.f32 1.0, %v5334_v32  ;;  %5361 = vpow2.f32 %v3541_v30  ;;  %v3353_v28 = vsub.f32 0.0, %v3225_v54 }
 0x2cf   :  { %v5338_v62 = vpop.eup %5337  ;;  %4097 = vst.msk [vmem:[%s7854_s7 + $0x1c8] sm:$0xff] %vm4039_vm4, %v5336_v49  ;;  %5363 = vpow2.f32 %v3543_v0  ;;  %v3003_v39 = vpop.xlane.xlu1 %3002 }
 0x2d0   :  { %v5340_v36 = vpop.eup %5339  ;;  %4098 = vst.msk [vmem:[%s7854_s7 + $0x1d0] sm:$0xff] %vm4039_vm4, %v5338_v62  ;;  %5365 = vrcp.f32 %v3719_v38  ;;  %v3226_v1 = vadd.f32 %v7512_v14, %v3003_v39  ;;  %v3563_v50 = vmul.f32 1.442695, %v3353_v28 }
 0x2d1   :  { %v5342_v5 = vpop.eup %5341  ;;  %v3720_v27 = vadd.f32 1.0, %v5340_v36  ;;  %5367 = vpow2.f32 %v3545_v3  ;;  %v3006_v29 = vpop.xlane.xlu0 %3005 }
 0x2d2   :  { %v5344_v41 = vpop.eup %5343  ;;  %v3721_v15 = vadd.f32 1.0, %v5342_v5  ;;  %5369 = vpow2.f32 %v3547_v22  ;;  %v3227_v19 = vadd.f32 %v7512_v14, %v3006_v29  ;;  %v3354_v47 = vsub.f32 0.0, %v3226_v1 }
 0x2d3   :  { %v5346_v21 = vpop.eup %5345  ;;  %4099 = vst.msk [vmem:[%s7854_s7 + $0x1d8] sm:$0xff] %vm4039_vm4, %v5344_v41  ;;  %5371 = vrcp.f32 %v3720_v27 }
 0x2d4   :  { %v5348_v57 = vpop.eup %5347  ;;  %5373 = vrcp.f32 %v3721_v15  ;;  %v3722_v31 = vadd.f32 1.0, %v5346_v21  ;;  %v3009_v12 = vpop.xlane.xlu1 %3008  ;;  %v3355_v45 = vsub.f32 0.0, %v3227_v19  ;;  %v3565_v23 = vmul.f32 1.442695, %v3354_v47 }
 0x2d5   :  { %v5350_v40 = vpop.eup %5349  ;;  %4100 = vst.msk [vmem:[%s7854_s7 + $0x1e0] sm:$0xff] %vm4039_vm4, %v5348_v57  ;;  %5375 = vpow2.f32 %v3549_v53  ;;  %v3012_v61 = vpop.xlane.xlu0 %3011  ;;  %v3228_v48 = vadd.f32 %v7512_v14, %v3009_v12 }
 0x2d6   :  { %v5352_v34 = vpop.eup %5351  ;;  %5377 = vrcp.f32 %v3722_v31  ;;  %v3723_v8 = vadd.f32 1.0, %v5350_v40  ;;  %v3229_v49 = vadd.f32 %v7512_v14, %v3012_v61  ;;  %v3567_v13 = vmul.f32 1.442695, %v3355_v45 }
 0x2d7   :  { %v5354_v25 = vpop.eup %5353  ;;  %4101 = vst.msk [vmem:[%s7854_s7 + $0x1e8] sm:$0xff] %vm4039_vm4, %v5352_v34  ;;  %5379 = vpow2.f32 %v3551_v37  ;;  %v3356_v10 = vsub.f32 0.0, %v3228_v48 }
 0x2d8   :  { %v5356_v52 = vpop.eup %5355  ;;  %5381 = vrcp.f32 %v3723_v8  ;;  %v3724_v4 = vadd.f32 1.0, %v5354_v25  ;;  %v3357_v29 = vsub.f32 0.0, %v3229_v49 }
 0x2d9   :  { %v5358_v9 = vpop.eup %5357  ;;  %4102 = vst.msk [vmem:[%s7854_s7 + $0x1f0] sm:$0xff] %vm4039_vm4, %v5356_v52  ;;  %5383 = vpow2.f32 %v3553_v51  ;;  %v3015_v2 = vpop.xlane.xlu1 %3014  ;;  %v3569_v57 = vmul.f32 1.442695, %v3356_v10 }
 0x2da   :  { %v5360_v18 = vpop.eup %5359  ;;  %5385 = vrcp.f32 %v3724_v4  ;;  %v3725_v44 = vadd.f32 1.0, %v5358_v9  ;;  %v3230_v39 = vadd.f32 %v7512_v14, %v3015_v2  ;;  %v3571_v34 = vmul.f32 1.442695, %v3357_v29 }
 0x2db   :  { %v5362_v58 = vpop.eup %5361  ;;  %4103 = vst.msk [vmem:[%s7854_s7 + $0x1f8] sm:$0xff] %vm4039_vm4, %v5360_v18  ;;  %5387 = vpow2.f32 %v3555_v20 }
 0x2dc   :  { %v5364_v17 = vpop.eup %5363  ;;  %5389 = vrcp.f32 %v3725_v44  ;;  %v3726_v42 = vadd.f32 1.0, %v5362_v58  ;;  %v3018_v55 = vpop.xlane.xlu0 %3017  ;;  %v3358_v31 = vsub.f32 0.0, %v3230_v39 }
 0x2dd   :  { %v5366_v33 = vpop.eup %5365  ;;  %v3727_v30 = vadd.f32 1.0, %v5364_v17  ;;  %5391 = vpow2.f32 %v3557_v11  ;;  %v3231_v27 = vadd.f32 %v7512_v14, %v3018_v55 }
 0x2de   :  { %v5368_v46 = vpop.eup %5367  ;;  %4104 = vst.msk [vmem:[%s7854_s7 + $0x200] sm:$0xff] %vm4039_vm4, %v5366_v33  ;;  %5393 = vrcp.f32 %v3726_v42  ;;  %v3021_v0 = vpop.xlane.xlu1 %3020  ;;  %v3573_v52 = vmul.f32 1.442695, %v3358_v31 }
 0x2df   :  { %v5370_v24 = vpop.eup %5369  ;;  %5395 = vrcp.f32 %v3727_v30  ;;  %v3728_v60 = vadd.f32 1.0, %v5368_v46  ;;  %v3232_v21 = vadd.f32 %v7512_v14, %v3021_v0  ;;  %v3359_v51 = vsub.f32 0.0, %v3231_v27 }
 0x2e0   :  { %v5372_v32 = vpop.eup %5371  ;;  %v3729_v3 = vadd.f32 1.0, %v5370_v24  ;;  %5397 = vpow2.f32 %v3559_v7 }
 0x2e1   :  { %v5374_v38 = vpop.eup %5373  ;;  %4105 = vst.msk [vmem:[%s7854_s7 + $0x208] sm:$0xff] %vm4039_vm4, %v5372_v32  ;;  %5399 = vrcp.f32 %v3728_v60  ;;  %v3024_v22 = vpop.xlane.xlu0 %3023  ;;  %v3360_v35 = vsub.f32 0.0, %v3232_v21  ;;  %v3575_v2 = vmul.f32 1.442695, %v3359_v51 }
 0x2e2   :  { %v5376_v62 = vpop.eup %5375  ;;  %4106 = vst.msk [vmem:[%s7854_s7 + $0x210] sm:$0xff] %vm4039_vm4, %v5374_v38  ;;  %5401 = vrcp.f32 %v3729_v3  ;;  %v3027_v36 = vpop.xlane.xlu1 %3026  ;;  %v3233_v43 = vadd.f32 %v7512_v14, %v3024_v22 }
 0x2e3   :  { %v5378_v26 = vpop.eup %5377  ;;  %v3730_v5 = vadd.f32 1.0, %v5376_v62  ;;  %5403 = vpow2.f32 %v3561_v16  ;;  %v3234_v8 = vadd.f32 %v7512_v14, %v3027_v36  ;;  %v3577_v63 = vmul.f32 1.442695, %v3360_v35 }
 0x2e4   :  { %v5380_v53 = vpop.eup %5379  ;;  %4107 = vst.msk [vmem:[%s7854_s7 + $0x218] sm:$0xff] %vm4039_vm4, %v5378_v26  ;;  %5405 = vpow2.f32 %v3563_v50  ;;  %v3361_v4 = vsub.f32 0.0, %v3233_v43 }
 0x2e5   :  { %v5382_v41 = vpop.eup %5381  ;;  %5407 = vrcp.f32 %v3730_v5  ;;  %v3731_v15 = vadd.f32 1.0, %v5380_v53  ;;  %v3030_v37 = vpop.xlane.xlu0 %3029  ;;  %v3362_v1 = vsub.f32 0.0, %v3234_v8 }
 0x2e6   :  { %v5384_v59 = vpop.eup %5383  ;;  %4108 = vst.msk [vmem:[%s7854_s7 + $0x220] sm:$0xff] %vm4039_vm4, %v5382_v41  ;;  %5409 = vpow2.f32 %v3565_v23  ;;  %v3235_v18 = vadd.f32 %v7512_v14, %v3030_v37  ;;  %v3579_v7 = vmul.f32 1.442695, %v3361_v4 }
 0x2e7   :  { %v5386_v12 = vpop.eup %5385  ;;  %5411 = vrcp.f32 %v3731_v15  ;;  %v3732_v40 = vadd.f32 1.0, %v5384_v59  ;;  %v3581_v48 = vmul.f32 1.442695, %v3362_v1 }
 0x2e8   :  { %v5388_v56 = vpop.eup %5387  ;;  %4109 = vst.msk [vmem:[%s7854_s7 + $0x228] sm:$0xff] %vm4039_vm4, %v5386_v12  ;;  %5413 = vpow2.f32 %v3567_v13  ;;  %v3033_v61 = vpop.xlane.xlu1 %3032  ;;  %v3363_v33 = vsub.f32 0.0, %v3235_v18 }
 0x2e9   :  { %v5390_v25 = vpop.eup %5389  ;;  %5415 = vrcp.f32 %v3732_v40  ;;  %v3733_v20 = vadd.f32 1.0, %v5388_v56  ;;  %v3236_v28 = vadd.f32 %v7512_v14, %v3033_v61 }
 0x2ea   :  { %v5392_v54 = vpop.eup %5391  ;;  %4110 = vst.msk [vmem:[%s7854_s7 + $0x230] sm:$0xff] %vm4039_vm4, %v5390_v25  ;;  %5417 = vpow2.f32 %v3569_v57  ;;  %v3036_v6 = vpop.xlane.xlu0 %3035  ;;  %v3583_v45 = vmul.f32 1.442695, %v3363_v33 }
 0x2eb   :  { %v5394_v9 = vpop.eup %5393  ;;  %5419 = vrcp.f32 %v3733_v20  ;;  %v3734_v11 = vadd.f32 1.0, %v5392_v54  ;;  %v3237_v30 = vadd.f32 %v7512_v14, %v3036_v6  ;;  %v3364_v60 = vsub.f32 0.0, %v3236_v28 }
 0x2ec   :  { %v5396_v44 = vpop.eup %5395  ;;  %4111 = vst.msk [vmem:[%s7854_s7 + $0x238] sm:$0xff] %vm4039_vm4, %v5394_v9  ;;  %5421 = vpow2.f32 %v3571_v34 }
 0x2ed   :  { %v5398_v58 = vpop.eup %5397  ;;  %4112 = vst.msk [vmem:[%s7854_s7 + $0x240] sm:$0xff] %vm4039_vm4, %v5396_v44  ;;  %5423 = vrcp.f32 %v3734_v11  ;;  %v3365_v49 = vsub.f32 0.0, %v3237_v30  ;;  %v3585_v36 = vmul.f32 1.442695, %v3364_v60 }
 0x2ee   :  { %v5400_v17 = vpop.eup %5399  ;;  %v3735_v42 = vadd.f32 1.0, %v5398_v58  ;;  %5425 = vpow2.f32 %v3573_v52  ;;  %v3039_v19 = vpop.xlane.xlu1 %3038 }
 0x2ef   :  { %v5402_v55 = vpop.eup %5401  ;;  %4113 = vst.msk [vmem:[%s7854_s7 + $0x248] sm:$0xff] %vm4039_vm4, %v5400_v17  ;;  %5427 = vpow2.f32 %v3575_v2  ;;  %v3042_v46 = vpop.xlane.xlu0 %3041  ;;  %v3238_v16 = vadd.f32 %v7512_v14, %v3039_v19  ;;  %v3587_v13 = vmul.f32 1.442695, %v3365_v49 }
 0x2f0   :  { %v5404_v47 = vpop.eup %5403  ;;  %4114 = vst.msk [vmem:[%s7854_s7 + $0x250] sm:$0xff] %vm4039_vm4, %v5402_v55  ;;  %5429 = vrcp.f32 %v3735_v42  ;;  %v3239_v23 = vadd.f32 %v7512_v14, %v3042_v46 }
 0x2f1   :  { %v5406_v0 = vpop.eup %5405  ;;  %v3736_v24 = vadd.f32 1.0, %v5404_v47  ;;  %5431 = vpow2.f32 %v3577_v63  ;;  %v3366_v26 = vsub.f32 0.0, %v3238_v16 }
 0x2f2   :  { %v5408_v50 = vpop.eup %5407  ;;  %v3737_v32 = vadd.f32 1.0, %v5406_v0  ;;  %5433 = vpow2.f32 %v3579_v7  ;;  %v3367_v59 = vsub.f32 0.0, %v3239_v23 }
 0x2f3   :  { %v5410_v3 = vpop.eup %5409  ;;  %4115 = vst.msk [vmem:[%s7854_s7 + $0x258] sm:$0xff] %vm4039_vm4, %v5408_v50  ;;  %5435 = vrcp.f32 %v3736_v24  ;;  %v3045_v38 = vpop.xlane.xlu1 %3044  ;;  %v3589_v43 = vmul.f32 1.442695, %v3366_v26 }
 0x2f4   :  { %v5412_v22 = vpop.eup %5411  ;;  %5437 = vrcp.f32 %v3737_v32  ;;  %v3738_v62 = vadd.f32 1.0, %v5410_v3  ;;  %v3048_v10 = vpop.xlane.xlu0 %3047  ;;  %v3240_v29 = vadd.f32 %v7512_v14, %v3045_v38  ;;  %v3591_v35 = vmul.f32 1.442695, %v3367_v59 }
 0x2f5   :  { %v5414_v39 = vpop.eup %5413  ;;  %4116 = vst.msk [vmem:[%s7854_s7 + $0x260] sm:$0xff] %vm4039_vm4, %v5412_v22  ;;  %5439 = vpow2.f32 %v3581_v48  ;;  %v3241_v41 = vadd.f32 %v7512_v14, %v3048_v10 }
 0x2f6   :  { %v5416_v5 = vpop.eup %5415  ;;  %5441 = vrcp.f32 %v3738_v62  ;;  %v3739_v27 = vadd.f32 1.0, %v5414_v39  ;;  %v3368_v34 = vsub.f32 0.0, %v3240_v29 }
 0x2f7   :  { %v5418_v53 = vpop.eup %5417  ;;  %4117 = vst.msk [vmem:[%s7854_s7 + $0x268] sm:$0xff] %vm4039_vm4, %v5416_v5  ;;  %5443 = vpow2.f32 %v3583_v45  ;;  %v3051_v15 = vpop.xlane.xlu1 %3050  ;;  %v3369_v8 = vsub.f32 0.0, %v3241_v41 }
 0x2f8   :  { %v5420_v21 = vpop.eup %5419  ;;  %5445 = vrcp.f32 %v3739_v27  ;;  %v3740_v37 = vadd.f32 1.0, %v5418_v53  ;;  %v3054_v57 = vpop.xlane.xlu0 %3053  ;;  %v3242_v51 = vadd.f32 %v7512_v14, %v3051_v15  ;;  %v3593_v1 = vmul.f32 1.442695, %v3368_v34 }
 0x2f9   :  { %v5422_v31 = vpop.eup %5421  ;;  %4118 = vst.msk [vmem:[%s7854_s7 + $0x270] sm:$0xff] %vm4039_vm4, %v5420_v21  ;;  %5447 = vpow2.f32 %v3585_v36  ;;  %v3243_v54 = vadd.f32 %v7512_v14, %v3054_v57  ;;  %v3595_v58 = vmul.f32 1.442695, %v3369_v8 }
 0x2fa   :  { %v5424_v12 = vpop.eup %5423  ;;  %5449 = vrcp.f32 %v3740_v37  ;;  %v3741_v40 = vadd.f32 1.0, %v5422_v31  ;;  %v3370_v2 = vsub.f32 0.0, %v3242_v51 }
 0x2fb   :  { %v5426_v56 = vpop.eup %5425  ;;  %4119 = vst.msk [vmem:[%s7854_s7 + $0x278] sm:$0xff] %vm4039_vm4, %v5424_v12  ;;  %5451 = vpow2.f32 %v3587_v13  ;;  %v3057_v61 = vpop.xlane.xlu1 %3056  ;;  %v3371_v17 = vsub.f32 0.0, %v3243_v54 }
 0x2fc   :  { %v5428_v25 = vpop.eup %5427  ;;  %5453 = vrcp.f32 %v3741_v40  ;;  %v3742_v20 = vadd.f32 1.0, %v5426_v56  ;;  %v3244_v6 = vadd.f32 %v7512_v14, %v3057_v61  ;;  %v3597_v30 = vmul.f32 1.442695, %v3370_v2 }
 0x2fd   :  { %v5430_v52 = vpop.eup %5429  ;;  %v3743_v4 = vadd.f32 1.0, %v5428_v25  ;;  %5455 = vpow2.f32 %v3589_v43  ;;  %v3060_v9 = vpop.xlane.xlu0 %3059  ;;  %v3599_v16 = vmul.f32 1.442695, %v3371_v17 }
 0x2fe   :  { %v5432_v11 = vpop.eup %5431  ;;  %4120 = vst.msk [vmem:[%s7854_s7 + $0x280] sm:$0xff] %vm4039_vm4, %v5430_v52  ;;  %5457 = vrcp.f32 %v3742_v20  ;;  %v3245_v42 = vadd.f32 %v7512_v14, %v3060_v9  ;;  %v3372_v55 = vsub.f32 0.0, %v3244_v6 }
 0x2ff   :  { %v5434_v18 = vpop.eup %5433  ;;  %5459 = vrcp.f32 %v3743_v4  ;;  %v3744_v44 = vadd.f32 1.0, %v5432_v11 }
 0x300   :  { %v5436_v63 = vpop.eup %5435  ;;  %v3745_v28 = vadd.f32 1.0, %v5434_v18  ;;  %5461 = vpow2.f32 %v3591_v35  ;;  %v3063_v7 = vpop.xlane.xlu1 %3062  ;;  %v3373_v50 = vsub.f32 0.0, %v3245_v42  ;;  %v3601_v45 = vmul.f32 1.442695, %v3372_v55 }
 0x301   :  { %v5438_v19 = vpop.eup %5437  ;;  %4121 = vst.msk [vmem:[%s7854_s7 + $0x288] sm:$0xff] %vm4039_vm4, %v5436_v63  ;;  %5463 = vrcp.f32 %v3744_v44  ;;  %v3246_v46 = vadd.f32 %v7512_v14, %v3063_v7 }
 0x302   :  { %v5440_v33 = vpop.eup %5439  ;;  %4122 = vst.msk [vmem:[%s7854_s7 + $0x290] sm:$0xff] %vm4039_vm4, %v5438_v19  ;;  %5465 = vrcp.f32 %v3745_v28  ;;  %v3066_v47 = vpop.xlane.xlu0 %3065  ;;  %v3603_v26 = vmul.f32 1.442695, %v3373_v50 }
 0x303   :  { %v5442_v48 = vpop.eup %5441  ;;  %v3746_v0 = vadd.f32 1.0, %v5440_v33  ;;  %5467 = vpow2.f32 %v3593_v1  ;;  %v3247_v24 = vadd.f32 %v7512_v14, %v3066_v47  ;;  %v3374_v22 = vsub.f32 0.0, %v3246_v46 }
 0x304   :  { %v5444_v60 = vpop.eup %5443  ;;  %4123 = vst.msk [vmem:[%s7854_s7 + $0x298] sm:$0xff] %vm4039_vm4, %v5442_v48  ;;  %5469 = vpow2.f32 %v3595_v58 }
 0x305   :  { %v5446_v32 = vpop.eup %5445  ;;  %5471 = vrcp.f32 %v3746_v0  ;;  %v3747_v3 = vadd.f32 1.0, %v5444_v60  ;;  %v3069_v49 = vpop.xlane.xlu1 %3068  ;;  %v3375_v62 = vsub.f32 0.0, %v3247_v24  ;;  %v3605_v15 = vmul.f32 1.442695, %v3374_v22 }
 0x306   :  { %v5448_v38 = vpop.eup %5447  ;;  %4124 = vst.msk [vmem:[%s7854_s7 + $0x2a0] sm:$0xff] %vm4039_vm4, %v5446_v32  ;;  %5473 = vpow2.f32 %v3597_v30  ;;  %v3248_v23 = vadd.f32 %v7512_v14, %v3069_v49 }
 0x307   :  { %v5450_v10 = vpop.eup %5449  ;;  %5475 = vrcp.f32 %v3747_v3  ;;  %v3748_v39 = vadd.f32 1.0, %v5448_v38  ;;  %v3607_v21 = vmul.f32 1.442695, %v3375_v62 }
 0x308   :  { %v5452_v36 = vpop.eup %5451  ;;  %4125 = vst.msk [vmem:[%s7854_s7 + $0x2a8] sm:$0xff] %vm4039_vm4, %v5450_v10  ;;  %5477 = vpow2.f32 %v3599_v16  ;;  %v3072_v5 = vpop.xlane.xlu0 %3071  ;;  %v3376_v13 = vsub.f32 0.0, %v3248_v23 }
 0x309   :  { %v5454_v27 = vpop.eup %5453  ;;  %5479 = vrcp.f32 %v3748_v39  ;;  %v3749_v53 = vadd.f32 1.0, %v5452_v36  ;;  %v3249_v29 = vadd.f32 %v7512_v14, %v3072_v5 }
 0x30a   :  { %v5456_v41 = vpop.eup %5455  ;;  %4126 = vst.msk [vmem:[%s7854_s7 + $0x2b0] sm:$0xff] %vm4039_vm4, %v5454_v27  ;;  %5481 = vpow2.f32 %v3601_v45  ;;  %v3075_v37 = vpop.xlane.xlu1 %3074  ;;  %v3609_v56 = vmul.f32 1.442695, %v3376_v13 }
 0x30b   :  { %v5458_v59 = vpop.eup %5457  ;;  %5483 = vrcp.f32 %v3749_v53  ;;  %v3750_v57 = vadd.f32 1.0, %v5456_v41  ;;  %v3377_v31 = vsub.f32 0.0, %v3249_v29  ;;  %v3250_v43 = vadd.f32 %v7512_v14, %v3075_v37 }
 0x30c   :  { %v5460_v12 = vpop.eup %5459  ;;  %4127 = vst.msk [vmem:[%s7854_s7 + $0x2b8] sm:$0xff] %vm4039_vm4, %v5458_v59  ;;  %5485 = vpow2.f32 %v3603_v26  ;;  %v3078_v40 = vpop.xlane.xlu0 %3077 }
 0x30d   :  { %v5462_v51 = vpop.eup %5461  ;;  %4128 = vst.msk [vmem:[%s7854_s7 + $0x2c0] sm:$0xff] %vm4039_vm4, %v5460_v12  ;;  %5487 = vrcp.f32 %v3750_v57  ;;  %v3378_v34 = vsub.f32 0.0, %v3250_v43  ;;  %v3251_v8 = vadd.f32 %v7512_v14, %v3078_v40  ;;  %v3611_v20 = vmul.f32 1.442695, %v3377_v31 }
 0x30e   :  { %v5464_v61 = vpop.eup %5463  ;;  %v3751_v25 = vadd.f32 1.0, %v5462_v51  ;;  %5489 = vpow2.f32 %v3605_v15  ;;  %v3081_v35 = vpop.xlane.xlu1 %3080 }
 0x30f   :  { %v5466_v54 = vpop.eup %5465  ;;  %4129 = vst.msk [vmem:[%s7854_s7 + $0x2c8] sm:$0xff] %vm4039_vm4, %v5464_v61  ;;  %5491 = vpow2.f32 %v3607_v21  ;;  %v3379_v52 = vsub.f32 0.0, %v3251_v8  ;;  %v3252_v4 = vadd.f32 %v7512_v14, %v3081_v35  ;;  %v3613_v18 = vmul.f32 1.442695, %v3378_v34 }
 0x310   :  { %v5468_v6 = vpop.eup %5467  ;;  %4130 = vst.msk [vmem:[%s7854_s7 + $0x2d0] sm:$0xff] %vm4039_vm4, %v5466_v54  ;;  %5493 = vrcp.f32 %v3751_v25  ;;  %v3084_v9 = vpop.xlane.xlu0 %3083 }
 0x311   :  { %v5470_v11 = vpop.eup %5469  ;;  %v3752_v2 = vadd.f32 1.0, %v5468_v6  ;;  %5495 = vpow2.f32 %v3609_v56  ;;  %v3380_v44 = vsub.f32 0.0, %v3252_v4  ;;  %v3253_v63 = vadd.f32 %v7512_v14, %v3084_v9 }
 0x312   :  { %v5472_v1 = vpop.eup %5471  ;;  %v3753_v58 = vadd.f32 1.0, %v5470_v11  ;;  %5497 = vpow2.f32 %v3611_v20  ;;  %v3615_v17 = vmul.f32 1.442695, %v3379_v52 }
 0x313   :  { %v5474_v28 = vpop.eup %5473  ;;  %4131 = vst.msk [vmem:[%s7854_s7 + $0x2d8] sm:$0xff] %vm4039_vm4, %v5472_v1  ;;  %5499 = vrcp.f32 %v3752_v2  ;;  %v3381_v19 = vsub.f32 0.0, %v3253_v63  ;;  %v3617_v30 = vmul.f32 1.442695, %v3380_v44 }
 0x314   :  { %v5476_v42 = vpop.eup %5475  ;;  %5501 = vrcp.f32 %v3753_v58  ;;  %v3754_v7 = vadd.f32 1.0, %v5474_v28  ;;  %v3087_v55 = vpop.xlane.xlu1 %3086 }
 0x315   :  { %v5478_v33 = vpop.eup %5477  ;;  %4132 = vst.msk [vmem:[%s7854_s7 + $0x2e0] sm:$0xff] %vm4039_vm4, %v5476_v42  ;;  %5503 = vpow2.f32 %v3613_v18  ;;  %v3254_v46 = vadd.f32 %v7512_v14, %v3087_v55  ;;  %v3619_v60 = vmul.f32 1.442695, %v3381_v19 }
 0x316   :  { %v5480_v47 = vpop.eup %5479  ;;  %5505 = vrcp.f32 %v3754_v7  ;;  %v3755_v48 = vadd.f32 1.0, %v5478_v33  ;;  %v3090_v0 = vpop.xlane.xlu0 %3089 }
 0x317   :  { %v5482_v24 = vpop.eup %5481  ;;  %4133 = vst.msk [vmem:[%s7854_s7 + $0x2e8] sm:$0xff] %vm4039_vm4, %v5480_v47  ;;  %5507 = vpow2.f32 %v3615_v17  ;;  %v3382_v16 = vsub.f32 0.0, %v3254_v46  ;;  %v3255_v50 = vadd.f32 %v7512_v14, %v3090_v0 }
 0x318   :  { %v5484_v32 = vpop.eup %5483  ;;  %5509 = vrcp.f32 %v3755_v48  ;;  %v3756_v3 = vadd.f32 1.0, %v5482_v24 }
 0x319   :  { %v5486_v45 = vpop.eup %5485  ;;  %4134 = vst.msk [vmem:[%s7854_s7 + $0x2f0] sm:$0xff] %vm4039_vm4, %v5484_v32  ;;  %5511 = vpow2.f32 %v3617_v30  ;;  %v3621_v49 = vmul.f32 1.442695, %v3382_v16  ;;  %v3383_v38 = vsub.f32 0.0, %v3255_v50  ;;  %v3093_v22 = vpop.xlane.xlu1 %3092 }
 0x31a   :  { %v5488_v62 = vpop.eup %5487  ;;  %5513 = vrcp.f32 %v3756_v3  ;;  %v3757_v23 = vadd.f32 1.0, %v5486_v45  ;;  %v3256_v10 = vadd.f32 %v7512_v14, %v3093_v22 }
 0x31b   :  { %v5490_v39 = vpop.eup %5489  ;;  %4135 = vst.msk [vmem:[%s7854_s7 + $0x2f8] sm:$0xff] %vm4039_vm4, %v5488_v62  ;;  %5515 = vpow2.f32 %v3619_v60  ;;  %v3623_v5 = vmul.f32 1.442695, %v3383_v38 }
 0x31c   :  { %v5492_v36 = vpop.eup %5491  ;;  %5517 = vrcp.f32 %v3757_v23  ;;  %v3758_v26 = vadd.f32 1.0, %v5490_v39  ;;  %v3384_v27 = vsub.f32 0.0, %v3256_v10  ;;  %v3096_v53 = vpop.xlane.xlu0 %3095 }
 0x31d   :  { %v5494_v13 = vpop.eup %5493  ;;  %v3759_v29 = vadd.f32 1.0, %v5492_v36  ;;  %5519 = vpow2.f32 %v3621_v49  ;;  %v3257_v41 = vadd.f32 %v7512_v14, %v3096_v53 }
 0x31e   :  { %v5496_v15 = vpop.eup %5495  ;;  %4136 = vst.msk [vmem:[%s7854_s7 + $0x300] sm:$0xff] %vm4039_vm4, %v5494_v13  ;;  %5521 = vrcp.f32 %v3758_v26  ;;  %v3625_v21 = vmul.f32 1.442695, %v3384_v27  ;;  %v3099_v37 = vpop.xlane.xlu1 %3098 }
 0x31f   :  { %v5498_v59 = vpop.eup %5497  ;;  %5523 = vrcp.f32 %v3759_v29  ;;  %v3760_v57 = vadd.f32 1.0, %v5496_v15  ;;  %v3385_v31 = vsub.f32 0.0, %v3257_v41  ;;  %v3258_v43 = vadd.f32 %v7512_v14, %v3099_v37 }
 0x320   :  { %v5500_v12 = vpop.eup %5499  ;;  %v3761_v40 = vadd.f32 1.0, %v5498_v59  ;;  %5525 = vpow2.f32 %v3623_v5  ;;  %v3102_v51 = vpop.xlane.xlu0 %3101 }
 0x321   :  { %v5502_v56 = vpop.eup %5501  ;;  %4137 = vst.msk [vmem:[%s7854_s7 + $0x308] sm:$0xff] %vm4039_vm4, %v5500_v12  ;;  %5527 = vrcp.f32 %v3760_v57  ;;  %v3627_v34 = vmul.f32 1.442695, %v3385_v31  ;;  %v3386_v8 = vsub.f32 0.0, %v3258_v43  ;;  %v3259_v61 = vadd.f32 %v7512_v14, %v3102_v51 }
 0x322   :  { %v5504_v25 = vpop.eup %5503  ;;  %4138 = vst.msk [vmem:[%s7854_s7 + $0x310] sm:$0xff] %vm4039_vm4, %v5502_v56  ;;  %5529 = vrcp.f32 %v3761_v40 }
 0x323   :  { %v5506_v20 = vpop.eup %5505  ;;  %v3762_v35 = vadd.f32 1.0, %v5504_v25  ;;  %5531 = vpow2.f32 %v3625_v21  ;;  %v3629_v54 = vmul.f32 1.442695, %v3386_v8  ;;  %v3387_v52 = vsub.f32 0.0, %v3259_v61 }
 0x324   :  { %v5508_v4 = vpop.eup %5507  ;;  %4139 = vst.msk [vmem:[%s7854_s7 + $0x318] sm:$0xff] %vm4039_vm4, %v5506_v20  ;;  %5533 = vpow2.f32 %v3627_v34  ;;  %v3105_v6 = vpop.xlane.xlu1 %3104 }
 0x325   :  { %v5510_v9 = vpop.eup %5509  ;;  %5535 = vrcp.f32 %v3762_v35  ;;  %v3763_v11 = vadd.f32 1.0, %v5508_v4  ;;  %v3631_v2 = vmul.f32 1.442695, %v3387_v52  ;;  %v3260_v18 = vadd.f32 %v7512_v14, %v3105_v6 }
 0x326   :  { %v5512_v44 = vpop.eup %5511  ;;  %4140 = vst.msk [vmem:[%s7854_s7 + $0x320] sm:$0xff] %vm4039_vm4, %v5510_v9  ;;  %5537 = vpow2.f32 %v3629_v54  ;;  %v3108_v1 = vpop.xlane.xlu0 %3107 }
 0x327   :  { %v5514_v58 = vpop.eup %5513  ;;  %5539 = vrcp.f32 %v3763_v11  ;;  %v3764_v63 = vadd.f32 1.0, %v5512_v44  ;;  %v3388_v28 = vsub.f32 0.0, %v3260_v18  ;;  %v3261_v17 = vadd.f32 %v7512_v14, %v3108_v1 }
 0x328   :  { %v5516_v42 = vpop.eup %5515  ;;  %4141 = vst.msk [vmem:[%s7854_s7 + $0x328] sm:$0xff] %vm4039_vm4, %v5514_v58  ;;  %5541 = vpow2.f32 %v3631_v2  ;;  %v3111_v7 = vpop.xlane.xlu1 %3110 }
 0x329   :  { %v5518_v19 = vpop.eup %5517  ;;  %5543 = vrcp.f32 %v3764_v63  ;;  %v3765_v55 = vadd.f32 1.0, %v5516_v42  ;;  %v3633_v33 = vmul.f32 1.442695, %v3388_v28  ;;  %v3389_v30 = vsub.f32 0.0, %v3261_v17 }
 0x32a   :  { %v5520_v46 = vpop.eup %5519  ;;  %4142 = vst.msk [vmem:[%s7854_s7 + $0x330] sm:$0xff] %vm4039_vm4, %v5518_v19  ;;  %v3262_v47 = vadd.f32 %v7512_v14, %v3111_v7  ;;  %v3114_v48 = vpop.xlane.xlu0 %3113 }
 0x32b   :  { %v5522_v0 = vpop.eup %5521  ;;  %5545 = vrcp.f32 %v3765_v55  ;;  %v3766_v24 = vadd.f32 1.0, %v5520_v46  ;;  %v3635_v60 = vmul.f32 1.442695, %v3389_v30  ;;  %v3263_v16 = vadd.f32 %v7512_v14, %v3114_v48 }
 0x32c   :  { %v5524_v50 = vpop.eup %5523  ;;  %4143 = vst.msk [vmem:[%s7854_s7 + $0x338] sm:$0xff] %vm4039_vm4, %v5522_v0  ;;  %5547 = vpow2.f32 %v3633_v33  ;;  %v3390_v32 = vsub.f32 0.0, %v3262_v47 }
 0x32d   :  { %v5526_v3 = vpop.eup %5525  ;;  %4144 = vst.msk [vmem:[%s7854_s7 + $0x340] sm:$0xff] %vm4039_vm4, %v5524_v50  ;;  %5549 = vrcp.f32 %v3766_v24  ;;  %v3391_v45 = vsub.f32 0.0, %v3263_v16  ;;  %v3117_v49 = vpop.xlane.xlu1 %3116 }
 0x32e   :  { %v5528_v38 = vpop.eup %5527  ;;  %v3767_v22 = vadd.f32 1.0, %v5526_v3  ;;  %5551 = vpow2.f32 %v3635_v60  ;;  %v3637_v62 = vmul.f32 1.442695, %v3390_v32  ;;  %v3264_v23 = vadd.f32 %v7512_v14, %v3117_v49 }
 0x32f   :  { %v5530_v10 = vpop.eup %5529  ;;  %4145 = vst.msk [vmem:[%s7854_s7 + $0x348] sm:$0xff] %vm4039_vm4, %v5528_v38  ;;  %v3639_v39 = vmul.f32 1.442695, %v3391_v45  ;;  %v3120_v36 = vpop.xlane.xlu0 %3119 }
 0x330   :  { %v5532_v26 = vpop.eup %5531  ;;  %4146 = vst.msk [vmem:[%s7854_s7 + $0x350] sm:$0xff] %vm4039_vm4, %v5530_v10  ;;  %5553 = vrcp.f32 %v3767_v22  ;;  %v3392_v5 = vsub.f32 0.0, %v3264_v23  ;;  %v3265_v27 = vadd.f32 %v7512_v14, %v3120_v36 }
 0x331   :  { %v5534_v53 = vpop.eup %5533  ;;  %v3768_v13 = vadd.f32 1.0, %v5532_v26  ;;  %5555 = vpow2.f32 %v3637_v62  ;;  %v3123_v29 = vpop.xlane.xlu1 %3122 }
 0x332   :  { %v5536_v41 = vpop.eup %5535  ;;  %v3769_v15 = vadd.f32 1.0, %v5534_v53  ;;  %5557 = vpow2.f32 %v3639_v39  ;;  %v3641_v21 = vmul.f32 1.442695, %v3392_v5  ;;  %v3393_v37 = vsub.f32 0.0, %v3265_v27 }
 0x333   :  { %v5538_v59 = vpop.eup %5537  ;;  %4147 = vst.msk [vmem:[%s7854_s7 + $0x358] sm:$0xff] %vm4039_vm4, %v5536_v41  ;;  %5559 = vrcp.f32 %v3768_v13  ;;  %v3266_v57 = vadd.f32 %v7512_v14, %v3123_v29  ;;  %v3126_v31 = vpop.xlane.xlu0 %3125 }
 0x334   :  { %v5540_v43 = vpop.eup %5539  ;;  %5561 = vrcp.f32 %v3769_v15  ;;  %v3770_v12 = vadd.f32 1.0, %v5538_v59  ;;  %v3643_v40 = vmul.f32 1.442695, %v3393_v37  ;;  %v3267_v51 = vadd.f32 %v7512_v14, %v3126_v31 }
 0x335   :  { %v5542_v56 = vpop.eup %5541  ;;  %4148 = vst.msk [vmem:[%s7854_s7 + $0x360] sm:$0xff] %vm4039_vm4, %v5540_v43  ;;  %5563 = vpow2.f32 %v3641_v21  ;;  %v3394_v34 = vsub.f32 0.0, %v3266_v57  ;;  %v3129_v8 = vpop.xlane.xlu1 %3128 }
 0x336   :  { %v5544_v61 = vpop.eup %5543  ;;  %5565 = vrcp.f32 %v3770_v12  ;;  %v3771_v25 = vadd.f32 1.0, %v5542_v56  ;;  %v3395_v20 = vsub.f32 0.0, %v3267_v51  ;;  %v3268_v35 = vadd.f32 %v7512_v14, %v3129_v8 }
 0x337   :  { %4149 = vst.msk [vmem:[%s7854_s7 + $0x368] sm:$0xff] %vm4039_vm4, %v5544_v61  ;;  %5567 = vpow2.f32 %v3643_v40  ;;  %v3645_v54 = vmul.f32 1.442695, %v3394_v34  ;;  %v3132_v52 = vpop.xlane.xlu0 %3131 }
 0x338   :  { %v5546_v4 = vpop.eup %5545  ;;  %5569 = vrcp.f32 %v3771_v25  ;;  %v3647_v6 = vmul.f32 1.442695, %v3395_v20  ;;  %v3396_v9 = vsub.f32 0.0, %v3268_v35  ;;  %v3269_v11 = vadd.f32 %v7512_v14, %v3132_v52  ;;  %v5610_v14 = vld [vmem:[#allocation2] ss:$0 sm:$0xff] }
 0x339   :  { %v5548_v2 = vpop.eup %5547  ;;  %4150 = vst.msk [vmem:[%s7854_s7 + $0x370] sm:$0xff] %vm4039_vm4, %v5546_v4  ;;  %5571 = vpow2.f32 %v3645_v54  ;;  %v3135_v18 = vpop.xlane.xlu1 %3134 }
 0x33a   :  { %v5550_v44 = vpop.eup %5549  ;;  %v3772_v1 = vadd.f32 1.0, %v5548_v2  ;;  %5573 = vpow2.f32 %v3647_v6  ;;  %v3649_v58 = vmul.f32 1.442695, %v3396_v9  ;;  %v3397_v63 = vsub.f32 0.0, %v3269_v11 }
 0x33b   :  { %v5552_v28 = vpop.eup %5551  ;;  %4151 = vst.msk [vmem:[%s7854_s7 + $0x378] sm:$0xff] %vm4039_vm4, %v5550_v44  ;;  %v3270_v17 = vadd.f32 %v5610_v14, %v3135_v18 }
 0x33c   :  { %5575 = vrcp.f32 %v3772_v1  ;;  %v3773_v42 = vadd.f32 1.0, %v5552_v28  ;;  %v3651_v7 = vmul.f32 1.442695, %v3397_v63 }
 0x33d   :  { %v5554_v19 = vpop.eup %5553  ;;  %5577 = vpow2.f32 %v3649_v58  ;;  %v3398_v55 = vsub.f32 0.0, %v3270_v17 }
 0x33e   :  { %v5556_v33 = vpop.eup %5555  ;;  %4152 = vst.msk [vmem:[%s7854_s7 + $0x380] sm:$0xff] %vm4039_vm4, %v5554_v19  ;;  %5579 = vrcp.f32 %v3773_v42 }
 0x33f   :  { %v5558_v30 = vpop.eup %5557  ;;  %v3774_v46 = vadd.f32 1.0, %v5556_v33  ;;  %5581 = vpow2.f32 %v3651_v7  ;;  %v3653_v47 = vmul.f32 1.442695, %v3398_v55 }
 0x340   :  { %v5560_v48 = vpop.eup %5559  ;;  %v3775_v0 = vadd.f32 1.0, %v5558_v30 }
 0x341   :  { %v5562_v24 = vpop.eup %5561  ;;  %4153 = vst.msk [vmem:[%s7854_s7 + $0x388] sm:$0xff] %vm4039_vm4, %v5560_v48  ;;  %5583 = vrcp.f32 %v3774_v46 }
 0x342   :  { %v5564_v60 = vpop.eup %5563  ;;  %4154 = vst.msk [vmem:[%s7854_s7 + $0x390] sm:$0xff] %vm4039_vm4, %v5562_v24  ;;  %5585 = vrcp.f32 %v3775_v0 }
 0x343   :  { %v5566_v16 = vpop.eup %5565  ;;  %v3776_v50 = vadd.f32 1.0, %v5564_v60  ;;  %5587 = vpow2.f32 %v3653_v47 }
 0x344   :  { %v5568_v32 = vpop.eup %5567  ;;  %4155 = vst.msk [vmem:[%s7854_s7 + $0x398] sm:$0xff] %vm4039_vm4, %v5566_v16 }
 0x345   :  { %v5570_v3 = vpop.eup %5569  ;;  %5589 = vrcp.f32 %v3776_v50  ;;  %v3777_v45 = vadd.f32 1.0, %v5568_v32 }
 0x346   :  { %v5572_v49 = vpop.eup %5571  ;;  %4156 = vst.msk [vmem:[%s7854_s7 + $0x3a0] sm:$0xff] %vm4039_vm4, %v5570_v3 }
 0x347   :  { %v5574_v38 = vpop.eup %5573  ;;  %5591 = vrcp.f32 %v3777_v45  ;;  %v3778_v22 = vadd.f32 1.0, %v5572_v49 }
 0x348   :  { %v3779_v62 = vadd.f32 1.0, %v5574_v38 }
 0x349   :  { %v5576_v23 = vpop.eup %5575  ;;  %5593 = vrcp.f32 %v3778_v22 }
 0x34a   :  { %v5578_v10 = vpop.eup %5577  ;;  %4157 = vst.msk [vmem:[%s7854_s7 + $0x3a8] sm:$0xff] %vm4039_vm4, %v5576_v23  ;;  %5595 = vrcp.f32 %v3779_v62 }
 0x34b   :  { %v5580_v39 = vpop.eup %5579  ;;  %v3780_v36 = vadd.f32 1.0, %v5578_v10 }
 0x34c   :  { %v5582_v26 = vpop.eup %5581  ;;  %4158 = vst.msk [vmem:[%s7854_s7 + $0x3b0] sm:$0xff] %vm4039_vm4, %v5580_v39 }
 0x34d   :  { %5597 = vrcp.f32 %v3780_v36  ;;  %v3781_v5 = vadd.f32 1.0, %v5582_v26 }
 0x34e   :  { %v5584_v27 = vpop.eup %5583 }
 0x34f   :  { %v5586_v53 = vpop.eup %5585  ;;  %4159 = vst.msk [vmem:[%s7854_s7 + $0x3b8] sm:$0xff] %vm4039_vm4, %v5584_v27  ;;  %5599 = vrcp.f32 %v3781_v5 }
 0x350   :  { %v5588_v13 = vpop.eup %5587  ;;  %4160 = vst.msk [vmem:[%s7854_s7 + $0x3c0] sm:$0xff] %vm4039_vm4, %v5586_v53 }
 0x351   :  { %v3782_v29 = vadd.f32 1.0, %v5588_v13 }
 0x352   :  { %v5590_v41 = vpop.eup %5589 }
 0x353   :  { %4161 = vst.msk [vmem:[%s7854_s7 + $0x3c8] sm:$0xff] %vm4039_vm4, %v5590_v41  ;;  %5601 = vrcp.f32 %v3782_v29 }
 0x354   :  { %v5592_v15 = vpop.eup %5591 }
 0x355   :  { %4162 = vst.msk [vmem:[%s7854_s7 + $0x3d0] sm:$0xff] %vm4039_vm4, %v5592_v15 }
 0x356   :  { %v5594_v21 = vpop.eup %5593 }
 0x357   :  { %v5596_v37 = vpop.eup %5595  ;;  %4163 = vst.msk [vmem:[%s7854_s7 + $0x3d8] sm:$0xff] %vm4039_vm4, %v5594_v21 }
 0x358   :  { %4164 = vst.msk [vmem:[%s7854_s7 + $0x3e0] sm:$0xff] %vm4039_vm4, %v5596_v37 }
 0x35a   :  { %v5598_v59 = vpop.eup %5597 }
 0x35b   :  { %4165 = vst.msk [vmem:[%s7854_s7 + $0x3e8] sm:$0xff] %vm4039_vm4, %v5598_v59 }
 0x35c   :  { %v5600_v57 = vpop.eup %5599 }
 0x35d   :  { %4166 = vst.msk [vmem:[%s7854_s7 + $0x3f0] sm:$0xff] %vm4039_vm4, %v5600_v57 }
 0x360   :  { %v5602_v31 = vpop.eup %5601 }
 0x361   :  { %4167 = vst.msk [vmem:[%s7854_s7 + $0x3f8] sm:$0xff] %vm4039_vm4, %v5602_v31 }

</bundles_post_ra>
